<compile_context>
chip_gen: v7x
topology: tpu7x:2x2x1
jax: 0.10.0
libtpu: 0.0.40
codegen_flags: <defaults>
</compile_context>

<pallas_src>
import jax
import jax.numpy as jnp
from jax.experimental import pallas as pl
from jax.experimental.pallas import tpu as pltpu

# ----------------- small synthetic config (same forward semantics as vit_base) --------
IMG = 16          # spatial size
PATCH = 8         # patch size (Conv2d kernel == stride)
IN_CHANS = 3
EMBED_DIM = 32    # features_dim
DEPTH = 2         # transformer blocks
NUM_HEADS = 4
MLP_RATIO = 4
OUT_SIZE = 5      # classifier out_size
LN_EPS = 1e-6     # timm ViT LayerNorm eps

NUM_PATCHES = (IMG // PATCH) ** 2
SEQ = NUM_PATCHES + 1          # real tokens (cls + patches)
S_PAD = 8                      # padded to one f32 sublane tile
HEAD_DIM = EMBED_DIM // NUM_HEADS
PIX = IN_CHANS * IMG * IMG     # pixels per image (flattened NCHW)


# ----------------- in-kernel helpers ---------------------------------------------------
def _layernorm(x, w, b):
    mu = jnp.mean(x, axis=-1, keepdims=True)
    var = jnp.mean((x - mu) ** 2, axis=-1, keepdims=True)
    return (x - mu) * jax.lax.rsqrt(var + LN_EPS) * w + b


def _gelu(x):
    # TODO(synk): timm ViT uses exact erf GELU; tanh approximation used for robust
    # Mosaic lowering (tiny numerical difference, no checkpoint to match).
    c = jnp.float32(0.7978845608028654)  # sqrt(2/pi)
    return 0.5 * x * (1.0 + jnp.tanh(c * (x + 0.044715 * (x * x * x))))


# ----------------- single fused Pallas kernel ------------------------------------------
def vit_fused_kernel(x_ref, wpix_ref, sel_ref, addrows_ref,
                     ln1w_ref, ln1b_ref,
                     qw_ref, qb_ref, kw_ref, kb_ref, vw_ref, vb_ref,
                     projw_ref, projb_ref,
                     ln2w_ref, ln2b_ref,
                     fc1w_ref, fc1b_ref, fc2w_ref, fc2b_ref,
                     normw_ref, normb_ref, clsw_ref, clsb_ref,
                     o_ref):
    f32 = jnp.float32
    bf16 = jnp.bfloat16
    D = EMBED_DIM
    H = NUM_HEADS
    B = x_ref.shape[0]
    BS = B * S_PAD
    scale = f32(1.0 / (HEAD_DIM ** 0.5))

    # additive key-padding mask: 0 for real tokens, -1e30 for the padded key slots
    key_idx = jax.lax.broadcasted_iota(jnp.int32, (1, 1, S_PAD), 2)
    kmask = jnp.where(key_idx < SEQ, 0.0, -1e30).astype(f32)

    def gbc(t):
        # broadcast a per-head (H, ...) tensor to per-(batch, head) (B*H, ...)
        return jnp.broadcast_to(t[None], (B,) + t.shape).reshape((B * H,) + t.shape[1:])

    # ---- patch embedding + padded token slab ----
    # sel selects the pixels feeding each (padded) token slot; wpix maps every pixel to
    # its Conv2d weight row.  cls/pos/conv-bias terms are pre-summed into addrows
    # (rows >= SEQ are zero, so padded token rows start exactly at zero).
    xm = (x_ref[...].reshape(B, 1, PIX) * sel_ref[...]).reshape(BS, PIX).astype(bf16)
    emb = jnp.dot(xm, wpix_ref[...], preferred_element_type=f32)          # (B*S_PAD, D)
    x = (emb.reshape(B, S_PAD, D) + addrows_ref[...]).reshape(BS, D)      # f32 residual

    # ---- transformer blocks (all weights VMEM-resident, static DEPTH loop) ----
    for dep in range(DEPTH):
        # multi-head self-attention (pre-norm, residual), heads batched over g=(b, h)
        h = _layernorm(x, ln1w_ref[dep], ln1b_ref[dep])
        hg = jnp.broadcast_to(h.astype(bf16).reshape(B, 1, S_PAD, D),
                              (B, H, S_PAD, D)).reshape(B * H, S_PAD, D)

        qh = (jnp.einsum('gse,ged->gsd', hg, gbc(qw_ref[dep]),
                         preferred_element_type=f32) + gbc(qb_ref[dep])).astype(bf16)
        kh = (jnp.einsum('gse,ged->gsd', hg, gbc(kw_ref[dep]),
                         preferred_element_type=f32) + gbc(kb_ref[dep])).astype(bf16)
        vh = (jnp.einsum('gse,ged->gsd', hg, gbc(vw_ref[dep]),
                         preferred_element_type=f32) + gbc(vb_ref[dep])).astype(bf16)

        logits = jnp.einsum('gsd,gtd->gst', qh, kh,
                            preferred_element_type=f32) * scale + kmask   # (B*H, S, S)
        m = jnp.max(logits, axis=-1, keepdims=True)
        p = jnp.exp(logits - m)
        p = p * pl.reciprocal(jnp.sum(p, axis=-1, keepdims=True), approx=True)
        oh = jnp.einsum('gst,gtd->gsd', p.astype(bf16), vh,
                        preferred_element_type=f32)                        # (B*H, S, dh)
        contrib = jnp.einsum('gsd,gdf->gsf', oh.astype(bf16), gbc(projw_ref[dep]),
                             preferred_element_type=f32)                   # (B*H, S, D)
        attn = contrib.reshape(B, H, S_PAD, D).sum(axis=1).reshape(BS, D)
        x = x + attn + projb_ref[dep]

        # MLP (pre-norm, residual)
        h = _layernorm(x, ln2w_ref[dep], ln2b_ref[dep])
        h = jnp.dot(h.astype(bf16), fc1w_ref[dep],
                    preferred_element_type=f32) + fc1b_ref[dep]
        h = _gelu(h)
        h = jnp.dot(h.astype(bf16), fc2w_ref[dep],
                    preferred_element_type=f32) + fc2b_ref[dep]
        x = x + h

    # ---- head: final LN on the (tile-aligned) cls rows + classifier + sigmoid ----
    cls_tok = x.reshape(B, S_PAD, D)[:, 0:1, :].reshape(B, D)
    hn = _layernorm(cls_tok, normw_ref[...], normb_ref[...])
    logits = jnp.dot(hn.astype(bf16), clsw_ref[...],
                     preferred_element_type=f32) + clsb_ref[...]
    o_ref[...] = 1.0 / (1.0 + jnp.exp(-logits))   # exact sigmoid keeps output in [0, 1]


# ----------------- parameters (deterministic synthetic init, depth-stacked) ------------
def init_params(key):
    D, H, dh = EMBED_DIM, NUM_HEADS, HEAD_DIM
    gp = IMG // PATCH
    hidden = MLP_RATIO * D
    bf16 = jnp.bfloat16

    def nrm(k, shape, scale=0.02):
        return (scale * jax.random.normal(k, shape)).astype(jnp.float32)

    ks = iter(jax.random.split(key, 20))

    # Conv2d(kernel=stride=PATCH) patch embedding; weight rows flattened (c, ph, pw)
    patch_w = nrm(next(ks), (IN_CHANS * PATCH * PATCH, D))
    patch_b = nrm(next(ks), (D,))
    cls_tok = nrm(next(ks), (D,))
    pos = nrm(next(ks), (SEQ, D))

    # Per-pixel weight: pixel (c, i, ph, j, pw) -> conv weight row (c, ph, pw).
    pw4 = patch_w.reshape(IN_CHANS, PATCH, PATCH, D)
    w_pix = jnp.broadcast_to(pw4[:, None, :, None, :, :],
                             (IN_CHANS, gp, PATCH, gp, PATCH, D))
    w_pix = w_pix.reshape(PIX, D).astype(bf16)

    # sel[s, pixel] = 1 iff the pixel belongs to the patch feeding (padded) token slot s
    # (slot 0 = cls, slots >= SEQ = padding stay all-zero).
    sel = jnp.zeros((S_PAD, IN_CHANS, gp, PATCH, gp, PATCH), jnp.float32)
    for i in range(gp):
        for j in range(gp):
            sel = sel.at[1 + i * gp + j, :, i, :, j, :].set(1.0)
    sel = sel.reshape(S_PAD, PIX)

    # Precomputed additive token rows: cls+pos[0] | pos[1:]+conv bias | zeros (padding).
    add_rows = jnp.zeros((S_PAD, D), jnp.float32)
    add_rows = add_rows.at[0].set(cls_tok + pos[0])
    add_rows = add_rows.at[1:SEQ].set(pos[1:SEQ] + patch_b[None, :])

    def head_major_w(k):   # (DEPTH, D, D) with output cols (h, dh) -> (DEPTH, H, D, dh)
        w = nrm(k, (DEPTH, D, D))
        return w.reshape(DEPTH, D, H, dh).transpose(0, 2, 1, 3).astype(bf16)

    def head_major_b(k):   # (DEPTH, D) -> (DEPTH, H, 1, dh)
        return nrm(k, (DEPTH, D)).reshape(DEPTH, H, 1, dh)

    return {
        "w_pix": w_pix,
        "sel": sel,
        "add_rows": add_rows,
        "ln1_w": jnp.ones((DEPTH, 1, D), jnp.float32),
        "ln1_b": jnp.zeros((DEPTH, 1, D), jnp.float32),
        "q_w": head_major_w(next(ks)), "q_b": head_major_b(next(ks)),
        "k_w": head_major_w(next(ks)), "k_b": head_major_b(next(ks)),
        "v_w": head_major_w(next(ks)), "v_b": head_major_b(next(ks)),
        # proj input rows are the concatenated heads (h, dh): a pure reshape is head-major
        "proj_w": nrm(next(ks), (DEPTH, D, D)).reshape(DEPTH, H, dh, D).astype(bf16),
        "proj_b": nrm(next(ks), (DEPTH, 1, D)),
        "ln2_w": jnp.ones((DEPTH, 1, D), jnp.float32),
        "ln2_b": jnp.zeros((DEPTH, 1, D), jnp.float32),
        "fc1_w": nrm(next(ks), (DEPTH, D, hidden)).astype(bf16),
        "fc1_b": nrm(next(ks), (DEPTH, 1, hidden)),
        "fc2_w": nrm(next(ks), (DEPTH, hidden, D)).astype(bf16),
        "fc2_b": nrm(next(ks), (DEPTH, 1, D)),
        "norm_w": jnp.ones((1, D), jnp.float32),
        "norm_b": jnp.zeros((1, D), jnp.float32),
        "cls_w": nrm(next(ks), (D, OUT_SIZE)).astype(bf16),
        "cls_b": nrm(next(ks), (1, OUT_SIZE)),
    }


# ----------------- forward pass: one pallas_call for the whole model -------------------
def vit_forward(params, x):
    B = x.shape[0]
    # The Conv2d im2col permutation is folded into (w_pix, sel) at init, so the only
    # host-side op is a free contiguous reshape of the NCHW input — no transpose dispatch.
    x_flat = x.reshape(B, PIX)

    args = (
        x_flat, params["w_pix"], params["sel"], params["add_rows"],
        params["ln1_w"], params["ln1_b"],
        params["q_w"], params["q_b"], params["k_w"], params["k_b"],
        params["v_w"], params["v_b"],
        params["proj_w"], params["proj_b"],
        params["ln2_w"], params["ln2_b"],
        params["fc1_w"], params["fc1_b"], params["fc2_w"], params["fc2_b"],
        params["norm_w"], params["norm_b"], params["cls_w"], params["cls_b"],
    )
    # Whole model (<0.3 MB weights + a few KB activations) lives in VMEM, so a single
    # gridless call is the right macro-structure at this size.
    # TODO(synk): at real ViT scale (D=768, S=197, depth=12) add a grid over depth
    #   (stacked bf16 weights + index_map) and token tiles; on v7x budget for 64 MiB VMEM
    #   (bf16 weights, pl.Buffered(1) on weight specs, explicit vmem_limit_bytes) and, for
    #   larger batches, a batch-parallel grid axis ("parallel") for the two TensorCores.
    return pl.pallas_call(
        vit_fused_kernel,
        out_shape=jax.ShapeDtypeStruct((B, OUT_SIZE), jnp.float32),
        in_specs=[pl.BlockSpec(memory_space=pltpu.MemorySpace.VMEM)] * len(args),
        out_specs=pl.BlockSpec(memory_space=pltpu.MemorySpace.VMEM),
    )(*args)


if __name__ == "__main__":
    key = jax.random.PRNGKey(0)
    k_param, k_x = jax.random.split(key)
    params = init_params(k_param)
    x = jax.random.normal(k_x, (2, IN_CHANS, IMG, IMG), dtype=jnp.float32)

    fwd = jax.jit(vit_forward)
    y = jax.block_until_ready(fwd(params, x))

    assert y.shape == (2, OUT_SIZE), y.shape
    assert bool(jnp.all(jnp.isfinite(y)))
    assert bool(jnp.all((y >= 0.0) & (y <= 1.0)))   # sigmoid output range
    print("KERNEL_OK")
</pallas_src>

<mosaic_0001>
module attributes {stable_mosaic.version = 11 : i64} {
  func.func @vit_fused_kernel(%arg0: memref<2x768xf32, #tpu.memory_space<vmem>>, %arg1: memref<768x32xbf16, #tpu.memory_space<vmem>>, %arg2: memref<8x768xf32, #tpu.memory_space<vmem>>, %arg3: memref<8x32xf32, #tpu.memory_space<vmem>>, %arg4: memref<2x1x32xf32, #tpu.memory_space<vmem>>, %arg5: memref<2x1x32xf32, #tpu.memory_space<vmem>>, %arg6: memref<2x4x32x8xbf16, #tpu.memory_space<vmem>>, %arg7: memref<2x4x1x8xf32, #tpu.memory_space<vmem>>, %arg8: memref<2x4x32x8xbf16, #tpu.memory_space<vmem>>, %arg9: memref<2x4x1x8xf32, #tpu.memory_space<vmem>>, %arg10: memref<2x4x32x8xbf16, #tpu.memory_space<vmem>>, %arg11: memref<2x4x1x8xf32, #tpu.memory_space<vmem>>, %arg12: memref<2x4x8x32xbf16, #tpu.memory_space<vmem>>, %arg13: memref<2x1x32xf32, #tpu.memory_space<vmem>>, %arg14: memref<2x1x32xf32, #tpu.memory_space<vmem>>, %arg15: memref<2x1x32xf32, #tpu.memory_space<vmem>>, %arg16: memref<2x32x128xbf16, #tpu.memory_space<vmem>>, %arg17: memref<2x1x128xf32, #tpu.memory_space<vmem>>, %arg18: memref<2x128x32xbf16, #tpu.memory_space<vmem>>, %arg19: memref<2x1x32xf32, #tpu.memory_space<vmem>>, %arg20: memref<1x32xf32, #tpu.memory_space<vmem>>, %arg21: memref<1x32xf32, #tpu.memory_space<vmem>>, %arg22: memref<32x5xbf16, #tpu.memory_space<vmem>>, %arg23: memref<1x5xf32, #tpu.memory_space<vmem>>, %arg24: memref<2x5xf32, #tpu.memory_space<vmem>>) attributes {dimension_semantics = [], scalar_prefetch = 0 : i64, scratch_operands = 0 : i64, tpu.core_type = #tpu.core_type<tc>} {
    %0 = tpu.iota {dimensions = array<i32: 2>} : vector<1x1x8xi32>
    %c5_i32 = arith.constant 5 : i32
    %1 = vector.broadcast %c5_i32 : i32 to vector<1x1x8xi32>
    %2 = arith.cmpi slt, %0, %1 : vector<1x1x8xi32>
    %cst = arith.constant 0.000000e+00 : f32
    %cst_0 = arith.constant -1.000000e+30 : f32
    %3 = vector.broadcast %cst : f32 to vector<1x1x8xf32>
    %4 = vector.broadcast %cst_0 : f32 to vector<1x1x8xf32>
    %5 = arith.select %2, %3, %4 : vector<1x1x8xi1>, vector<1x1x8xf32>
    %c0 = arith.constant 0 : index
    %c0_1 = arith.constant 0 : index
    %6 = vector.load %arg0[%c0, %c0_1] : memref<2x768xf32, #tpu.memory_space<vmem>>, vector<2x768xf32>
    %7 = vector.shape_cast %6 : vector<2x768xf32> to vector<2x1x768xf32>
    %c0_2 = arith.constant 0 : index
    %c0_3 = arith.constant 0 : index
    %8 = vector.load %arg2[%c0_2, %c0_3] : memref<8x768xf32, #tpu.memory_space<vmem>>, vector<8x768xf32>
    %9 = vector.shape_cast %8 : vector<8x768xf32> to vector<1x8x768xf32>
    %10 = vector.broadcast %7 : vector<2x1x768xf32> to vector<2x8x768xf32>
    %11 = vector.broadcast %9 : vector<1x8x768xf32> to vector<2x8x768xf32>
    %12 = arith.mulf %10, %11 : vector<2x8x768xf32>
    %13 = vector.shape_cast %12 : vector<2x8x768xf32> to vector<16x768xf32>
    %14 = arith.truncf %13 : vector<16x768xf32> to vector<16x768xbf16>
    %c0_4 = arith.constant 0 : index
    %c0_5 = arith.constant 0 : index
    %15 = vector.load %arg1[%c0_4, %c0_5] : memref<768x32xbf16, #tpu.memory_space<vmem>>, vector<768x32xbf16>
    %cst_6 = arith.constant dense<0.000000e+00> : vector<16x32xf32>
    %16 = tpu.matmul %14, %15, %cst_6 {dimension_numbers = #tpu.dot_dimension_numbers<[1], [0], [0], [1], [0, 0, 1, 1], [], []>} : vector<16x768xbf16>, vector<768x32xbf16>, vector<16x32xf32> -> vector<16x32xf32>
    %17 = vector.shape_cast %16 : vector<16x32xf32> to vector<2x8x32xf32>
    %c0_7 = arith.constant 0 : index
    %c0_8 = arith.constant 0 : index
    %18 = vector.load %arg3[%c0_7, %c0_8] : memref<8x32xf32, #tpu.memory_space<vmem>>, vector<8x32xf32>
    %19 = vector.shape_cast %18 : vector<8x32xf32> to vector<1x8x32xf32>
    %20 = vector.broadcast %19 : vector<1x8x32xf32> to vector<2x8x32xf32>
    %21 = arith.addf %17, %20 : vector<2x8x32xf32>
    %22 = vector.shape_cast %21 : vector<2x8x32xf32> to vector<16x32xf32>
    %c0_9 = arith.constant 0 : index
    %c0_10 = arith.constant 0 : index
    %c0_11 = arith.constant 0 : index
    %23 = vector.load %arg4[%c0_9, %c0_10, %c0_11] : memref<2x1x32xf32, #tpu.memory_space<vmem>>, vector<1x1x32xf32>
    %24 = vector.shape_cast %23 : vector<1x1x32xf32> to vector<1x32xf32>
    %c0_12 = arith.constant 0 : index
    %c0_13 = arith.constant 0 : index
    %c0_14 = arith.constant 0 : index
    %25 = vector.load %arg5[%c0_12, %c0_13, %c0_14] : memref<2x1x32xf32, #tpu.memory_space<vmem>>, vector<1x1x32xf32>
    %26 = vector.shape_cast %25 : vector<1x1x32xf32> to vector<1x32xf32>
    %cst_15 = arith.constant dense<0.000000e+00> : vector<16xf32>
    %27 = vector.multi_reduction <add>, %22, %cst_15 [1] : vector<16x32xf32> to vector<16xf32>
    %28 = vector.shape_cast %27 : vector<16xf32> to vector<16x1xf32>
    %cst_16 = arith.constant 3.200000e+01 : f32
    %29 = vector.broadcast %cst_16 : f32 to vector<16x1xf32>
    %30 = arith.divf %28, %29 : vector<16x1xf32>
    %31 = vector.broadcast %30 : vector<16x1xf32> to vector<16x32xf32>
    %32 = arith.subf %22, %31 : vector<16x32xf32>
    %33 = arith.mulf %32, %32 : vector<16x32xf32>
    %cst_17 = arith.constant dense<0.000000e+00> : vector<16xf32>
    %34 = vector.multi_reduction <add>, %33, %cst_17 [1] : vector<16x32xf32> to vector<16xf32>
    %35 = vector.shape_cast %34 : vector<16xf32> to vector<16x1xf32>
    %cst_18 = arith.constant 3.200000e+01 : f32
    %36 = vector.broadcast %cst_18 : f32 to vector<16x1xf32>
    %37 = arith.divf %35, %36 : vector<16x1xf32>
    %38 = vector.broadcast %30 : vector<16x1xf32> to vector<16x32xf32>
    %39 = arith.subf %22, %38 : vector<16x32xf32>
    %cst_19 = arith.constant 9.99999997E-7 : f32
    %40 = vector.broadcast %cst_19 : f32 to vector<16x1xf32>
    %41 = arith.addf %37, %40 : vector<16x1xf32>
    %42 = math.rsqrt %41 : vector<16x1xf32>
    %43 = vector.broadcast %42 : vector<16x1xf32> to vector<16x32xf32>
    %44 = arith.mulf %39, %43 : vector<16x32xf32>
    %45 = vector.broadcast %24 : vector<1x32xf32> to vector<16x32xf32>
    %46 = arith.mulf %44, %45 : vector<16x32xf32>
    %47 = vector.broadcast %26 : vector<1x32xf32> to vector<16x32xf32>
    %48 = arith.addf %46, %47 : vector<16x32xf32>
    %49 = arith.truncf %48 : vector<16x32xf32> to vector<16x32xbf16>
    %50 = vector.shape_cast %49 : vector<16x32xbf16> to vector<2x1x8x32xbf16>
    %51 = vector.shape_cast %50 : vector<2x1x8x32xbf16> to vector<2x1x8x32xbf16>
    %52 = vector.broadcast %51 : vector<2x1x8x32xbf16> to vector<2x4x8x32xbf16>
    %53 = vector.shape_cast %52 : vector<2x4x8x32xbf16> to vector<8x8x32xbf16>
    %c0_20 = arith.constant 0 : index
    %c0_21 = arith.constant 0 : index
    %c0_22 = arith.constant 0 : index
    %c0_23 = arith.constant 0 : index
    %54 = vector.load %arg6[%c0_20, %c0_21, %c0_22, %c0_23] : memref<2x4x32x8xbf16, #tpu.memory_space<vmem>>, vector<1x4x32x8xbf16>
    %55 = vector.shape_cast %54 : vector<1x4x32x8xbf16> to vector<4x32x8xbf16>
    %56 = vector.shape_cast %55 : vector<4x32x8xbf16> to vector<1x4x32x8xbf16>
    %57 = vector.shape_cast %56 : vector<1x4x32x8xbf16> to vector<1x4x32x8xbf16>
    %58 = vector.broadcast %57 : vector<1x4x32x8xbf16> to vector<2x4x32x8xbf16>
    %59 = vector.shape_cast %58 : vector<2x4x32x8xbf16> to vector<8x32x8xbf16>
    "tpu.trace_start"() <{level = 10 : i32, message = "gse,ged->gsd"}> : () -> ()
    %cst_24 = arith.constant dense<0.000000e+00> : vector<8x8x8xf32>
    %60 = tpu.matmul %53, %59, %cst_24 {dimension_numbers = #tpu.dot_dimension_numbers<[2], [1], [1], [2], [0, 0, 0, 1, 1, 2], [0], [0]>} : vector<8x8x32xbf16>, vector<8x32x8xbf16>, vector<8x8x8xf32> -> vector<8x8x8xf32>
    "tpu.trace_stop"() : () -> ()
    %c0_25 = arith.constant 0 : index
    %c0_26 = arith.constant 0 : index
    %c0_27 = arith.constant 0 : index
    %c0_28 = arith.constant 0 : index
    %61 = vector.load %arg7[%c0_25, %c0_26, %c0_27, %c0_28] : memref<2x4x1x8xf32, #tpu.memory_space<vmem>>, vector<1x4x1x8xf32>
    %62 = vector.shape_cast %61 : vector<1x4x1x8xf32> to vector<4x1x8xf32>
    %63 = vector.shape_cast %62 : vector<4x1x8xf32> to vector<1x4x1x8xf32>
    %64 = vector.shape_cast %63 : vector<1x4x1x8xf32> to vector<1x4x1x8xf32>
    %65 = vector.broadcast %64 : vector<1x4x1x8xf32> to vector<2x4x1x8xf32>
    %66 = vector.shape_cast %65 : vector<2x4x1x8xf32> to vector<8x1x8xf32>
    %67 = vector.broadcast %66 : vector<8x1x8xf32> to vector<8x8x8xf32>
    %68 = arith.addf %60, %67 : vector<8x8x8xf32>
    %69 = arith.truncf %68 : vector<8x8x8xf32> to vector<8x8x8xbf16>
    %c0_29 = arith.constant 0 : index
    %c0_30 = arith.constant 0 : index
    %c0_31 = arith.constant 0 : index
    %c0_32 = arith.constant 0 : index
    %70 = vector.load %arg8[%c0_29, %c0_30, %c0_31, %c0_32] : memref<2x4x32x8xbf16, #tpu.memory_space<vmem>>, vector<1x4x32x8xbf16>
    %71 = vector.shape_cast %70 : vector<1x4x32x8xbf16> to vector<4x32x8xbf16>
    %72 = vector.shape_cast %71 : vector<4x32x8xbf16> to vector<1x4x32x8xbf16>
    %73 = vector.shape_cast %72 : vector<1x4x32x8xbf16> to vector<1x4x32x8xbf16>
    %74 = vector.broadcast %73 : vector<1x4x32x8xbf16> to vector<2x4x32x8xbf16>
    %75 = vector.shape_cast %74 : vector<2x4x32x8xbf16> to vector<8x32x8xbf16>
    "tpu.trace_start"() <{level = 10 : i32, message = "gse,ged->gsd"}> : () -> ()
    %cst_33 = arith.constant dense<0.000000e+00> : vector<8x8x8xf32>
    %76 = tpu.matmul %53, %75, %cst_33 {dimension_numbers = #tpu.dot_dimension_numbers<[2], [1], [1], [2], [0, 0, 0, 1, 1, 2], [0], [0]>} : vector<8x8x32xbf16>, vector<8x32x8xbf16>, vector<8x8x8xf32> -> vector<8x8x8xf32>
    "tpu.trace_stop"() : () -> ()
    %c0_34 = arith.constant 0 : index
    %c0_35 = arith.constant 0 : index
    %c0_36 = arith.constant 0 : index
    %c0_37 = arith.constant 0 : index
    %77 = vector.load %arg9[%c0_34, %c0_35, %c0_36, %c0_37] : memref<2x4x1x8xf32, #tpu.memory_space<vmem>>, vector<1x4x1x8xf32>
    %78 = vector.shape_cast %77 : vector<1x4x1x8xf32> to vector<4x1x8xf32>
    %79 = vector.shape_cast %78 : vector<4x1x8xf32> to vector<1x4x1x8xf32>
    %80 = vector.shape_cast %79 : vector<1x4x1x8xf32> to vector<1x4x1x8xf32>
    %81 = vector.broadcast %80 : vector<1x4x1x8xf32> to vector<2x4x1x8xf32>
    %82 = vector.shape_cast %81 : vector<2x4x1x8xf32> to vector<8x1x8xf32>
    %83 = vector.broadcast %82 : vector<8x1x8xf32> to vector<8x8x8xf32>
    %84 = arith.addf %76, %83 : vector<8x8x8xf32>
    %85 = arith.truncf %84 : vector<8x8x8xf32> to vector<8x8x8xbf16>
    %c0_38 = arith.constant 0 : index
    %c0_39 = arith.constant 0 : index
    %c0_40 = arith.constant 0 : index
    %c0_41 = arith.constant 0 : index
    %86 = vector.load %arg10[%c0_38, %c0_39, %c0_40, %c0_41] : memref<2x4x32x8xbf16, #tpu.memory_space<vmem>>, vector<1x4x32x8xbf16>
    %87 = vector.shape_cast %86 : vector<1x4x32x8xbf16> to vector<4x32x8xbf16>
    %88 = vector.shape_cast %87 : vector<4x32x8xbf16> to vector<1x4x32x8xbf16>
    %89 = vector.shape_cast %88 : vector<1x4x32x8xbf16> to vector<1x4x32x8xbf16>
    %90 = vector.broadcast %89 : vector<1x4x32x8xbf16> to vector<2x4x32x8xbf16>
    %91 = vector.shape_cast %90 : vector<2x4x32x8xbf16> to vector<8x32x8xbf16>
    "tpu.trace_start"() <{level = 10 : i32, message = "gse,ged->gsd"}> : () -> ()
    %cst_42 = arith.constant dense<0.000000e+00> : vector<8x8x8xf32>
    %92 = tpu.matmul %53, %91, %cst_42 {dimension_numbers = #tpu.dot_dimension_numbers<[2], [1], [1], [2], [0, 0, 0, 1, 1, 2], [0], [0]>} : vector<8x8x32xbf16>, vector<8x32x8xbf16>, vector<8x8x8xf32> -> vector<8x8x8xf32>
    "tpu.trace_stop"() : () -> ()
    %c0_43 = arith.constant 0 : index
    %c0_44 = arith.constant 0 : index
    %c0_45 = arith.constant 0 : index
    %c0_46 = arith.constant 0 : index
    %93 = vector.load %arg11[%c0_43, %c0_44, %c0_45, %c0_46] : memref<2x4x1x8xf32, #tpu.memory_space<vmem>>, vector<1x4x1x8xf32>
    %94 = vector.shape_cast %93 : vector<1x4x1x8xf32> to vector<4x1x8xf32>
    %95 = vector.shape_cast %94 : vector<4x1x8xf32> to vector<1x4x1x8xf32>
    %96 = vector.shape_cast %95 : vector<1x4x1x8xf32> to vector<1x4x1x8xf32>
    %97 = vector.broadcast %96 : vector<1x4x1x8xf32> to vector<2x4x1x8xf32>
    %98 = vector.shape_cast %97 : vector<2x4x1x8xf32> to vector<8x1x8xf32>
    %99 = vector.broadcast %98 : vector<8x1x8xf32> to vector<8x8x8xf32>
    %100 = arith.addf %92, %99 : vector<8x8x8xf32>
    %101 = arith.truncf %100 : vector<8x8x8xf32> to vector<8x8x8xbf16>
    "tpu.trace_start"() <{level = 10 : i32, message = "gsd,gtd->gst"}> : () -> ()
    %cst_47 = arith.constant dense<0.000000e+00> : vector<8x8x8xf32>
    %102 = tpu.matmul %69, %85, %cst_47 {dimension_numbers = #tpu.dot_dimension_numbers<[2], [2], [1], [1], [0, 0, 0, 1, 1, 1], [0], [0]>} : vector<8x8x8xbf16>, vector<8x8x8xbf16>, vector<8x8x8xf32> -> vector<8x8x8xf32>
    "tpu.trace_stop"() : () -> ()
    %cst_48 = arith.constant 0.353553385 : f32
    %103 = vector.broadcast %cst_48 : f32 to vector<8x8x8xf32>
    %104 = arith.mulf %102, %103 : vector<8x8x8xf32>
    %105 = vector.broadcast %5 : vector<1x1x8xf32> to vector<8x8x8xf32>
    %106 = arith.addf %104, %105 : vector<8x8x8xf32>
    %cst_49 = arith.constant dense<0xFF800000> : vector<8x8xf32>
    %107 = vector.multi_reduction <maximumf>, %106, %cst_49 [2] : vector<8x8x8xf32> to vector<8x8xf32>
    %108 = vector.shape_cast %107 : vector<8x8xf32> to vector<8x8x1xf32>
    %109 = vector.broadcast %108 : vector<8x8x1xf32> to vector<8x8x8xf32>
    %110 = arith.subf %106, %109 : vector<8x8x8xf32>
    %111 = math.exp %110 : vector<8x8x8xf32>
    %cst_50 = arith.constant dense<0.000000e+00> : vector<8x8xf32>
    %112 = vector.multi_reduction <add>, %111, %cst_50 [2] : vector<8x8x8xf32> to vector<8x8xf32>
    %113 = vector.shape_cast %112 : vector<8x8xf32> to vector<8x8x1xf32>
    %114 = tpu.reciprocal %113 {approx = true} : vector<8x8x1xf32> -> vector<8x8x1xf32>
    %115 = vector.broadcast %114 : vector<8x8x1xf32> to vector<8x8x8xf32>
    %116 = arith.mulf %111, %115 : vector<8x8x8xf32>
    %117 = arith.truncf %116 : vector<8x8x8xf32> to vector<8x8x8xbf16>
    "tpu.trace_start"() <{level = 10 : i32, message = "gst,gtd->gsd"}> : () -> ()
    %cst_51 = arith.constant dense<0.000000e+00> : vector<8x8x8xf32>
    %118 = tpu.matmul %117, %101, %cst_51 {dimension_numbers = #tpu.dot_dimension_numbers<[2], [1], [1], [2], [0, 0, 0, 1, 1, 2], [0], [0]>} : vector<8x8x8xbf16>, vector<8x8x8xbf16>, vector<8x8x8xf32> -> vector<8x8x8xf32>
    "tpu.trace_stop"() : () -> ()
    %119 = arith.truncf %118 : vector<8x8x8xf32> to vector<8x8x8xbf16>
    %c0_52 = arith.constant 0 : index
    %c0_53 = arith.constant 0 : index
    %c0_54 = arith.constant 0 : index
    %c0_55 = arith.constant 0 : index
    %120 = vector.load %arg12[%c0_52, %c0_53, %c0_54, %c0_55] : memref<2x4x8x32xbf16, #tpu.memory_space<vmem>>, vector<1x4x8x32xbf16>
    %121 = vector.shape_cast %120 : vector<1x4x8x32xbf16> to vector<4x8x32xbf16>
    %122 = vector.shape_cast %121 : vector<4x8x32xbf16> to vector<1x4x8x32xbf16>
    %123 = vector.shape_cast %122 : vector<1x4x8x32xbf16> to vector<1x4x8x32xbf16>
    %124 = vector.broadcast %123 : vector<1x4x8x32xbf16> to vector<2x4x8x32xbf16>
    %125 = vector.shape_cast %124 : vector<2x4x8x32xbf16> to vector<8x8x32xbf16>
    "tpu.trace_start"() <{level = 10 : i32, message = "gsd,gdf->gsf"}> : () -> ()
    %cst_56 = arith.constant dense<0.000000e+00> : vector<8x8x32xf32>
    %126 = tpu.matmul %119, %125, %cst_56 {dimension_numbers = #tpu.dot_dimension_numbers<[2], [1], [1], [2], [0, 0, 0, 1, 1, 2], [0], [0]>} : vector<8x8x8xbf16>, vector<8x8x32xbf16>, vector<8x8x32xf32> -> vector<8x8x32xf32>
    "tpu.trace_stop"() : () -> ()
    %127 = vector.shape_cast %126 : vector<8x8x32xf32> to vector<2x4x8x32xf32>
    %cst_57 = arith.constant dense<0.000000e+00> : vector<2x8x32xf32>
    %128 = vector.multi_reduction <add>, %127, %cst_57 [1] : vector<2x4x8x32xf32> to vector<2x8x32xf32>
    %129 = vector.shape_cast %128 : vector<2x8x32xf32> to vector<16x32xf32>
    %130 = arith.addf %22, %129 : vector<16x32xf32>
    %c0_58 = arith.constant 0 : index
    %c0_59 = arith.constant 0 : index
    %c0_60 = arith.constant 0 : index
    %131 = vector.load %arg13[%c0_58, %c0_59, %c0_60] : memref<2x1x32xf32, #tpu.memory_space<vmem>>, vector<1x1x32xf32>
    %132 = vector.shape_cast %131 : vector<1x1x32xf32> to vector<1x32xf32>
    %133 = vector.broadcast %132 : vector<1x32xf32> to vector<16x32xf32>
    %134 = arith.addf %130, %133 : vector<16x32xf32>
    %c0_61 = arith.constant 0 : index
    %c0_62 = arith.constant 0 : index
    %c0_63 = arith.constant 0 : index
    %135 = vector.load %arg14[%c0_61, %c0_62, %c0_63] : memref<2x1x32xf32, #tpu.memory_space<vmem>>, vector<1x1x32xf32>
    %136 = vector.shape_cast %135 : vector<1x1x32xf32> to vector<1x32xf32>
    %c0_64 = arith.constant 0 : index
    %c0_65 = arith.constant 0 : index
    %c0_66 = arith.constant 0 : index
    %137 = vector.load %arg15[%c0_64, %c0_65, %c0_66] : memref<2x1x32xf32, #tpu.memory_space<vmem>>, vector<1x1x32xf32>
    %138 = vector.shape_cast %137 : vector<1x1x32xf32> to vector<1x32xf32>
    %cst_67 = arith.constant dense<0.000000e+00> : vector<16xf32>
    %139 = vector.multi_reduction <add>, %134, %cst_67 [1] : vector<16x32xf32> to vector<16xf32>
    %140 = vector.shape_cast %139 : vector<16xf32> to vector<16x1xf32>
    %cst_68 = arith.constant 3.200000e+01 : f32
    %141 = vector.broadcast %cst_68 : f32 to vector<16x1xf32>
    %142 = arith.divf %140, %141 : vector<16x1xf32>
    %143 = vector.broadcast %142 : vector<16x1xf32> to vector<16x32xf32>
    %144 = arith.subf %134, %143 : vector<16x32xf32>
    %145 = arith.mulf %144, %144 : vector<16x32xf32>
    %cst_69 = arith.constant dense<0.000000e+00> : vector<16xf32>
    %146 = vector.multi_reduction <add>, %145, %cst_69 [1] : vector<16x32xf32> to vector<16xf32>
    %147 = vector.shape_cast %146 : vector<16xf32> to vector<16x1xf32>
    %cst_70 = arith.constant 3.200000e+01 : f32
    %148 = vector.broadcast %cst_70 : f32 to vector<16x1xf32>
    %149 = arith.divf %147, %148 : vector<16x1xf32>
    %150 = vector.broadcast %142 : vector<16x1xf32> to vector<16x32xf32>
    %151 = arith.subf %134, %150 : vector<16x32xf32>
    %cst_71 = arith.constant 9.99999997E-7 : f32
    %152 = vector.broadcast %cst_71 : f32 to vector<16x1xf32>
    %153 = arith.addf %149, %152 : vector<16x1xf32>
    %154 = math.rsqrt %153 : vector<16x1xf32>
    %155 = vector.broadcast %154 : vector<16x1xf32> to vector<16x32xf32>
    %156 = arith.mulf %151, %155 : vector<16x32xf32>
    %157 = vector.broadcast %136 : vector<1x32xf32> to vector<16x32xf32>
    %158 = arith.mulf %156, %157 : vector<16x32xf32>
    %159 = vector.broadcast %138 : vector<1x32xf32> to vector<16x32xf32>
    %160 = arith.addf %158, %159 : vector<16x32xf32>
    %161 = arith.truncf %160 : vector<16x32xf32> to vector<16x32xbf16>
    %c0_72 = arith.constant 0 : index
    %c0_73 = arith.constant 0 : index
    %c0_74 = arith.constant 0 : index
    %162 = vector.load %arg16[%c0_72, %c0_73, %c0_74] : memref<2x32x128xbf16, #tpu.memory_space<vmem>>, vector<1x32x128xbf16>
    %163 = vector.shape_cast %162 : vector<1x32x128xbf16> to vector<32x128xbf16>
    %cst_75 = arith.constant dense<0.000000e+00> : vector<16x128xf32>
    %164 = tpu.matmul %161, %163, %cst_75 {dimension_numbers = #tpu.dot_dimension_numbers<[1], [0], [0], [1], [0, 0, 1, 1], [], []>} : vector<16x32xbf16>, vector<32x128xbf16>, vector<16x128xf32> -> vector<16x128xf32>
    %c0_76 = arith.constant 0 : index
    %c0_77 = arith.constant 0 : index
    %c0_78 = arith.constant 0 : index
    %165 = vector.load %arg17[%c0_76, %c0_77, %c0_78] : memref<2x1x128xf32, #tpu.memory_space<vmem>>, vector<1x1x128xf32>
    %166 = vector.shape_cast %165 : vector<1x1x128xf32> to vector<1x128xf32>
    %167 = vector.broadcast %166 : vector<1x128xf32> to vector<16x128xf32>
    %168 = arith.addf %164, %167 : vector<16x128xf32>
    %cst_79 = arith.constant 5.000000e-01 : f32
    %169 = vector.broadcast %cst_79 : f32 to vector<16x128xf32>
    %170 = arith.mulf %169, %168 : vector<16x128xf32>
    %171 = arith.mulf %168, %168 : vector<16x128xf32>
    %172 = arith.mulf %171, %168 : vector<16x128xf32>
    %cst_80 = arith.constant 4.471500e-02 : f32
    %173 = vector.broadcast %cst_80 : f32 to vector<16x128xf32>
    %174 = arith.mulf %173, %172 : vector<16x128xf32>
    %175 = arith.addf %168, %174 : vector<16x128xf32>
    %cst_81 = arith.constant 0.797884583 : f32
    %176 = vector.broadcast %cst_81 : f32 to vector<16x128xf32>
    %177 = arith.mulf %176, %175 : vector<16x128xf32>
    %178 = math.tanh %177 : vector<16x128xf32>
    %cst_82 = arith.constant 1.000000e+00 : f32
    %179 = vector.broadcast %cst_82 : f32 to vector<16x128xf32>
    %180 = arith.addf %179, %178 : vector<16x128xf32>
    %181 = arith.mulf %170, %180 : vector<16x128xf32>
    %182 = arith.truncf %181 : vector<16x128xf32> to vector<16x128xbf16>
    %c0_83 = arith.constant 0 : index
    %c0_84 = arith.constant 0 : index
    %c0_85 = arith.constant 0 : index
    %183 = vector.load %arg18[%c0_83, %c0_84, %c0_85] : memref<2x128x32xbf16, #tpu.memory_space<vmem>>, vector<1x128x32xbf16>
    %184 = vector.shape_cast %183 : vector<1x128x32xbf16> to vector<128x32xbf16>
    %cst_86 = arith.constant dense<0.000000e+00> : vector<16x32xf32>
    %185 = tpu.matmul %182, %184, %cst_86 {dimension_numbers = #tpu.dot_dimension_numbers<[1], [0], [0], [1], [0, 0, 1, 1], [], []>} : vector<16x128xbf16>, vector<128x32xbf16>, vector<16x32xf32> -> vector<16x32xf32>
    %c0_87 = arith.constant 0 : index
    %c0_88 = arith.constant 0 : index
    %c0_89 = arith.constant 0 : index
    %186 = vector.load %arg19[%c0_87, %c0_88, %c0_89] : memref<2x1x32xf32, #tpu.memory_space<vmem>>, vector<1x1x32xf32>
    %187 = vector.shape_cast %186 : vector<1x1x32xf32> to vector<1x32xf32>
    %188 = vector.broadcast %187 : vector<1x32xf32> to vector<16x32xf32>
    %189 = arith.addf %185, %188 : vector<16x32xf32>
    %190 = arith.addf %134, %189 : vector<16x32xf32>
    %c1 = arith.constant 1 : index
    %c0_90 = arith.constant 0 : index
    %c0_91 = arith.constant 0 : index
    %191 = vector.load %arg4[%c1, %c0_90, %c0_91] : memref<2x1x32xf32, #tpu.memory_space<vmem>>, vector<1x1x32xf32>
    %192 = vector.shape_cast %191 : vector<1x1x32xf32> to vector<1x32xf32>
    %c1_92 = arith.constant 1 : index
    %c0_93 = arith.constant 0 : index
    %c0_94 = arith.constant 0 : index
    %193 = vector.load %arg5[%c1_92, %c0_93, %c0_94] : memref<2x1x32xf32, #tpu.memory_space<vmem>>, vector<1x1x32xf32>
    %194 = vector.shape_cast %193 : vector<1x1x32xf32> to vector<1x32xf32>
    %cst_95 = arith.constant dense<0.000000e+00> : vector<16xf32>
    %195 = vector.multi_reduction <add>, %190, %cst_95 [1] : vector<16x32xf32> to vector<16xf32>
    %196 = vector.shape_cast %195 : vector<16xf32> to vector<16x1xf32>
    %cst_96 = arith.constant 3.200000e+01 : f32
    %197 = vector.broadcast %cst_96 : f32 to vector<16x1xf32>
    %198 = arith.divf %196, %197 : vector<16x1xf32>
    %199 = vector.broadcast %198 : vector<16x1xf32> to vector<16x32xf32>
    %200 = arith.subf %190, %199 : vector<16x32xf32>
    %201 = arith.mulf %200, %200 : vector<16x32xf32>
    %cst_97 = arith.constant dense<0.000000e+00> : vector<16xf32>
    %202 = vector.multi_reduction <add>, %201, %cst_97 [1] : vector<16x32xf32> to vector<16xf32>
    %203 = vector.shape_cast %202 : vector<16xf32> to vector<16x1xf32>
    %cst_98 = arith.constant 3.200000e+01 : f32
    %204 = vector.broadcast %cst_98 : f32 to vector<16x1xf32>
    %205 = arith.divf %203, %204 : vector<16x1xf32>
    %206 = vector.broadcast %198 : vector<16x1xf32> to vector<16x32xf32>
    %207 = arith.subf %190, %206 : vector<16x32xf32>
    %cst_99 = arith.constant 9.99999997E-7 : f32
    %208 = vector.broadcast %cst_99 : f32 to vector<16x1xf32>
    %209 = arith.addf %205, %208 : vector<16x1xf32>
    %210 = math.rsqrt %209 : vector<16x1xf32>
    %211 = vector.broadcast %210 : vector<16x1xf32> to vector<16x32xf32>
    %212 = arith.mulf %207, %211 : vector<16x32xf32>
    %213 = vector.broadcast %192 : vector<1x32xf32> to vector<16x32xf32>
    %214 = arith.mulf %212, %213 : vector<16x32xf32>
    %215 = vector.broadcast %194 : vector<1x32xf32> to vector<16x32xf32>
    %216 = arith.addf %214, %215 : vector<16x32xf32>
    %217 = arith.truncf %216 : vector<16x32xf32> to vector<16x32xbf16>
    %218 = vector.shape_cast %217 : vector<16x32xbf16> to vector<2x1x8x32xbf16>
    %219 = vector.shape_cast %218 : vector<2x1x8x32xbf16> to vector<2x1x8x32xbf16>
    %220 = vector.broadcast %219 : vector<2x1x8x32xbf16> to vector<2x4x8x32xbf16>
    %221 = vector.shape_cast %220 : vector<2x4x8x32xbf16> to vector<8x8x32xbf16>
    %c1_100 = arith.constant 1 : index
    %c0_101 = arith.constant 0 : index
    %c0_102 = arith.constant 0 : index
    %c0_103 = arith.constant 0 : index
    %222 = vector.load %arg6[%c1_100, %c0_101, %c0_102, %c0_103] : memref<2x4x32x8xbf16, #tpu.memory_space<vmem>>, vector<1x4x32x8xbf16>
    %223 = vector.shape_cast %222 : vector<1x4x32x8xbf16> to vector<4x32x8xbf16>
    %224 = vector.shape_cast %223 : vector<4x32x8xbf16> to vector<1x4x32x8xbf16>
    %225 = vector.shape_cast %224 : vector<1x4x32x8xbf16> to vector<1x4x32x8xbf16>
    %226 = vector.broadcast %225 : vector<1x4x32x8xbf16> to vector<2x4x32x8xbf16>
    %227 = vector.shape_cast %226 : vector<2x4x32x8xbf16> to vector<8x32x8xbf16>
    "tpu.trace_start"() <{level = 10 : i32, message = "gse,ged->gsd"}> : () -> ()
    %cst_104 = arith.constant dense<0.000000e+00> : vector<8x8x8xf32>
    %228 = tpu.matmul %221, %227, %cst_104 {dimension_numbers = #tpu.dot_dimension_numbers<[2], [1], [1], [2], [0, 0, 0, 1, 1, 2], [0], [0]>} : vector<8x8x32xbf16>, vector<8x32x8xbf16>, vector<8x8x8xf32> -> vector<8x8x8xf32>
    "tpu.trace_stop"() : () -> ()
    %c1_105 = arith.constant 1 : index
    %c0_106 = arith.constant 0 : index
    %c0_107 = arith.constant 0 : index
    %c0_108 = arith.constant 0 : index
    %229 = vector.load %arg7[%c1_105, %c0_106, %c0_107, %c0_108] : memref<2x4x1x8xf32, #tpu.memory_space<vmem>>, vector<1x4x1x8xf32>
    %230 = vector.shape_cast %229 : vector<1x4x1x8xf32> to vector<4x1x8xf32>
    %231 = vector.shape_cast %230 : vector<4x1x8xf32> to vector<1x4x1x8xf32>
    %232 = vector.shape_cast %231 : vector<1x4x1x8xf32> to vector<1x4x1x8xf32>
    %233 = vector.broadcast %232 : vector<1x4x1x8xf32> to vector<2x4x1x8xf32>
    %234 = vector.shape_cast %233 : vector<2x4x1x8xf32> to vector<8x1x8xf32>
    %235 = vector.broadcast %234 : vector<8x1x8xf32> to vector<8x8x8xf32>
    %236 = arith.addf %228, %235 : vector<8x8x8xf32>
    %237 = arith.truncf %236 : vector<8x8x8xf32> to vector<8x8x8xbf16>
    %c1_109 = arith.constant 1 : index
    %c0_110 = arith.constant 0 : index
    %c0_111 = arith.constant 0 : index
    %c0_112 = arith.constant 0 : index
    %238 = vector.load %arg8[%c1_109, %c0_110, %c0_111, %c0_112] : memref<2x4x32x8xbf16, #tpu.memory_space<vmem>>, vector<1x4x32x8xbf16>
    %239 = vector.shape_cast %238 : vector<1x4x32x8xbf16> to vector<4x32x8xbf16>
    %240 = vector.shape_cast %239 : vector<4x32x8xbf16> to vector<1x4x32x8xbf16>
    %241 = vector.shape_cast %240 : vector<1x4x32x8xbf16> to vector<1x4x32x8xbf16>
    %242 = vector.broadcast %241 : vector<1x4x32x8xbf16> to vector<2x4x32x8xbf16>
    %243 = vector.shape_cast %242 : vector<2x4x32x8xbf16> to vector<8x32x8xbf16>
    "tpu.trace_start"() <{level = 10 : i32, message = "gse,ged->gsd"}> : () -> ()
    %cst_113 = arith.constant dense<0.000000e+00> : vector<8x8x8xf32>
    %244 = tpu.matmul %221, %243, %cst_113 {dimension_numbers = #tpu.dot_dimension_numbers<[2], [1], [1], [2], [0, 0, 0, 1, 1, 2], [0], [0]>} : vector<8x8x32xbf16>, vector<8x32x8xbf16>, vector<8x8x8xf32> -> vector<8x8x8xf32>
    "tpu.trace_stop"() : () -> ()
    %c1_114 = arith.constant 1 : index
    %c0_115 = arith.constant 0 : index
    %c0_116 = arith.constant 0 : index
    %c0_117 = arith.constant 0 : index
    %245 = vector.load %arg9[%c1_114, %c0_115, %c0_116, %c0_117] : memref<2x4x1x8xf32, #tpu.memory_space<vmem>>, vector<1x4x1x8xf32>
    %246 = vector.shape_cast %245 : vector<1x4x1x8xf32> to vector<4x1x8xf32>
    %247 = vector.shape_cast %246 : vector<4x1x8xf32> to vector<1x4x1x8xf32>
    %248 = vector.shape_cast %247 : vector<1x4x1x8xf32> to vector<1x4x1x8xf32>
    %249 = vector.broadcast %248 : vector<1x4x1x8xf32> to vector<2x4x1x8xf32>
    %250 = vector.shape_cast %249 : vector<2x4x1x8xf32> to vector<8x1x8xf32>
    %251 = vector.broadcast %250 : vector<8x1x8xf32> to vector<8x8x8xf32>
    %252 = arith.addf %244, %251 : vector<8x8x8xf32>
    %253 = arith.truncf %252 : vector<8x8x8xf32> to vector<8x8x8xbf16>
    %c1_118 = arith.constant 1 : index
    %c0_119 = arith.constant 0 : index
    %c0_120 = arith.constant 0 : index
    %c0_121 = arith.constant 0 : index
    %254 = vector.load %arg10[%c1_118, %c0_119, %c0_120, %c0_121] : memref<2x4x32x8xbf16, #tpu.memory_space<vmem>>, vector<1x4x32x8xbf16>
    %255 = vector.shape_cast %254 : vector<1x4x32x8xbf16> to vector<4x32x8xbf16>
    %256 = vector.shape_cast %255 : vector<4x32x8xbf16> to vector<1x4x32x8xbf16>
    %257 = vector.shape_cast %256 : vector<1x4x32x8xbf16> to vector<1x4x32x8xbf16>
    %258 = vector.broadcast %257 : vector<1x4x32x8xbf16> to vector<2x4x32x8xbf16>
    %259 = vector.shape_cast %258 : vector<2x4x32x8xbf16> to vector<8x32x8xbf16>
    "tpu.trace_start"() <{level = 10 : i32, message = "gse,ged->gsd"}> : () -> ()
    %cst_122 = arith.constant dense<0.000000e+00> : vector<8x8x8xf32>
    %260 = tpu.matmul %221, %259, %cst_122 {dimension_numbers = #tpu.dot_dimension_numbers<[2], [1], [1], [2], [0, 0, 0, 1, 1, 2], [0], [0]>} : vector<8x8x32xbf16>, vector<8x32x8xbf16>, vector<8x8x8xf32> -> vector<8x8x8xf32>
    "tpu.trace_stop"() : () -> ()
    %c1_123 = arith.constant 1 : index
    %c0_124 = arith.constant 0 : index
    %c0_125 = arith.constant 0 : index
    %c0_126 = arith.constant 0 : index
    %261 = vector.load %arg11[%c1_123, %c0_124, %c0_125, %c0_126] : memref<2x4x1x8xf32, #tpu.memory_space<vmem>>, vector<1x4x1x8xf32>
    %262 = vector.shape_cast %261 : vector<1x4x1x8xf32> to vector<4x1x8xf32>
    %263 = vector.shape_cast %262 : vector<4x1x8xf32> to vector<1x4x1x8xf32>
    %264 = vector.shape_cast %263 : vector<1x4x1x8xf32> to vector<1x4x1x8xf32>
    %265 = vector.broadcast %264 : vector<1x4x1x8xf32> to vector<2x4x1x8xf32>
    %266 = vector.shape_cast %265 : vector<2x4x1x8xf32> to vector<8x1x8xf32>
    %267 = vector.broadcast %266 : vector<8x1x8xf32> to vector<8x8x8xf32>
    %268 = arith.addf %260, %267 : vector<8x8x8xf32>
    %269 = arith.truncf %268 : vector<8x8x8xf32> to vector<8x8x8xbf16>
    "tpu.trace_start"() <{level = 10 : i32, message = "gsd,gtd->gst"}> : () -> ()
    %cst_127 = arith.constant dense<0.000000e+00> : vector<8x8x8xf32>
    %270 = tpu.matmul %237, %253, %cst_127 {dimension_numbers = #tpu.dot_dimension_numbers<[2], [2], [1], [1], [0, 0, 0, 1, 1, 1], [0], [0]>} : vector<8x8x8xbf16>, vector<8x8x8xbf16>, vector<8x8x8xf32> -> vector<8x8x8xf32>
    "tpu.trace_stop"() : () -> ()
    %cst_128 = arith.constant 0.353553385 : f32
    %271 = vector.broadcast %cst_128 : f32 to vector<8x8x8xf32>
    %272 = arith.mulf %270, %271 : vector<8x8x8xf32>
    %273 = vector.broadcast %5 : vector<1x1x8xf32> to vector<8x8x8xf32>
    %274 = arith.addf %272, %273 : vector<8x8x8xf32>
    %cst_129 = arith.constant dense<0xFF800000> : vector<8x8xf32>
    %275 = vector.multi_reduction <maximumf>, %274, %cst_129 [2] : vector<8x8x8xf32> to vector<8x8xf32>
    %276 = vector.shape_cast %275 : vector<8x8xf32> to vector<8x8x1xf32>
    %277 = vector.broadcast %276 : vector<8x8x1xf32> to vector<8x8x8xf32>
    %278 = arith.subf %274, %277 : vector<8x8x8xf32>
    %279 = math.exp %278 : vector<8x8x8xf32>
    %cst_130 = arith.constant dense<0.000000e+00> : vector<8x8xf32>
    %280 = vector.multi_reduction <add>, %279, %cst_130 [2] : vector<8x8x8xf32> to vector<8x8xf32>
    %281 = vector.shape_cast %280 : vector<8x8xf32> to vector<8x8x1xf32>
    %282 = tpu.reciprocal %281 {approx = true} : vector<8x8x1xf32> -> vector<8x8x1xf32>
    %283 = vector.broadcast %282 : vector<8x8x1xf32> to vector<8x8x8xf32>
    %284 = arith.mulf %279, %283 : vector<8x8x8xf32>
    %285 = arith.truncf %284 : vector<8x8x8xf32> to vector<8x8x8xbf16>
    "tpu.trace_start"() <{level = 10 : i32, message = "gst,gtd->gsd"}> : () -> ()
    %cst_131 = arith.constant dense<0.000000e+00> : vector<8x8x8xf32>
    %286 = tpu.matmul %285, %269, %cst_131 {dimension_numbers = #tpu.dot_dimension_numbers<[2], [1], [1], [2], [0, 0, 0, 1, 1, 2], [0], [0]>} : vector<8x8x8xbf16>, vector<8x8x8xbf16>, vector<8x8x8xf32> -> vector<8x8x8xf32>
    "tpu.trace_stop"() : () -> ()
    %287 = arith.truncf %286 : vector<8x8x8xf32> to vector<8x8x8xbf16>
    %c1_132 = arith.constant 1 : index
    %c0_133 = arith.constant 0 : index
    %c0_134 = arith.constant 0 : index
    %c0_135 = arith.constant 0 : index
    %288 = vector.load %arg12[%c1_132, %c0_133, %c0_134, %c0_135] : memref<2x4x8x32xbf16, #tpu.memory_space<vmem>>, vector<1x4x8x32xbf16>
    %289 = vector.shape_cast %288 : vector<1x4x8x32xbf16> to vector<4x8x32xbf16>
    %290 = vector.shape_cast %289 : vector<4x8x32xbf16> to vector<1x4x8x32xbf16>
    %291 = vector.shape_cast %290 : vector<1x4x8x32xbf16> to vector<1x4x8x32xbf16>
    %292 = vector.broadcast %291 : vector<1x4x8x32xbf16> to vector<2x4x8x32xbf16>
    %293 = vector.shape_cast %292 : vector<2x4x8x32xbf16> to vector<8x8x32xbf16>
    "tpu.trace_start"() <{level = 10 : i32, message = "gsd,gdf->gsf"}> : () -> ()
    %cst_136 = arith.constant dense<0.000000e+00> : vector<8x8x32xf32>
    %294 = tpu.matmul %287, %293, %cst_136 {dimension_numbers = #tpu.dot_dimension_numbers<[2], [1], [1], [2], [0, 0, 0, 1, 1, 2], [0], [0]>} : vector<8x8x8xbf16>, vector<8x8x32xbf16>, vector<8x8x32xf32> -> vector<8x8x32xf32>
    "tpu.trace_stop"() : () -> ()
    %295 = vector.shape_cast %294 : vector<8x8x32xf32> to vector<2x4x8x32xf32>
    %cst_137 = arith.constant dense<0.000000e+00> : vector<2x8x32xf32>
    %296 = vector.multi_reduction <add>, %295, %cst_137 [1] : vector<2x4x8x32xf32> to vector<2x8x32xf32>
    %297 = vector.shape_cast %296 : vector<2x8x32xf32> to vector<16x32xf32>
    %298 = arith.addf %190, %297 : vector<16x32xf32>
    %c1_138 = arith.constant 1 : index
    %c0_139 = arith.constant 0 : index
    %c0_140 = arith.constant 0 : index
    %299 = vector.load %arg13[%c1_138, %c0_139, %c0_140] : memref<2x1x32xf32, #tpu.memory_space<vmem>>, vector<1x1x32xf32>
    %300 = vector.shape_cast %299 : vector<1x1x32xf32> to vector<1x32xf32>
    %301 = vector.broadcast %300 : vector<1x32xf32> to vector<16x32xf32>
    %302 = arith.addf %298, %301 : vector<16x32xf32>
    %c1_141 = arith.constant 1 : index
    %c0_142 = arith.constant 0 : index
    %c0_143 = arith.constant 0 : index
    %303 = vector.load %arg14[%c1_141, %c0_142, %c0_143] : memref<2x1x32xf32, #tpu.memory_space<vmem>>, vector<1x1x32xf32>
    %304 = vector.shape_cast %303 : vector<1x1x32xf32> to vector<1x32xf32>
    %c1_144 = arith.constant 1 : index
    %c0_145 = arith.constant 0 : index
    %c0_146 = arith.constant 0 : index
    %305 = vector.load %arg15[%c1_144, %c0_145, %c0_146] : memref<2x1x32xf32, #tpu.memory_space<vmem>>, vector<1x1x32xf32>
    %306 = vector.shape_cast %305 : vector<1x1x32xf32> to vector<1x32xf32>
    %cst_147 = arith.constant dense<0.000000e+00> : vector<16xf32>
    %307 = vector.multi_reduction <add>, %302, %cst_147 [1] : vector<16x32xf32> to vector<16xf32>
    %308 = vector.shape_cast %307 : vector<16xf32> to vector<16x1xf32>
    %cst_148 = arith.constant 3.200000e+01 : f32
    %309 = vector.broadcast %cst_148 : f32 to vector<16x1xf32>
    %310 = arith.divf %308, %309 : vector<16x1xf32>
    %311 = vector.broadcast %310 : vector<16x1xf32> to vector<16x32xf32>
    %312 = arith.subf %302, %311 : vector<16x32xf32>
    %313 = arith.mulf %312, %312 : vector<16x32xf32>
    %cst_149 = arith.constant dense<0.000000e+00> : vector<16xf32>
    %314 = vector.multi_reduction <add>, %313, %cst_149 [1] : vector<16x32xf32> to vector<16xf32>
    %315 = vector.shape_cast %314 : vector<16xf32> to vector<16x1xf32>
    %cst_150 = arith.constant 3.200000e+01 : f32
    %316 = vector.broadcast %cst_150 : f32 to vector<16x1xf32>
    %317 = arith.divf %315, %316 : vector<16x1xf32>
    %318 = vector.broadcast %310 : vector<16x1xf32> to vector<16x32xf32>
    %319 = arith.subf %302, %318 : vector<16x32xf32>
    %cst_151 = arith.constant 9.99999997E-7 : f32
    %320 = vector.broadcast %cst_151 : f32 to vector<16x1xf32>
    %321 = arith.addf %317, %320 : vector<16x1xf32>
    %322 = math.rsqrt %321 : vector<16x1xf32>
    %323 = vector.broadcast %322 : vector<16x1xf32> to vector<16x32xf32>
    %324 = arith.mulf %319, %323 : vector<16x32xf32>
    %325 = vector.broadcast %304 : vector<1x32xf32> to vector<16x32xf32>
    %326 = arith.mulf %324, %325 : vector<16x32xf32>
    %327 = vector.broadcast %306 : vector<1x32xf32> to vector<16x32xf32>
    %328 = arith.addf %326, %327 : vector<16x32xf32>
    %329 = arith.truncf %328 : vector<16x32xf32> to vector<16x32xbf16>
    %c1_152 = arith.constant 1 : index
    %c0_153 = arith.constant 0 : index
    %c0_154 = arith.constant 0 : index
    %330 = vector.load %arg16[%c1_152, %c0_153, %c0_154] : memref<2x32x128xbf16, #tpu.memory_space<vmem>>, vector<1x32x128xbf16>
    %331 = vector.shape_cast %330 : vector<1x32x128xbf16> to vector<32x128xbf16>
    %cst_155 = arith.constant dense<0.000000e+00> : vector<16x128xf32>
    %332 = tpu.matmul %329, %331, %cst_155 {dimension_numbers = #tpu.dot_dimension_numbers<[1], [0], [0], [1], [0, 0, 1, 1], [], []>} : vector<16x32xbf16>, vector<32x128xbf16>, vector<16x128xf32> -> vector<16x128xf32>
    %c1_156 = arith.constant 1 : index
    %c0_157 = arith.constant 0 : index
    %c0_158 = arith.constant 0 : index
    %333 = vector.load %arg17[%c1_156, %c0_157, %c0_158] : memref<2x1x128xf32, #tpu.memory_space<vmem>>, vector<1x1x128xf32>
    %334 = vector.shape_cast %333 : vector<1x1x128xf32> to vector<1x128xf32>
    %335 = vector.broadcast %334 : vector<1x128xf32> to vector<16x128xf32>
    %336 = arith.addf %332, %335 : vector<16x128xf32>
    %cst_159 = arith.constant 5.000000e-01 : f32
    %337 = vector.broadcast %cst_159 : f32 to vector<16x128xf32>
    %338 = arith.mulf %337, %336 : vector<16x128xf32>
    %339 = arith.mulf %336, %336 : vector<16x128xf32>
    %340 = arith.mulf %339, %336 : vector<16x128xf32>
    %cst_160 = arith.constant 4.471500e-02 : f32
    %341 = vector.broadcast %cst_160 : f32 to vector<16x128xf32>
    %342 = arith.mulf %341, %340 : vector<16x128xf32>
    %343 = arith.addf %336, %342 : vector<16x128xf32>
    %cst_161 = arith.constant 0.797884583 : f32
    %344 = vector.broadcast %cst_161 : f32 to vector<16x128xf32>
    %345 = arith.mulf %344, %343 : vector<16x128xf32>
    %346 = math.tanh %345 : vector<16x128xf32>
    %cst_162 = arith.constant 1.000000e+00 : f32
    %347 = vector.broadcast %cst_162 : f32 to vector<16x128xf32>
    %348 = arith.addf %347, %346 : vector<16x128xf32>
    %349 = arith.mulf %338, %348 : vector<16x128xf32>
    %350 = arith.truncf %349 : vector<16x128xf32> to vector<16x128xbf16>
    %c1_163 = arith.constant 1 : index
    %c0_164 = arith.constant 0 : index
    %c0_165 = arith.constant 0 : index
    %351 = vector.load %arg18[%c1_163, %c0_164, %c0_165] : memref<2x128x32xbf16, #tpu.memory_space<vmem>>, vector<1x128x32xbf16>
    %352 = vector.shape_cast %351 : vector<1x128x32xbf16> to vector<128x32xbf16>
    %cst_166 = arith.constant dense<0.000000e+00> : vector<16x32xf32>
    %353 = tpu.matmul %350, %352, %cst_166 {dimension_numbers = #tpu.dot_dimension_numbers<[1], [0], [0], [1], [0, 0, 1, 1], [], []>} : vector<16x128xbf16>, vector<128x32xbf16>, vector<16x32xf32> -> vector<16x32xf32>
    %c1_167 = arith.constant 1 : index
    %c0_168 = arith.constant 0 : index
    %c0_169 = arith.constant 0 : index
    %354 = vector.load %arg19[%c1_167, %c0_168, %c0_169] : memref<2x1x32xf32, #tpu.memory_space<vmem>>, vector<1x1x32xf32>
    %355 = vector.shape_cast %354 : vector<1x1x32xf32> to vector<1x32xf32>
    %356 = vector.broadcast %355 : vector<1x32xf32> to vector<16x32xf32>
    %357 = arith.addf %353, %356 : vector<16x32xf32>
    %358 = arith.addf %302, %357 : vector<16x32xf32>
    %359 = vector.shape_cast %358 : vector<16x32xf32> to vector<2x8x32xf32>
    %360 = vector.extract_strided_slice %359 {offsets = [0, 0, 0], sizes = [2, 1, 32], strides = [1, 1, 1]} : vector<2x8x32xf32> to vector<2x1x32xf32>
    %361 = vector.shape_cast %360 : vector<2x1x32xf32> to vector<2x32xf32>
    %c0_170 = arith.constant 0 : index
    %c0_171 = arith.constant 0 : index
    %362 = vector.load %arg20[%c0_170, %c0_171] : memref<1x32xf32, #tpu.memory_space<vmem>>, vector<1x32xf32>
    %c0_172 = arith.constant 0 : index
    %c0_173 = arith.constant 0 : index
    %363 = vector.load %arg21[%c0_172, %c0_173] : memref<1x32xf32, #tpu.memory_space<vmem>>, vector<1x32xf32>
    %cst_174 = arith.constant dense<0.000000e+00> : vector<2xf32>
    %364 = vector.multi_reduction <add>, %361, %cst_174 [1] : vector<2x32xf32> to vector<2xf32>
    %365 = vector.shape_cast %364 : vector<2xf32> to vector<2x1xf32>
    %cst_175 = arith.constant 3.200000e+01 : f32
    %366 = vector.broadcast %cst_175 : f32 to vector<2x1xf32>
    %367 = arith.divf %365, %366 : vector<2x1xf32>
    %368 = vector.broadcast %367 : vector<2x1xf32> to vector<2x32xf32>
    %369 = arith.subf %361, %368 : vector<2x32xf32>
    %370 = arith.mulf %369, %369 : vector<2x32xf32>
    %cst_176 = arith.constant dense<0.000000e+00> : vector<2xf32>
    %371 = vector.multi_reduction <add>, %370, %cst_176 [1] : vector<2x32xf32> to vector<2xf32>
    %372 = vector.shape_cast %371 : vector<2xf32> to vector<2x1xf32>
    %cst_177 = arith.constant 3.200000e+01 : f32
    %373 = vector.broadcast %cst_177 : f32 to vector<2x1xf32>
    %374 = arith.divf %372, %373 : vector<2x1xf32>
    %375 = vector.broadcast %367 : vector<2x1xf32> to vector<2x32xf32>
    %376 = arith.subf %361, %375 : vector<2x32xf32>
    %cst_178 = arith.constant 9.99999997E-7 : f32
    %377 = vector.broadcast %cst_178 : f32 to vector<2x1xf32>
    %378 = arith.addf %374, %377 : vector<2x1xf32>
    %379 = math.rsqrt %378 : vector<2x1xf32>
    %380 = vector.broadcast %379 : vector<2x1xf32> to vector<2x32xf32>
    %381 = arith.mulf %376, %380 : vector<2x32xf32>
    %382 = vector.broadcast %362 : vector<1x32xf32> to vector<2x32xf32>
    %383 = arith.mulf %381, %382 : vector<2x32xf32>
    %384 = vector.broadcast %363 : vector<1x32xf32> to vector<2x32xf32>
    %385 = arith.addf %383, %384 : vector<2x32xf32>
    %386 = arith.truncf %385 : vector<2x32xf32> to vector<2x32xbf16>
    %c0_179 = arith.constant 0 : index
    %c0_180 = arith.constant 0 : index
    %387 = vector.load %arg22[%c0_179, %c0_180] : memref<32x5xbf16, #tpu.memory_space<vmem>>, vector<32x5xbf16>
    %cst_181 = arith.constant dense<0.000000e+00> : vector<2x5xf32>
    %388 = tpu.matmul %386, %387, %cst_181 {dimension_numbers = #tpu.dot_dimension_numbers<[1], [0], [0], [1], [0, 0, 1, 1], [], []>} : vector<2x32xbf16>, vector<32x5xbf16>, vector<2x5xf32> -> vector<2x5xf32>
    %c0_182 = arith.constant 0 : index
    %c0_183 = arith.constant 0 : index
    %389 = vector.load %arg23[%c0_182, %c0_183] : memref<1x5xf32, #tpu.memory_space<vmem>>, vector<1x5xf32>
    %390 = vector.broadcast %389 : vector<1x5xf32> to vector<2x5xf32>
    %391 = arith.addf %388, %390 : vector<2x5xf32>
    %cst_184 = arith.constant 0.000000e+00 : f32
    %392 = vector.broadcast %cst_184 : f32 to vector<2x5xf32>
    %393 = arith.subf %392, %391 : vector<2x5xf32>
    %394 = math.exp %393 : vector<2x5xf32>
    %cst_185 = arith.constant 1.000000e+00 : f32
    %395 = vector.broadcast %cst_185 : f32 to vector<2x5xf32>
    %396 = arith.addf %395, %394 : vector<2x5xf32>
    %cst_186 = arith.constant 1.000000e+00 : f32
    %397 = vector.broadcast %cst_186 : f32 to vector<2x5xf32>
    %398 = arith.divf %397, %396 : vector<2x5xf32>
    %c0_187 = arith.constant 0 : index
    %c0_188 = arith.constant 0 : index
    %399 = vector.load %arg24[%c0_187, %c0_188] : memref<2x5xf32, #tpu.memory_space<vmem>>, vector<2x5xf32>
    tpu.vector_store %arg24[%c0_187, %c0_188], %398 {strides = array<i32>} : memref<2x5xf32, #tpu.memory_space<vmem>>, vector<2x5xf32>,
    return
  }
}

</mosaic_0001>

<bundles_post_ra>
// kernel: vit_forward.1
= control target key start
LH: loop header
LB: loop body
LE: loop exit
PB: predicated region body
PF: predicated region fallthrough
CT: control target
= control target key end

     0   :  { %s9652_s0 = inlined_call_operand.vmem [shape: f32[2,768], index: 0, kind: input, shape index: {}]   ;;  %s9653_s1 = inlined_call_operand.vmem [shape: bf16[768,32], index: 1, kind: input, shape index: {}]   ;;  %s9654_s2 = inlined_call_operand.vmem [shape: f32[8,768], index: 2, kind: input, shape index: {}]   ;;  %s9655_s3 = inlined_call_operand.vmem [shape: f32[8,32], index: 3, kind: input, shape index: {}]   ;;  %s9656_s4 = inlined_call_operand.vmem [shape: f32[2,1,32], index: 4, kind: input, shape index: {}]   ;;  %s9657_s5 = inlined_call_operand.vmem [shape: f32[2,1,32], index: 5, kind: input, shape index: {}]   ;;  %s9658_s6 = inlined_call_operand.vmem [shape: bf16[2,4,32,8], index: 6, kind: input, shape index: {}]   ;;  %s9659_s7 = inlined_call_operand.vmem [shape: f32[2,4,1,8], index: 7, kind: input, shape index: {}]   ;;  %s9660_s8 = inlined_call_operand.vmem [shape: bf16[2,4,32,8], index: 8, kind: input, shape index: {}]   ;;  %s9661_s9 = inlined_call_operand.vmem [shape: f32[2,4,1,8], index: 9, kind: input, shape index: {}]   ;;  %s9662_s10 = inlined_call_operand.vmem [shape: bf16[2,4,32,8], index: 10, kind: input, shape index: {}]   ;;  %s9663_s11 = inlined_call_operand.vmem [shape: f32[2,4,1,8], index: 11, kind: input, shape index: {}]   ;;  %s9664_s12 = inlined_call_operand.vmem [shape: bf16[2,4,8,32], index: 12, kind: input, shape index: {}]   ;;  %s9665_s13 = inlined_call_operand.vmem [shape: f32[2,1,32], index: 13, kind: input, shape index: {}]   ;;  %s9666_s14 = inlined_call_operand.vmem [shape: f32[2,1,32], index: 14, kind: input, shape index: {}]   ;;  %s9667_s15 = inlined_call_operand.vmem [shape: f32[2,1,32], index: 15, kind: input, shape index: {}]   ;;  %s9668_s16 = inlined_call_operand.vmem [shape: bf16[2,32,128], index: 16, kind: input, shape index: {}]   ;;  %s9669_s17 = inlined_call_operand.vmem [shape: f32[2,1,128], index: 17, kind: input, shape index: {}]   ;;  %s9670_s18 = inlined_call_operand.vmem [shape: bf16[2,128,32], index: 18, kind: input, shape index: {}]   ;;  %s9671_s19 = inlined_call_operand.vmem [shape: f32[2,1,32], index: 19, kind: input, shape index: {}]   ;;  %s9672_s20 = inlined_call_operand.vmem [shape: f32[1,32], index: 20, kind: input, shape index: {}]   ;;  %s9673_s21 = inlined_call_operand.vmem [shape: f32[1,32], index: 21, kind: input, shape index: {}]   ;;  %s9674_s22 = inlined_call_operand.vmem [shape: bf16[32,5], index: 22, kind: input, shape index: {}]   ;;  %s9675_s23 = inlined_call_operand.vmem [shape: f32[1,5], index: 23, kind: input, shape index: {}]   ;;  %s9676_s24 = inlined_call_operand.hbm [shape: f32[2,5], index: 24, kind: output, shape index: {}]  }
   0x1   :  { %9685 = sst [smem:[#allocation5_spill]] %s9652_s0 }
   0x2   :  { %9686 = sst [smem:[#allocation6_spill]] %s9653_s1 }
   0x3   :  { %9687 = sst [smem:[#allocation7_spill]] %s9654_s2 }
   0x4   :  { %9688 = sst [smem:[#allocation8_spill]] %s9655_s3 }
   0x5   :  { %9689 = sst [smem:[#allocation9_spill]] %s9656_s4 }
   0x6   :  { %9690 = sst [smem:[#allocation10_spill]] %s9657_s5 }
   0x7   :  { %9691 = sst [smem:[#allocation11_spill]] %s9658_s6 }
   0x8   :  { %9692 = sst [smem:[#allocation12_spill]] %s9659_s7 }
   0x9   :  { %9693 = sst [smem:[#allocation13_spill]] %s9660_s8 }
   0xa   :  { %s9694_s27 = sld [smem:[#allocation6_spill]]  ;;  %v79_v25 = vlaneseq  ;;  %s9695_s25 = sld [smem:[#allocation5_spill]] }
   0xb   :  { %s9696_s26 = sld [smem:[#allocation7_spill]] }
   0xc   :  { %v8357_v30 = vshrl.u32 %v79_v25, 7 }
   0xe   :  { %v115_v35 = vsub.s32 1, %v8357_v30  ;;  %v123_v36 = vsub.s32 3, %v8357_v30  ;;  %v111_v37 = vsub.s32 0, %v8357_v30  ;;  %v119_v40 = vsub.s32 2, %v8357_v30 }
  0x10   :  { %v7904_v0 = vld [vmem:[%s9694_s27 + $0x40] sm:$0xff]   ;;  %v7908_v4 = vld [vmem:[%s9694_s27 + $0x48] sm:$0xff]   ;;  %v7912_v8 = vld [vmem:[%s9694_s27 + $0x50] sm:$0xff]  }
  0x11   :  { %v7905_v1 = vld [vmem:[%s9694_s27 + $0xc0] sm:$0xff]   ;;  %6831 = vmatprep.subr.bf16.mxu0 %v7904_v0  ;;  %v7909_v5 = vld [vmem:[%s9694_s27 + $0xc8] sm:$0xff]   ;;  %v7913_v9 = vld [vmem:[%s9694_s27 + $0xd0] sm:$0xff]  }
  0x12   :  { %v7906_v2 = vld [vmem:[%s9694_s27] sm:$0xff]   ;;  %6853 = vmatprep.subr.bf16.mxu1 %v7905_v1  ;;  %v7910_v6 = vld [vmem:[%s9694_s27 + $0x8] sm:$0xff]   ;;  %v7914_v10 = vld [vmem:[%s9694_s27 + $0x10] sm:$0xff]  }
  0x13   :  { %v7907_v3 = vld [vmem:[%s9694_s27 + $0x80] sm:$0xff]   ;;  %6832 = vmatpush3.bf16.msra.mxu0 %v7906_v2  ;;  %v7911_v7 = vld [vmem:[%s9694_s27 + $0x88] sm:$0xff]   ;;  %v7915_v11 = vld [vmem:[%s9694_s27 + $0x90] sm:$0xff]  }
  0x14   :  { %6854 = vmatpush3.bf16.msra.mxu1 %v7907_v3  ;;  %6833 = vmatprep.subr.bf16.mxu0 %v7908_v4  ;;  %v7916_v12 = vld [vmem:[%s9694_s27 + $0x58] sm:$0xff]   ;;  %v7920_v16 = vld [vmem:[%s9694_s27 + $0x60] sm:$0xff]   ;;  %v7924_v20 = vld [vmem:[%s9694_s27 + $0x68] sm:$0xff]  }
  0x15   :  { %6855 = vmatprep.subr.bf16.mxu1 %v7909_v5  ;;  %v7917_v13 = vld [vmem:[%s9694_s27 + $0xd8] sm:$0xff]   ;;  %v7921_v17 = vld [vmem:[%s9694_s27 + $0xe0] sm:$0xff]   ;;  %v7925_v21 = vld [vmem:[%s9694_s27 + $0xe8] sm:$0xff]   ;;  %v131_v5 = vsub.s32 5, %v8357_v30 }
  0x16   :  { %v7918_v14 = vld [vmem:[%s9694_s27 + $0x18] sm:$0xff]   ;;  %v7922_v18 = vld [vmem:[%s9694_s27 + $0x20] sm:$0xff]   ;;  %v7926_v22 = vld [vmem:[%s9694_s27 + $0x28] sm:$0xff]  }
  0x17   :  { %6834 = vmatpush3.bf16.msra.mxu0 %v7910_v6  ;;  %v7919_v15 = vld [vmem:[%s9694_s27 + $0x98] sm:$0xff]   ;;  %v7923_v19 = vld [vmem:[%s9694_s27 + $0xa0] sm:$0xff]   ;;  %v7927_v23 = vld [vmem:[%s9694_s27 + $0xa8] sm:$0xff]  }
  0x18   :  { %6856 = vmatpush3.bf16.msra.mxu1 %v7911_v7  ;;  %6835 = vmatprep.subr.bf16.mxu0 %v7912_v8  ;;  %v7928_v24 = vld [vmem:[%s9694_s27 + $0x70] sm:$0xff]   ;;  %v7932_v29 = vld [vmem:[%s9694_s27 + $0x78] sm:$0xff]   ;;  %v6472_v34 = vld.sshfl [vmem:[%s9695_s25] sm:$0xff pattern:$0x75316420] }
  0x19   :  { %6857 = vmatprep.subr.bf16.mxu1 %v7913_v9  ;;  %v7929_v26 = vld [vmem:[%s9694_s27 + $0xf0] sm:$0xff]   ;;  %v7933_v31 = vld [vmem:[%s9694_s27 + $0xf8] sm:$0xff]   ;;  %v6473_v38 = vld.sshfl [vmem:[%s9695_s25 + $0x8] sm:$0x33 pattern:$0x75316420] }
  0x1a   :  { %v7930_v27 = vld [vmem:[%s9694_s27 + $0x30] sm:$0xff]   ;;  %v7934_v32 = vld [vmem:[%s9694_s27 + $0x38] sm:$0xff]   ;;  %v104_v39 = vld [vmem:[%s9696_s26 + $0x8] sm:$0xff]  ;;  %v8381_v41 = vcombine.low %v6472_v34, %v6473_v38  ;;  %v8383_v42 = vcombine.high %v6472_v34, %v6473_v38 }
  0x1b   :  { %6836 = vmatpush3.bf16.msra.mxu0 %v7914_v10  ;;  %v7931_v28 = vld [vmem:[%s9694_s27 + $0xb0] sm:$0xff]   ;;  %v7935_v33 = vld [vmem:[%s9694_s27 + $0xb8] sm:$0xff]   ;;  %v103_v44 = vld [vmem:[%s9696_s26] sm:$0xff] }
  0x1c   :  { %6858 = vmatpush3.bf16.msra.mxu1 %v7915_v11  ;;  %6837 = vmatprep.subr.bf16.mxu0 %v7916_v12  ;;  %v106_v43 = vld [vmem:[%s9696_s26 + $0x18] sm:$0xff]  ;;  %v7936_v45 = vld [vmem:[%s9694_s27 + $0x140] sm:$0xff]   ;;  %v116_v46 = vrot.slane %v8381_v41, %v115_v35  ;;  %v140_v47 = vrot.slane %v8383_v42, %v115_v35  ;;  %v124_v48 = vrot.slane %v8381_v41, %v123_v36  ;;  %v105_v50 = vld [vmem:[%s9696_s26 + $0x10] sm:$0xff] }
  0x1d   :  { %6859 = vmatprep.subr.bf16.mxu1 %v7917_v13  ;;  %v148_v49 = vrot.slane %v8383_v42, %v123_v36  ;;  %v112_v51 = vrot.slane %v8381_v41, %v111_v37  ;;  %v136_v52 = vrot.slane %v8383_v42, %v111_v37  ;;  %v120_v53 = vrot.slane %v8381_v41, %v119_v40  ;;  %v7937_v1 = vld [vmem:[%s9694_s27 + $0x100] sm:$0xff]   ;;  %v7938_v4 = vld [vmem:[%s9694_s27 + $0x148] sm:$0xff]   ;;  %v7940_v7 = vld [vmem:[%s9694_s27 + $0x150] sm:$0xff]  }
  0x1e   :  { %v144_v54 = vrot.slane %v8383_v42, %v119_v40  ;;  %v170_v55 = vmul.f32 %v116_v46, %v104_v39  ;;  %v176_v56 = vmul.f32 %v140_v47, %v104_v39  ;;  %v172_v57 = vmul.f32 %v124_v48, %v106_v43  ;;  %v7939_v6 = vld [vmem:[%s9694_s27 + $0x108] sm:$0xff]   ;;  %v7941_v10 = vld [vmem:[%s9694_s27 + $0x110] sm:$0xff]   ;;  %v7942_v11 = vld [vmem:[%s9694_s27 + $0x158] sm:$0xff]  }
  0x1f   :  { %6838 = vmatpush3.bf16.msra.mxu0 %v7918_v14  ;;  %v178_v58 = vmul.f32 %v148_v49, %v106_v43  ;;  %v169_v59 = vmul.f32 %v112_v51, %v103_v44  ;;  %v175_v60 = vmul.f32 %v136_v52, %v103_v44  ;;  %v171_v61 = vmul.f32 %v120_v53, %v105_v50  ;;  %v7943_v12 = vld [vmem:[%s9694_s27 + $0x118] sm:$0xff]   ;;  %v108_v13 = vld [vmem:[%s9696_s26 + $0x28] sm:$0xff]  ;;  %v7944_v14 = vld [vmem:[%s9694_s27 + $0x160] sm:$0xff]  }
  0x20   :  { %6860 = vmatpush3.bf16.msra.mxu1 %v7919_v15  ;;  %6839 = vmatprep.subr.bf16.mxu0 %v7920_v16  ;;  %v177_v62 = vmul.f32 %v144_v54, %v105_v50  ;;  %v182_v63 = vpack.c.bf16 %v176_v56, %v170_v55  ;;  %v132_v8 = vrot.slane %v8381_v41, %v131_v5 }
  0x21   :  { %6861 = vmatprep.subr.bf16.mxu1 %v7921_v17  ;;  %v184_v0 = vpack.c.bf16 %v178_v58, %v172_v57  ;;  %v181_v2 = vpack.c.bf16 %v175_v60, %v169_v59  ;;  %v156_v9 = vrot.slane %v8383_v42, %v131_v5  ;;  %v127_v17 = vsub.s32 4, %v8357_v30 }
  0x22   :  { %v183_v3 = vpack.c.bf16 %v177_v62, %v171_v61  ;;  %603 = vmatprep.mubr.bf16.mxu0 %v182_v63  ;;  %v174_v15 = vmul.f32 %v132_v8, %v108_v13 }
  0x23   :  { %6840 = vmatpush3.bf16.msra.mxu0 %v7922_v18  ;;  %644 = vmatprep.mubr.bf16.mxu1 %v184_v0  ;;  %v180_v16 = vmul.f32 %v156_v9, %v108_v13 }
  0x24   :  { %6862 = vmatpush3.bf16.msra.mxu1 %v7923_v19  ;;  %6841 = vmatprep.subr.bf16.mxu0 %v7924_v20  ;;  %v7945_v19 = vld [vmem:[%s9694_s27 + $0x120] sm:$0xff]   ;;  %v7946_v20 = vld [vmem:[%s9694_s27 + $0x168] sm:$0xff]  }
  0x25   :  { %6863 = vmatprep.subr.bf16.mxu1 %v7925_v21  ;;  %v186_v18 = vpack.c.bf16 %v180_v16, %v174_v15  ;;  %v7947_v21 = vld [vmem:[%s9694_s27 + $0x128] sm:$0xff]  }
  0x27   :  { %6842 = vmatpush3.bf16.msra.mxu0 %v7926_v22  ;;  %v7948_v22 = vld [vmem:[%s9694_s27 + $0x170] sm:$0xff]  }
  0x28   :  { %6864 = vmatpush3.bf16.msra.mxu1 %v7927_v23  ;;  %6843 = vmatprep.subr.bf16.mxu0 %v7928_v24  ;;  %v7949_v23 = vld [vmem:[%s9694_s27 + $0x130] sm:$0xff]   ;;  %v107_v24 = vld [vmem:[%s9696_s26 + $0x20] sm:$0xff] }
  0x29   :  { %6865 = vmatprep.subr.bf16.mxu1 %v7929_v26  ;;  %v7950_v26 = vld [vmem:[%s9694_s27 + $0x178] sm:$0xff]  }
  0x2b   :  { %6844 = vmatpush3.bf16.msra.mxu0 %v7930_v27  ;;  %v128_v27 = vrot.slane %v8381_v41, %v127_v17 }
  0x2c   :  { %6866 = vmatpush3.bf16.msra.mxu1 %v7931_v28  ;;  %6845 = vmatprep.subr.bf16.mxu0 %v7932_v29  ;;  %v152_v28 = vrot.slane %v8383_v42, %v127_v17  ;;  %v7951_v29 = vld [vmem:[%s9694_s27 + $0x138] sm:$0xff]  }
  0x2d   :  { %6867 = vmatprep.subr.bf16.mxu1 %v7933_v31  ;;  %v173_v30 = vmul.f32 %v128_v27, %v107_v24 }
  0x2e   :  { %v179_v31 = vmul.f32 %v152_v28, %v107_v24 }
  0x2f   :  { %6846 = vmatpush3.bf16.msra.mxu0 %v7934_v32 }
  0x30   :  { %6868 = vmatpush3.bf16.msra.mxu1 %v7935_v33  ;;  %6875 = vmatprep.subr.bf16.mxu0 %v7936_v45  ;;  %v185_v32 = vpack.c.bf16 %v179_v31, %v173_v30 }
  0x32   :  { %604 = vmatmul.mubr.bf16.vlgmr.msra.gmra.mrb[0].mxu0 %v181_v2 }
  0x33   :  { %645 = vmatmul.mubr.bf16.vlgmr.msra.gmra.mrb[0].mxu1 %v183_v3  ;;  %6876 = vmatpush3.bf16.msra.mxu0 %v7937_v1 }
  0x34   :  { %6877 = vmatprep.subr.bf16.mxu0 %v7938_v4  ;;  %685 = vmatprep.mubr.bf16.mxu0 %v186_v18 }
  0x37   :  { %6878 = vmatpush3.bf16.msra.mxu0 %v7939_v6 }
  0x38   :  { %6879 = vmatprep.subr.bf16.mxu0 %v7940_v7 }
  0x3b   :  { %6880 = vmatpush3.bf16.msra.mxu0 %v7941_v10 }
  0x3c   :  { %6881 = vmatprep.subr.bf16.mxu0 %v7942_v11 }
  0x3f   :  { %6882 = vmatpush3.bf16.msra.mxu0 %v7943_v12 }
  0x40   :  { %6883 = vmatprep.subr.bf16.mxu0 %v7944_v14 }
  0x43   :  { %6884 = vmatpush3.bf16.msra.mxu0 %v7945_v19 }
  0x44   :  { %6885 = vmatprep.subr.bf16.mxu0 %v7946_v20 }
  0x47   :  { %6886 = vmatpush3.bf16.msra.mxu0 %v7947_v21 }
  0x48   :  { %6887 = vmatprep.subr.bf16.mxu0 %v7948_v22 }
  0x4b   :  { %6888 = vmatpush3.bf16.msra.mxu0 %v7949_v23 }
  0x4c   :  { %6889 = vmatprep.subr.bf16.mxu0 %v7950_v26 }
  0x4f   :  { %6890 = vmatpush3.bf16.msra.mxu0 %v7951_v29 }
  0x52   :  { %686 = vmatmul.mubr.bf16.vlgmr.msra.gmra.mrb[4].mxu0 %v185_v32 }
  0x53   :  { %29 = vsyncpa [#allocation3], 0  ;;  %s9697_s29 = sld [smem:[#allocation8_spill]]  ;;  %vm699_vm0 = vcmask 261120   ;;  %s9698_s30 = sld [smem:[#allocation11_spill]]  ;;  %v8140_v7 = vmov 0.0  }
  0x54   :  { %7164 = vmatprep.subr.bf16.mxu1 %v8140_v7  ;;  %7212 = vmatprep.subr.bf16.mxu0 %v8140_v7  ;;  %vm8141_vm1 = vmmov 0   ;;  %s9699_s2 = sld [smem:[#allocation9_spill]]  ;;  %s9701_s1 = sld [smem:[#allocation13_spill]]  ;;  %vm2015_vm2 = vcmask 64512   ;;  %vm2499_vm3 = vcmask 1043456   ;;  %vm6326_vm5 = vcmask 1041409  }
  0x55   :  { %7168 = vmatprep.mubr.msk.bf16.mxu1 %vm8141_vm1, %v8140_v7  ;;  %7216 = vmatprep.mubr.msk.bf16.mxu0 %vm8141_vm1, %v8140_v7  ;;  %s9702_s0 = sld [smem:[#allocation12_spill]]  ;;  %vm6329_vm6 = vcmask 254976   ;;  %vm6456_vm7 = vcmask 33792  }
  0x59   :  { %v694_v52 = vld [vmem:[%s9697_s29] sm:$0xff]  ;;  %v8489_v8 = vld [vmem:[%s9698_s30 + $0x8] sm:$0xff]   ;;  %s9700_s29 = sld [smem:[#allocation10_spill]]  ;;  %v7955_v26 = vld [vmem:[%s9698_s30 + $0x10] sm:$0xff]  }
  0x5a   :  { %v8480_v6 = vld [vmem:[%s9698_s30] sm:$0xff]   ;;  %v7956_v10 = vld [vmem:[%s9698_s30 + $0x28] sm:$0xff]   ;;  %v7957_v30 = vld [vmem:[%s9698_s30 + $0x18] sm:$0xff]  }
  0x5b   :  { %7165 = vmatpush3.bf16.msra.mxu1 %v8480_v6  ;;  %v7954_v9 = vld [vmem:[%s9698_s30 + $0x20] sm:$0xff]  }
  0x5c   :  { %7166 = vmatprep.subr.bf16.mxu1 %v8140_v7  ;;  %7213 = vmatpush3.bf16.msra.mxu0 %v7954_v9  ;;  %v6522_v18 = vld [vmem:[%s9699_s2] ss:$0 sm:$0xff] }
  0x5d   :  { %7214 = vmatprep.subr.bf16.mxu0 %v8140_v7  ;;  %v7958_v31 = vld [vmem:[%s9701_s1] sm:$0xff]  }
  0x5f   :  { %7167 = vmatpush3.bf16.msra.mxu1 %v8489_v8  ;;  %v6523_v20 = vld [vmem:[%s9700_s29] ss:$0 sm:$0xff] }
  0x60   :  { %7172 = vmatprep.subr.bf16.mxu1 %v8140_v7  ;;  %7215 = vmatpush3.bf16.msra.mxu0 %v7956_v10 }
  0x61   :  { %7228 = vmatprep.subr.bf16.mxu0 %v8140_v7 }
 0x105   :  { %v6847_v33 = vpop.f32.mrb[0].mxu0 }
 0x106   :  { %v6869_v34 = vpop.f32.mrb[0].mxu1  ;;  %v6848_v35 = vpop.f32.mrb[1].mxu0 }
 0x107   :  { %v6870_v36 = vpop.f32.mrb[1].mxu1  ;;  %v6849_v37 = vadd.f32 %v6848_v35, %v6847_v33  ;;  %v6850_v39 = vpop.f32.mrb[2].mxu0  ;;  %v7959_v33 = vld [vmem:[%s9701_s1 + $0x8] sm:$0xff]   ;;  %v7961_v35 = vld [vmem:[%s9698_s30 + $0x30] sm:$0xff]  }
 0x108   :  { %v6871_v38 = vadd.f32 %v6870_v36, %v6869_v34  ;;  %v6872_v40 = vpop.f32.mrb[2].mxu1  ;;  %v6851_v41 = vpop.f32.mrb[3].mxu0  ;;  %v7960_v34 = vld [vmem:[%s9701_s1 + $0x20] sm:$0xff]   ;;  %v7962_v36 = vld [vmem:[%s9701_s1 + $0x28] sm:$0xff]  }
 0x109   :  { %v6873_v42 = vpop.f32.mrb[3].mxu1  ;;  %v6852_v44 = vadd.f32 %v6851_v41, %v6850_v39  ;;  %v7965_v39 = vld [vmem:[%s9662_s10 + $0x8] sm:$0xff]   ;;  %v7967_v41 = vld [vmem:[%s9701_s1 + $0x10] sm:$0xff]  }
 0x10a   :  { %v647_v43 = vadd.f32 %v6871_v38, %v6849_v37  ;;  %v6874_v45 = vadd.f32 %v6873_v42, %v6872_v40  ;;  %v7963_v37 = vld [vmem:[%s9698_s30 + $0x38] sm:$0xff]   ;;  %v7964_v38 = vld [vmem:[%s9662_s10] sm:$0xff]   ;;  %v7968_v42 = vld [vmem:[%s9662_s10 + $0x28] sm:$0xff]  }
 0x10b   :  { %v7966_v40 = vld [vmem:[%s9662_s10 + $0x20] sm:$0xff]  }
 0x10c   :  { %v650_v46 = vadd.f32 %v6874_v45, %v6852_v44  ;;  %v7970_v44 = vld [vmem:[%s9701_s1 + $0x30] sm:$0xff]   ;;  %v7971_v45 = vld [vmem:[%s9701_s1 + $0x38] sm:$0xff]  }
 0x125   :  { %v6891_v47 = vpop.f32.mrb[4].mxu0 }
 0x126   :  { %v6892_v48 = vpop.f32.mrb[5].mxu0 }
 0x127   :  { %v6893_v49 = vadd.f32 %v6892_v48, %v6891_v47  ;;  %v6894_v50 = vpop.f32.mrb[6].mxu0  ;;  %v7973_v47 = vld [vmem:[%s9662_s10 + $0x18] sm:$0xff]   ;;  %v7974_v48 = vld [vmem:[%s9662_s10 + $0x30] sm:$0xff]  }
 0x128   :  { %v6895_v51 = vpop.f32.mrb[7].mxu0 }
 0x129   :  { %v688_v53 = vadd.f32 %v6893_v49, %v647_v43  ;;  %v6896_v54 = vadd.f32 %v6895_v51, %v6894_v50  ;;  %v7969_v43 = vld [vmem:[%s9701_s1 + $0x18] sm:$0xff]  }
 0x12a   :  { %v7975_v49 = vld [vmem:[%s9662_s10 + $0x38] sm:$0xff]  }
 0x12b   :  { %v691_v55 = vadd.f32 %v6896_v54, %v650_v46  ;;  %v8465_v56 = vadd.f32 %v694_v52, %v688_v53  ;;  %v7972_v46 = vld [vmem:[%s9662_s10 + $0x10] sm:$0xff]  }
 0x12d   :  { %v8467_v57 = vadd.f32 %v694_v52, %v691_v55  ;;  %v700_v58 = vsel %vm699_vm0, %v8465_v56, 0.0 }
 0x12e   :  { %701 = vadd.xlane.f32.xlu0 %v700_v58 }
 0x12f   :  { %v703_v59 = vsel %vm699_vm0, %v8467_v57, 0.0 }
 0x132   :  { %704 = vadd.xlane.f32.xlu0 %v703_v59 }
 0x1bb   :  { %v702_v60 = vpop.xlane.xlu0 %701 }
 0x1bc   :  { %v707_v61 = vmul.f32 0.03125, %v702_v60 }
 0x1be   :  { %v709_v62 = vsub.f32 %v8465_v56, %v707_v61 }
 0x1bf   :  { %v705_v63 = vpop.xlane.xlu0 %704 }
 0x1c0   :  { %v708_v0 = vmul.f32 0.03125, %v705_v63  ;;  %v711_v1 = vmul.f32 %v709_v62, %v709_v62  ;;  %v6546_v63 = vld [vmem:[%s9661_s9] ss:$0 sm:$0xff] }
 0x1c2   :  { %v710_v2 = vsub.f32 %v8467_v57, %v708_v0  ;;  %v713_v3 = vsel %vm699_vm0, %v711_v1, 0.0 }
 0x1c3   :  { %714 = vadd.xlane.f32.xlu1 %v713_v3 }
 0x1c4   :  { %v712_v4 = vmul.f32 %v710_v2, %v710_v2 }
 0x1c6   :  { %v716_v5 = vsel %vm699_vm0, %v712_v4, 0.0 }
 0x1c7   :  { %717 = vadd.xlane.f32.xlu1 %v716_v5 }
 0x250   :  { %v715_v11 = vpop.xlane.xlu1 %714 }
 0x251   :  { %v719_v12 = vmul.f32 0.03125, %v715_v11 }
 0x253   :  { %v721_v13 = vadd.f32 1e-06, %v719_v12 }
 0x254   :  { %v718_v14 = vpop.xlane.xlu1 %717 }
 0x255   :  { %8022 = vrsqrt.f32 %v721_v13  ;;  %v720_v15 = vmul.f32 0.03125, %v718_v14  ;;  %v6548_v13 = vld [vmem:[%s9661_s9 + $0x2] ss:$0 sm:$0xff] }
 0x257   :  { %v722_v16 = vadd.f32 1e-06, %v720_v15 }
 0x259   :  { %8024 = vrsqrt.f32 %v722_v16 }
 0x25f   :  { %v8023_v17 = vpop.eup %8022 }
 0x260   :  { %v725_v19 = vmul.f32 %v8023_v17, %v709_v62 }
 0x262   :  { %v733_v21 = vmul.f32 %v6522_v18, %v725_v19 }
 0x263   :  { %v8025_v22 = vpop.eup %8024 }
 0x264   :  { %v741_v23 = vadd.f32 %v6523_v20, %v733_v21  ;;  %v726_v24 = vmul.f32 %v8025_v22, %v710_v2 }
 0x266   :  { %v8514_v27 = vpack.c.bf16 %v741_v23, %v741_v23  ;;  %v734_v28 = vmul.f32 %v6522_v18, %v726_v24 }
 0x268   :  { %v742_v29 = vadd.f32 %v6523_v20, %v734_v28  ;;  %7169 = vmatmul.mubr.msk.bf16.vlgmr.msra.gmra.mrb[4].mxu1 %vm699_vm0, %v8514_v27 }
 0x269   :  { %7173 = vmatpush3.bf16.msra.mxu1 %v7955_v26  ;;  %7176 = vmatprep.mubr.msk.bf16.mxu1 %vm8141_vm1, %v8140_v7 }
 0x26a   :  { %v8526_v32 = vpack.c.bf16 %v742_v29, %v742_v29  ;;  %7174 = vmatprep.subr.bf16.mxu1 %v8140_v7 }
 0x26c   :  { %7217 = vmatmul.mubr.msk.bf16.vlgmr.msra.gmra.mrb[8].mxu0 %vm699_vm0, %v8526_v32 }
 0x26d   :  { %7175 = vmatpush3.bf16.msra.mxu1 %v7957_v30  ;;  %7229 = vmatpush3.bf16.msra.mxu0 %v7958_v31 }
 0x26e   :  { %7180 = vmatprep.subr.bf16.mxu1 %v8140_v7  ;;  %7230 = vmatprep.subr.bf16.mxu0 %v8140_v7 }
 0x26f   :  { %7232 = vmatprep.mubr.msk.bf16.mxu0 %vm8141_vm1, %v8140_v7 }
 0x270   :  { %7177 = vmatmul.mubr.msk.bf16.vlgmr.msra.gmra.mrb[8].mxu1 %vm699_vm0, %v8514_v27 }
 0x271   :  { %7181 = vmatpush3.bf16.msra.mxu1 %v7954_v9  ;;  %7231 = vmatpush3.bf16.msra.mxu0 %v7959_v33 }
 0x272   :  { %7182 = vmatprep.subr.bf16.mxu1 %v8140_v7  ;;  %7244 = vmatprep.subr.bf16.mxu0 %v8140_v7 }
 0x273   :  { %7184 = vmatprep.mubr.msk.bf16.mxu1 %vm8141_vm1, %v8140_v7 }
 0x274   :  { %7233 = vmatmul.mubr.msk.bf16.vlgmr.msra.gmra.mrb[12].mxu0 %vm699_vm0, %v8514_v27 }
 0x275   :  { %7183 = vmatpush3.bf16.msra.mxu1 %v7956_v10  ;;  %7245 = vmatpush3.bf16.msra.mxu0 %v7960_v34 }
 0x276   :  { %7188 = vmatprep.subr.bf16.mxu1 %v8140_v7  ;;  %7246 = vmatprep.subr.bf16.mxu0 %v8140_v7 }
 0x277   :  { %7248 = vmatprep.mubr.msk.bf16.mxu0 %vm8141_vm1, %v8140_v7 }
 0x278   :  { %7185 = vmatmul.mubr.msk.bf16.vlgmr.msra.gmra.mrb[12].mxu1 %vm699_vm0, %v8514_v27 }
 0x279   :  { %7189 = vmatpush3.bf16.msra.mxu1 %v7961_v35  ;;  %7247 = vmatpush3.bf16.msra.mxu0 %v7962_v36 }
 0x27a   :  { %7190 = vmatprep.subr.bf16.mxu1 %v8140_v7  ;;  %7260 = vmatprep.subr.bf16.mxu0 %v8140_v7 }
 0x27b   :  { %7192 = vmatprep.mubr.msk.bf16.mxu1 %vm8141_vm1, %v8140_v7 }
 0x27c   :  { %7249 = vmatmul.mubr.msk.bf16.vlgmr.msra.gmra.mrb[16].mxu0 %vm699_vm0, %v8514_v27 }
 0x27d   :  { %7191 = vmatpush3.bf16.msra.mxu1 %v7963_v37  ;;  %7261 = vmatpush3.bf16.msra.mxu0 %v7958_v31 }
 0x27e   :  { %7196 = vmatprep.subr.bf16.mxu1 %v8140_v7  ;;  %7262 = vmatprep.subr.bf16.mxu0 %v8140_v7 }
 0x27f   :  { %7264 = vmatprep.mubr.msk.bf16.mxu0 %vm8141_vm1, %v8140_v7 }
 0x280   :  { %7193 = vmatmul.mubr.msk.bf16.vlgmr.msra.gmra.mrb[16].mxu1 %vm699_vm0, %v8514_v27 }
 0x281   :  { %7197 = vmatpush3.bf16.msra.mxu1 %v8480_v6  ;;  %7263 = vmatpush3.bf16.msra.mxu0 %v7959_v33 }
 0x282   :  { %7198 = vmatprep.subr.bf16.mxu1 %v8140_v7  ;;  %7276 = vmatprep.subr.bf16.mxu0 %v8140_v7 }
 0x283   :  { %7200 = vmatprep.mubr.msk.bf16.mxu1 %vm8141_vm1, %v8140_v7 }
 0x284   :  { %7265 = vmatmul.mubr.msk.bf16.vlgmr.msra.gmra.mrb[20].mxu0 %vm699_vm0, %v8526_v32 }
 0x285   :  { %7199 = vmatpush3.bf16.msra.mxu1 %v8489_v8  ;;  %7277 = vmatpush3.bf16.msra.mxu0 %v7960_v34  ;;  %v6526_v8 = vld [vmem:[%s9702_s0] ss:$0 sm:$0xff] }
 0x286   :  { %7204 = vmatprep.subr.bf16.mxu1 %v8140_v7  ;;  %7278 = vmatprep.subr.bf16.mxu0 %v8140_v7 }
 0x287   :  { %7280 = vmatprep.mubr.msk.bf16.mxu0 %vm8141_vm1, %v8140_v7 }
 0x288   :  { %7201 = vmatmul.mubr.msk.bf16.vlgmr.msra.gmra.mrb[20].mxu1 %vm699_vm0, %v8526_v32 }
 0x289   :  { %7205 = vmatpush3.bf16.msra.mxu1 %v7955_v26  ;;  %7279 = vmatpush3.bf16.msra.mxu0 %v7962_v36 }
 0x28a   :  { %7206 = vmatprep.subr.bf16.mxu1 %v8140_v7  ;;  %7292 = vmatprep.subr.bf16.mxu0 %v8140_v7 }
 0x28b   :  { %7208 = vmatprep.mubr.msk.bf16.mxu1 %vm8141_vm1, %v8140_v7 }
 0x28c   :  { %7281 = vmatmul.mubr.msk.bf16.vlgmr.msra.gmra.mrb[24].mxu0 %vm699_vm0, %v8526_v32 }
 0x28d   :  { %7207 = vmatpush3.bf16.msra.mxu1 %v7957_v30  ;;  %7293 = vmatpush3.bf16.msra.mxu0 %v7964_v38 }
 0x28e   :  { %7220 = vmatprep.subr.bf16.mxu1 %v8140_v7  ;;  %7294 = vmatprep.subr.bf16.mxu0 %v8140_v7 }
 0x28f   :  { %7296 = vmatprep.mubr.msk.bf16.mxu0 %vm8141_vm1, %v8140_v7 }
 0x290   :  { %7209 = vmatmul.mubr.msk.bf16.vlgmr.msra.gmra.mrb[24].mxu1 %vm699_vm0, %v8526_v32 }
 0x291   :  { %7221 = vmatpush3.bf16.msra.mxu1 %v7961_v35  ;;  %7295 = vmatpush3.bf16.msra.mxu0 %v7965_v39 }
 0x292   :  { %7222 = vmatprep.subr.bf16.mxu1 %v8140_v7  ;;  %7308 = vmatprep.subr.bf16.mxu0 %v8140_v7 }
 0x293   :  { %7224 = vmatprep.mubr.msk.bf16.mxu1 %vm8141_vm1, %v8140_v7 }
 0x294   :  { %7297 = vmatmul.mubr.msk.bf16.vlgmr.msra.gmra.mrb[28].mxu0 %vm699_vm0, %v8514_v27 }
 0x295   :  { %7223 = vmatpush3.bf16.msra.mxu1 %v7963_v37  ;;  %7309 = vmatpush3.bf16.msra.mxu0 %v7966_v40 }
 0x296   :  { %7236 = vmatprep.subr.bf16.mxu1 %v8140_v7  ;;  %7310 = vmatprep.subr.bf16.mxu0 %v8140_v7 }
 0x297   :  { %7312 = vmatprep.mubr.msk.bf16.mxu0 %vm8141_vm1, %v8140_v7 }
 0x298   :  { %7225 = vmatmul.mubr.msk.bf16.vlgmr.msra.gmra.mrb[28].mxu1 %vm699_vm0, %v8526_v32 }
 0x299   :  { %7237 = vmatpush3.bf16.msra.mxu1 %v7967_v41  ;;  %7311 = vmatpush3.bf16.msra.mxu0 %v7968_v42 }
 0x29a   :  { %7238 = vmatprep.subr.bf16.mxu1 %v8140_v7  ;;  %7324 = vmatprep.subr.bf16.mxu0 %v8140_v7 }
 0x29b   :  { %7240 = vmatprep.mubr.msk.bf16.mxu1 %vm8141_vm1, %v8140_v7 }
 0x29c   :  { %7313 = vmatmul.mubr.msk.bf16.vlgmr.msra.gmra.mrb[32].mxu0 %vm699_vm0, %v8514_v27 }
 0x29d   :  { %7239 = vmatpush3.bf16.msra.mxu1 %v7969_v43  ;;  %7325 = vmatpush3.bf16.msra.mxu0 %v7964_v38 }
 0x29e   :  { %7252 = vmatprep.subr.bf16.mxu1 %v8140_v7  ;;  %7326 = vmatprep.subr.bf16.mxu0 %v8140_v7 }
 0x29f   :  { %7328 = vmatprep.mubr.msk.bf16.mxu0 %vm8141_vm1, %v8140_v7 }
 0x2a0   :  { %7241 = vmatmul.mubr.msk.bf16.vlgmr.msra.gmra.mrb[32].mxu1 %vm699_vm0, %v8514_v27 }
 0x2a1   :  { %7253 = vmatpush3.bf16.msra.mxu1 %v7970_v44  ;;  %7327 = vmatpush3.bf16.msra.mxu0 %v7965_v39 }
 0x2a2   :  { %7254 = vmatprep.subr.bf16.mxu1 %v8140_v7  ;;  %7340 = vmatprep.subr.bf16.mxu0 %v8140_v7 }
 0x2a3   :  { %7256 = vmatprep.mubr.msk.bf16.mxu1 %vm8141_vm1, %v8140_v7 }
 0x2a4   :  { %7329 = vmatmul.mubr.msk.bf16.vlgmr.msra.gmra.mrb[36].mxu0 %vm699_vm0, %v8526_v32 }
 0x2a5   :  { %7255 = vmatpush3.bf16.msra.mxu1 %v7971_v45  ;;  %7341 = vmatpush3.bf16.msra.mxu0 %v7966_v40 }
 0x2a6   :  { %7268 = vmatprep.subr.bf16.mxu1 %v8140_v7  ;;  %7342 = vmatprep.subr.bf16.mxu0 %v8140_v7 }
 0x2a7   :  { %7344 = vmatprep.mubr.msk.bf16.mxu0 %vm8141_vm1, %v8140_v7 }
 0x2a8   :  { %7257 = vmatmul.mubr.msk.bf16.vlgmr.msra.gmra.mrb[36].mxu1 %vm699_vm0, %v8514_v27 }
 0x2a9   :  { %7269 = vmatpush3.bf16.msra.mxu1 %v7967_v41  ;;  %7343 = vmatpush3.bf16.msra.mxu0 %v7968_v42 }
 0x2aa   :  { %7270 = vmatprep.subr.bf16.mxu1 %v8140_v7  ;;  %7272 = vmatprep.mubr.msk.bf16.mxu1 %vm8141_vm1, %v8140_v7 }
 0x2ab   :  { %7356 = vmatprep.subr.bf16.mxu0 %v8140_v7 }
 0x2ac   :  { %7345 = vmatmul.mubr.msk.bf16.vlgmr.msra.gmra.mrb[40].mxu0 %vm699_vm0, %v8526_v32 }
 0x2ad   :  { %7271 = vmatpush3.bf16.msra.mxu1 %v7969_v43  ;;  %7358 = vmatprep.mubr.msk.bf16.mxu0 %vm8141_vm1, %v8140_v7 }
 0x2ae   :  { %7284 = vmatprep.subr.bf16.mxu1 %v8140_v7 }
 0x2b0   :  { %7273 = vmatmul.mubr.msk.bf16.vlgmr.msra.gmra.mrb[40].mxu1 %vm699_vm0, %v8526_v32 }
 0x2b1   :  { %7285 = vmatpush3.bf16.msra.mxu1 %v7970_v44  ;;  %7288 = vmatprep.mubr.msk.bf16.mxu1 %vm8141_vm1, %v8140_v7 }
 0x2b2   :  { %7286 = vmatprep.subr.bf16.mxu1 %v8140_v7 }
 0x2b5   :  { %7287 = vmatpush3.bf16.msra.mxu1 %v7971_v45 }
 0x2b6   :  { %7300 = vmatprep.subr.bf16.mxu1 %v8140_v7 }
 0x2b8   :  { %7289 = vmatmul.mubr.msk.bf16.vlgmr.msra.gmra.mrb[44].mxu1 %vm699_vm0, %v8526_v32 }
 0x2b9   :  { %7301 = vmatpush3.bf16.msra.mxu1 %v7972_v46  ;;  %7304 = vmatprep.mubr.msk.bf16.mxu1 %vm8141_vm1, %v8140_v7 }
 0x2ba   :  { %7302 = vmatprep.subr.bf16.mxu1 %v8140_v7 }
 0x2bd   :  { %7303 = vmatpush3.bf16.msra.mxu1 %v7973_v47 }
 0x2be   :  { %7316 = vmatprep.subr.bf16.mxu1 %v8140_v7 }
 0x2c0   :  { %7305 = vmatmul.mubr.msk.bf16.vlgmr.msra.gmra.mrb[48].mxu1 %vm699_vm0, %v8514_v27 }
 0x2c1   :  { %7317 = vmatpush3.bf16.msra.mxu1 %v7974_v48  ;;  %7320 = vmatprep.mubr.msk.bf16.mxu1 %vm8141_vm1, %v8140_v7 }
 0x2c2   :  { %7318 = vmatprep.subr.bf16.mxu1 %v8140_v7 }
 0x2c5   :  { %7319 = vmatpush3.bf16.msra.mxu1 %v7975_v49 }
 0x2c6   :  { %7332 = vmatprep.subr.bf16.mxu1 %v8140_v7 }
 0x2c8   :  { %7321 = vmatmul.mubr.msk.bf16.vlgmr.msra.gmra.mrb[52].mxu1 %vm699_vm0, %v8514_v27  ;;  %v6528_v27 = vld [vmem:[%s9702_s0 + $0x2] ss:$0 sm:$0xff] }
 0x2c9   :  { %7333 = vmatpush3.bf16.msra.mxu1 %v7972_v46  ;;  %7336 = vmatprep.mubr.msk.bf16.mxu1 %vm8141_vm1, %v8140_v7 }
 0x2ca   :  { %7334 = vmatprep.subr.bf16.mxu1 %v8140_v7 }
 0x2cd   :  { %7335 = vmatpush3.bf16.msra.mxu1 %v7973_v47 }
 0x2ce   :  { %7348 = vmatprep.subr.bf16.mxu1 %v8140_v7 }
 0x2d0   :  { %7337 = vmatmul.mubr.msk.bf16.vlgmr.msra.gmra.mrb[56].mxu1 %vm699_vm0, %v8526_v32 }
 0x2d1   :  { %7349 = vmatpush3.bf16.msra.mxu1 %v7974_v48  ;;  %7352 = vmatprep.mubr.msk.bf16.mxu1 %vm8141_vm1, %v8140_v7 }
 0x2d2   :  { %7350 = vmatprep.subr.bf16.mxu1 %v8140_v7 }
 0x2d5   :  { %7351 = vmatpush3.bf16.msra.mxu1 %v7975_v49 }
 0x2d6   :  { %7362 = vmatprep.subr.bf16.mxu1 %v8140_v7 }
 0x2d8   :  { %7353 = vmatmul.mubr.msk.bf16.vlgmr.msra.gmra.mrb[60].mxu1 %vm699_vm0, %v8526_v32 }
 0x2d9   :  { %7364 = vmatprep.mubr.msk.bf16.mxu1 %vm8141_vm1, %v8140_v7 }
 0x33b   :  { %v842_v50 = vpop.f32.mrb[4].mxu1 }
 0x33c   :  { %v7170_v51 = vpop.f32.mrb[5].mxu1  ;;  %v843_v14 = vadd.f32 %v6526_v8, %v842_v50 }
 0x33d   :  { %v845_v52 = vpop.f32.mrb[6].mxu1 }
 0x33e   :  { %v7171_v53 = vpop.f32.mrb[7].mxu1  ;;  %v1167_v20 = vpack.c.bf16 %v843_v14, %v843_v14 }
 0x33f   :  { %v8717_v54 = vpop.f32.mrb[8].mxu0 }
 0x340   :  { %v7218_v55 = vpop.f32.mrb[9].mxu0 }
 0x341   :  { %v1124_v58 = vpop.f32.mrb[10].mxu0 }
 0x342   :  { %v7219_v59 = vpop.f32.mrb[11].mxu0  ;;  %v6566_v58 = vld [vmem:[%s9663_s11] ss:$0 sm:$0xff] }
 0x343   :  { %v8719_v60 = vpop.f32.mrb[8].mxu1  ;;  %v1122_v59 = vadd.f32 %v6528_v27, %v8717_v54 }
 0x344   :  { %v7178_v61 = vpop.f32.mrb[9].mxu1 }
 0x345   :  { %v897_v62 = vpop.f32.mrb[10].mxu1 }
 0x346   :  { %v7179_v0 = vpop.f32.mrb[11].mxu1 }
 0x347   :  { %v1265_v1 = vpop.f32.mrb[12].mxu0 }
 0x348   :  { %v1266_v2 = vadd.f32 %v6546_v63, %v1265_v1  ;;  %v7234_v3 = vpop.f32.mrb[13].mxu0 }
 0x349   :  { %v1268_v4 = vpop.f32.mrb[14].mxu0 }
 0x34a   :  { %v1587_v5 = vpack.c.bf16 %v1266_v2, %v1266_v2  ;;  %v7235_v6 = vpop.f32.mrb[15].mxu0  ;;  %v1173_v2 = vpack.c.bf16 %v1122_v59, %v1122_v59 }
 0x34b   :  { %v946_v9 = vpop.f32.mrb[12].mxu1 }
 0x34c   :  { %v2020_v10 = vsel %vm2015_vm2, %v1587_v5, 0  ;;  %v7186_v11 = vpop.f32.mrb[13].mxu1  ;;  %v947_v29 = vadd.f32 %v6528_v27, %v946_v9 }
 0x34d   :  { %v949_v12 = vpop.f32.mrb[14].mxu1  ;;  %7357 = vmatpush3.bf16.xpose.msra.mxu0 %v2020_v10 }
 0x34e   :  { %v7187_v15 = vpop.f32.mrb[15].mxu1  ;;  %7368 = vmatprep.subr.bf16.mxu0 %v8140_v7  ;;  %v1169_v35 = vpack.c.bf16 %v947_v29, %v947_v29  ;;  %v6549_v29 = vld [vmem:[%s9661_s9 + $0x3] ss:$0 sm:$0xff] }
 0x34f   :  { %v1369_v16 = vpop.f32.mrb[16].mxu0 }
 0x350   :  { %v1370_v17 = vadd.f32 %v6548_v13, %v1369_v16  ;;  %v7250_v18 = vpop.f32.mrb[17].mxu0 }
 0x351   :  { %v1372_v19 = vpop.f32.mrb[18].mxu0 }
 0x352   :  { %v1589_v21 = vpack.c.bf16 %v1370_v17, %v1370_v17  ;;  %v7251_v22 = vpop.f32.mrb[19].mxu0 }
 0x353   :  { %v8732_v23 = vpop.f32.mrb[16].mxu1 }
 0x354   :  { %v2112_v24 = vsel %vm2015_vm2, %v1589_v21, 0  ;;  %v7194_v26 = vpop.f32.mrb[17].mxu1  ;;  %7359 = vmatmul.mubr.msk.bf16.vlgmr.msra.gmra.mrb[44].mxu0 %vm2015_vm2, %v1167_v20  ;;  %v6527_v21 = vld [vmem:[%s9702_s0 + $0x1] ss:$0 sm:$0xff] }
 0x355   :  { %v1001_v28 = vpop.f32.mrb[18].mxu1  ;;  %7369 = vmatpush3.bf16.xpose.msra.mxu0 %v2112_v24  ;;  %7370 = vmatprep.mubr.msk.bf16.mxu0 %vm8141_vm1, %v8140_v7 }
 0x356   :  { %v7195_v30 = vpop.f32.mrb[19].mxu1  ;;  %7380 = vmatprep.subr.bf16.mxu0 %v8140_v7 }
 0x357   :  { %v1461_v31 = vpop.f32.mrb[20].mxu0  ;;  %v895_v30 = vadd.f32 %v6527_v21, %v8719_v60 }
 0x358   :  { %v1462_v32 = vadd.f32 %v6546_v63, %v1461_v31  ;;  %v7266_v33 = vpop.f32.mrb[21].mxu0 }
 0x359   :  { %v1464_v34 = vpop.f32.mrb[22].mxu0 }
 0x35a   :  { %v1591_v36 = vpack.c.bf16 %v1462_v32, %v1462_v32  ;;  %v7267_v37 = vpop.f32.mrb[23].mxu0 }
 0x35b   :  { %v1041_v38 = vpop.f32.mrb[20].mxu1 }
 0x35c   :  { %v2204_v39 = vsel %vm2015_vm2, %v1591_v36, 0  ;;  %v7202_v40 = vpop.f32.mrb[21].mxu1  ;;  %7371 = vmatmul.mubr.msk.bf16.vlgmr.msra.gmra.mrb[48].mxu0 %vm2015_vm2, %v1169_v35  ;;  %v1042_v42 = vadd.f32 %v6526_v8, %v1041_v38  ;;  %v1168_v36 = vpack.c.bf16 %v895_v30, %v895_v30 }
 0x35d   :  { %v1044_v41 = vpop.f32.mrb[22].mxu1  ;;  %7381 = vmatpush3.bf16.xpose.msra.mxu0 %v2204_v39  ;;  %7382 = vmatprep.mubr.msk.bf16.mxu0 %vm8141_vm1, %v8140_v7  ;;  %v6529_v39 = vld [vmem:[%s9702_s0 + $0x3] ss:$0 sm:$0xff] }
 0x35e   :  { %v7203_v43 = vpop.f32.mrb[23].mxu1  ;;  %7392 = vmatprep.subr.bf16.mxu0 %v8140_v7  ;;  %v1171_v48 = vpack.c.bf16 %v1042_v42, %v1042_v42 }
 0x35f   :  { %v1541_v44 = vpop.f32.mrb[24].mxu0  ;;  %v999_v43 = vadd.f32 %v6529_v39, %v8732_v23 }
 0x360   :  { %v1542_v45 = vadd.f32 %v6548_v13, %v1541_v44  ;;  %v7282_v46 = vpop.f32.mrb[25].mxu0  ;;  %v6547_v13 = vld [vmem:[%s9661_s9 + $0x1] ss:$0 sm:$0xff] }
 0x361   :  { %v1544_v47 = vpop.f32.mrb[26].mxu0 }
 0x362   :  { %v1593_v49 = vpack.c.bf16 %v1542_v45, %v1542_v45  ;;  %v7283_v50 = vpop.f32.mrb[27].mxu0 }
 0x363   :  { %v8747_v51 = vpop.f32.mrb[24].mxu1 }
 0x364   :  { %v2296_v52 = vsel %vm2015_vm2, %v1593_v49, 0  ;;  %v7210_v53 = vpop.f32.mrb[25].mxu1  ;;  %7383 = vmatmul.mubr.msk.bf16.vlgmr.msra.gmra.mrb[52].mxu0 %vm2015_vm2, %v1171_v48  ;;  %v1170_v49 = vpack.c.bf16 %v999_v43, %v999_v43  ;;  %v1082_v23 = vadd.f32 %v6527_v21, %v8747_v51 }
 0x365   :  { %v1084_v55 = vpop.f32.mrb[26].mxu1  ;;  %7393 = vmatpush3.bf16.xpose.msra.mxu0 %v2296_v52  ;;  %7394 = vmatprep.mubr.msk.bf16.mxu0 %vm8141_vm1, %v8140_v7 }
 0x366   :  { %v7211_v61 = vpop.f32.mrb[27].mxu1  ;;  %7404 = vmatprep.subr.bf16.mxu0 %v8140_v7 }
 0x367   :  { %v1685_v62 = vpop.f32.mrb[28].mxu0 }
 0x368   :  { %v1686_v63 = vadd.f32 %v6566_v58, %v1685_v62  ;;  %v7298_v0 = vpop.f32.mrb[29].mxu0  ;;  %v1172_v62 = vpack.c.bf16 %v1082_v23, %v1082_v23 }
 0x369   :  { %v1688_v1 = vpop.f32.mrb[30].mxu0 }
 0x36a   :  { %v2007_v3 = vpack.c.bf16 %v1686_v63, %v1686_v63  ;;  %v7299_v4 = vpop.f32.mrb[31].mxu0 }
 0x36b   :  { %v8758_v5 = vpop.f32.mrb[28].mxu1 }
 0x36c   :  { %v2501_v6 = vsel %vm2499_vm3, %v2007_v3, 0  ;;  %v7226_v8 = vpop.f32.mrb[29].mxu1  ;;  %7395 = vmatmul.mubr.msk.bf16.vlgmr.msra.gmra.mrb[56].mxu0 %vm2015_vm2, %v1173_v2  ;;  %v6567_v2 = vld [vmem:[%s9663_s11 + $0x1] ss:$0 sm:$0xff]  ;;  %v1162_v51 = vadd.f32 %v6529_v39, %v8758_v5 }
 0x36d   :  { %v1164_v9 = vpop.f32.mrb[30].mxu1  ;;  %7405 = vmatpush3.bf16.msra.mxu0 %v2501_v6  ;;  %7406 = vmatprep.mubr.msk.bf16.mxu0 %vm8141_vm1, %v8140_v7 }
 0x36e   :  { %v7227_v54 = vpop.f32.mrb[31].mxu1  ;;  %7416 = vmatprep.subr.bf16.mxu0 %v8140_v7  ;;  %v1174_v9 = vpack.c.bf16 %v1162_v51, %v1162_v51 }
 0x36f   :  { %v8765_v10 = vpop.f32.mrb[32].mxu0 }
 0x370   :  { %v7314_v11 = vpop.f32.mrb[33].mxu0 }
 0x371   :  { %v1792_v12 = vpop.f32.mrb[34].mxu0 }
 0x372   :  { %v7315_v14 = vpop.f32.mrb[35].mxu0 }
 0x373   :  { %v1317_v15 = vpop.f32.mrb[32].mxu1 }
 0x374   :  { %v1318_v16 = vadd.f32 %v6547_v13, %v1317_v15  ;;  %v7242_v17 = vpop.f32.mrb[33].mxu1 }
 0x375   :  { %v1320_v18 = vpop.f32.mrb[34].mxu1 }
 0x376   :  { %v1588_v19 = vpack.c.bf16 %v1318_v16, %v1318_v16  ;;  %v7243_v20 = vpop.f32.mrb[35].mxu1 }
 0x377   :  { %v1881_v22 = vpop.f32.mrb[36].mxu0 }
 0x378   :  { %v2066_v24 = vsel %vm2015_vm2, %v1588_v19, 0  ;;  %v8774_v26 = vadd.f32 %v6566_v58, %v1881_v22  ;;  %v7330_v27 = vpop.f32.mrb[37].mxu0 }
 0x379   :  { %v1884_v28 = vpop.f32.mrb[38].mxu0  ;;  %7363 = vmatpush3.bf16.xpose.msra.mxu1 %v2066_v24 }
 0x37a   :  { %v7331_v31 = vpop.f32.mrb[39].mxu0  ;;  %7374 = vmatprep.subr.bf16.mxu1 %v8140_v7  ;;  %v80_v28 = vand.u32 127, %v79_v25 }
 0x37b   :  { %v1421_v32 = vpop.f32.mrb[36].mxu1 }
 0x37c   :  { %v1422_v33 = vadd.f32 %v6549_v29, %v1421_v32  ;;  %v7258_v34 = vpop.f32.mrb[37].mxu1  ;;  %vm81_vm4 = vcmp.lt.s32.totalorder %v80_v28, 5 }
 0x37d   :  { %v1424_v35 = vpop.f32.mrb[38].mxu1 }
 0x37e   :  { %v1590_v37 = vpack.c.bf16 %v1422_v33, %v1422_v33  ;;  %v7259_v38 = vpop.f32.mrb[39].mxu1 }
 0x37f   :  { %v8784_v40 = vpop.f32.mrb[40].mxu0 }
 0x380   :  { %v2158_v41 = vsel %vm2015_vm2, %v1590_v37, 0  ;;  %v7346_v42 = vpop.f32.mrb[41].mxu0  ;;  %7365 = vmatmul.mubr.msk.bf16.vlgmr.msra.gmra.mrb[64].mxu1 %vm2015_vm2, %v1168_v36 }
 0x381   :  { %v1964_v60 = vpop.f32.mrb[42].mxu0  ;;  %7375 = vmatpush3.bf16.xpose.msra.mxu1 %v2158_v41  ;;  %7376 = vmatprep.mubr.msk.bf16.mxu1 %vm8141_vm1, %v8140_v7 }
 0x382   :  { %v7347_v44 = vpop.f32.mrb[43].mxu0  ;;  %7386 = vmatprep.subr.bf16.mxu1 %v8140_v7 }
 0x383   :  { %v1501_v45 = vpop.f32.mrb[40].mxu1 }
 0x384   :  { %v1502_v46 = vadd.f32 %v6547_v13, %v1501_v45  ;;  %v7274_v47 = vpop.f32.mrb[41].mxu1 }
 0x385   :  { %v1504_v48 = vpop.f32.mrb[42].mxu1 }
 0x386   :  { %v1592_v50 = vpack.c.bf16 %v1502_v46, %v1502_v46  ;;  %v7275_v52 = vpop.f32.mrb[43].mxu1 }
 0x388   :  { %v2250_v53 = vsel %vm2015_vm2, %v1592_v50, 0  ;;  %7377 = vmatmul.mubr.msk.bf16.vlgmr.msra.gmra.mrb[68].mxu1 %vm2015_vm2, %v1170_v49 }
 0x389   :  { %7387 = vmatpush3.bf16.xpose.msra.mxu1 %v2250_v53  ;;  %7388 = vmatprep.mubr.msk.bf16.mxu1 %vm8141_vm1, %v8140_v7 }
 0x38a   :  { %7398 = vmatprep.subr.bf16.mxu1 %v8140_v7 }
 0x38b   :  { %v1581_v55 = vpop.f32.mrb[44].mxu1 }
 0x38c   :  { %v1582_v58 = vadd.f32 %v6549_v29, %v1581_v55  ;;  %v7290_v59 = vpop.f32.mrb[45].mxu1  ;;  %v8142_v29 = vmov -1e+30  }
 0x38d   :  { %v1584_v61 = vpop.f32.mrb[46].mxu1  ;;  %v8819_v30 = vsel %vm81_vm4, 0.0, %v8142_v29 }
 0x38e   :  { %v1594_v63 = vpack.c.bf16 %v1582_v58, %v1582_v58  ;;  %v7291_v0 = vpop.f32.mrb[47].mxu1 }
 0x390   :  { %v2342_v1 = vsel %vm2015_vm2, %v1594_v63, 0  ;;  %7389 = vmatmul.mubr.msk.bf16.vlgmr.msra.gmra.mrb[72].mxu1 %vm2015_vm2, %v1172_v62 }
 0x391   :  { %7399 = vmatpush3.bf16.xpose.msra.mxu1 %v2342_v1  ;;  %7400 = vmatprep.mubr.msk.bf16.mxu1 %vm8141_vm1, %v8140_v7 }
 0x392   :  { %7410 = vmatprep.subr.bf16.mxu1 %v8140_v7 }
 0x393   :  { %v1737_v3 = vpop.f32.mrb[48].mxu1 }
 0x394   :  { %v1738_v4 = vadd.f32 %v6567_v2, %v1737_v3  ;;  %v7306_v6 = vpop.f32.mrb[49].mxu1 }
 0x395   :  { %v1740_v8 = vpop.f32.mrb[50].mxu1 }
 0x396   :  { %v2008_v54 = vpack.c.bf16 %v1738_v4, %v1738_v4  ;;  %v7307_v11 = vpop.f32.mrb[51].mxu1 }
 0x398   :  { %v2547_v12 = vsel %vm2499_vm3, %v2008_v54, 0  ;;  %7401 = vmatmul.mubr.msk.bf16.vlgmr.msra.gmra.mrb[76].mxu1 %vm2015_vm2, %v1174_v9 }
 0x399   :  { %7411 = vmatpush3.bf16.msra.mxu1 %v2547_v12  ;;  %7412 = vmatprep.mubr.msk.bf16.mxu1 %vm8141_vm1, %v8140_v7 }
 0x39a   :  { %7422 = vmatprep.subr.bf16.mxu1 %v8140_v7 }
 0x39b   :  { %v8812_v5 = vpop.f32.mrb[52].mxu1 }
 0x39c   :  { %v7322_v13 = vpop.f32.mrb[53].mxu1 }
 0x39d   :  { %v1844_v14 = vpop.f32.mrb[54].mxu1 }
 0x39e   :  { %v7323_v15 = vpop.f32.mrb[55].mxu1 }
 0x3a3   :  { %v1921_v16 = vpop.f32.mrb[56].mxu1 }
 0x3a4   :  { %v8814_v17 = vadd.f32 %v6567_v2, %v1921_v16  ;;  %v7338_v18 = vpop.f32.mrb[57].mxu1 }
 0x3a5   :  { %v1924_v19 = vpop.f32.mrb[58].mxu1 }
 0x3a6   :  { %v7339_v20 = vpop.f32.mrb[59].mxu1 }
 0x3ab   :  { %v8816_v21 = vpop.f32.mrb[60].mxu1 }
 0x3ac   :  { %v7354_v22 = vpop.f32.mrb[61].mxu1 }
 0x3ad   :  { %v2004_v24 = vpop.f32.mrb[62].mxu1 }
 0x3ae   :  { %v7355_v27 = vpop.f32.mrb[63].mxu1 }
 0x427   :  { %v2056_v31 = vpop.f32.mrb[44].mxu0 }
 0x428   :  { %v2384_v32 = vmul.f32 0.35355338, %v2056_v31  ;;  %v7360_v33 = vpop.f32.mrb[45].mxu0 }
 0x429   :  { %v2059_v34 = vpop.f32.mrb[46].mxu0 }
 0x42a   :  { %v7361_v35 = vpop.f32.mrb[47].mxu0  ;;  %v2392_v36 = vadd.f32 %v2384_v32, %v8819_v30 }
 0x42c   :  { %v2400_v37 = vsel %vm2015_vm2, %v2392_v36, -inf }
 0x42d   :  { %2401 = vmax.xlane.f32.xlu0 %v2400_v37 }
 0x42f   :  { %v2148_v38 = vpop.f32.mrb[48].mxu0 }
 0x430   :  { %v2386_v39 = vmul.f32 0.35355338, %v2148_v38  ;;  %v7372_v41 = vpop.f32.mrb[49].mxu0 }
 0x431   :  { %v2151_v42 = vpop.f32.mrb[50].mxu0 }
 0x432   :  { %v7373_v60 = vpop.f32.mrb[51].mxu0  ;;  %v2394_v25 = vadd.f32 %v2386_v39, %v8819_v30 }
 0x434   :  { %v2406_v43 = vsel %vm2015_vm2, %v2394_v25, -inf }
 0x435   :  { %2407 = vmax.xlane.f32.xlu0 %v2406_v43 }
 0x437   :  { %v2240_v44 = vpop.f32.mrb[52].mxu0 }
 0x438   :  { %v2388_v45 = vmul.f32 0.35355338, %v2240_v44  ;;  %v7384_v46 = vpop.f32.mrb[53].mxu0 }
 0x439   :  { %v2243_v47 = vpop.f32.mrb[54].mxu0 }
 0x43a   :  { %v7385_v48 = vpop.f32.mrb[55].mxu0  ;;  %v2396_v49 = vadd.f32 %v2388_v45, %v8819_v30 }
 0x43c   :  { %v2412_v50 = vsel %vm2015_vm2, %v2396_v49, -inf }
 0x43d   :  { %2413 = vmax.xlane.f32.xlu0 %v2412_v50 }
 0x43f   :  { %v2332_v52 = vpop.f32.mrb[56].mxu0 }
 0x440   :  { %v2390_v53 = vmul.f32 0.35355338, %v2332_v52  ;;  %v7396_v23 = vpop.f32.mrb[57].mxu0 }
 0x441   :  { %v2335_v55 = vpop.f32.mrb[58].mxu0 }
 0x442   :  { %v7397_v58 = vpop.f32.mrb[59].mxu0  ;;  %v2398_v59 = vadd.f32 %v2390_v53, %v8819_v30 }
 0x444   :  { %v2418_v61 = vsel %vm2015_vm2, %v2398_v59, -inf }
 0x445   :  { %2419 = vmax.xlane.f32.xlu0 %v2418_v61 }
 0x453   :  { %v2102_v62 = vpop.f32.mrb[64].mxu1 }
 0x454   :  { %v2385_v63 = vmul.f32 0.35355338, %v2102_v62  ;;  %v7366_v0 = vpop.f32.mrb[65].mxu1 }
 0x455   :  { %v2105_v1 = vpop.f32.mrb[66].mxu1 }
 0x456   :  { %v7367_v2 = vpop.f32.mrb[67].mxu1  ;;  %v2393_v51 = vadd.f32 %v2385_v63, %v8819_v30 }
 0x458   :  { %v2403_v3 = vsel %vm2015_vm2, %v2393_v51, -inf }
 0x459   :  { %2404 = vmax.xlane.f32.xlu1 %v2403_v3 }
 0x45b   :  { %v2194_v4 = vpop.f32.mrb[68].mxu1 }
 0x45c   :  { %v2387_v6 = vmul.f32 0.35355338, %v2194_v4  ;;  %v7378_v8 = vpop.f32.mrb[69].mxu1 }
 0x45d   :  { %v2197_v9 = vpop.f32.mrb[70].mxu1 }
 0x45e   :  { %v7379_v54 = vpop.f32.mrb[71].mxu1  ;;  %v2395_v11 = vadd.f32 %v2387_v6, %v8819_v30 }
 0x460   :  { %v2409_v12 = vsel %vm2015_vm2, %v2395_v11, -inf }
 0x461   :  { %2410 = vmax.xlane.f32.xlu1 %v2409_v12 }
 0x463   :  { %v2286_v13 = vpop.f32.mrb[72].mxu1 }
 0x464   :  { %v2389_v14 = vmul.f32 0.35355338, %v2286_v13  ;;  %v7390_v15 = vpop.f32.mrb[73].mxu1 }
 0x465   :  { %v2289_v16 = vpop.f32.mrb[74].mxu1 }
 0x466   :  { %v7391_v18 = vpop.f32.mrb[75].mxu1  ;;  %v2397_v19 = vadd.f32 %v2389_v14, %v8819_v30  ;;  %v6568_v14 = vld [vmem:[%s9663_s11 + $0x2] ss:$0 sm:$0xff] }
 0x467   :  { %v1790_v15 = vadd.f32 %v6568_v14, %v8765_v10  ;;  %v2011_v10 = vpack.c.bf16 %v8774_v26, %v8774_v26 }
 0x468   :  { %v2415_v20 = vsel %vm2015_vm2, %v2397_v19, -inf }
 0x469   :  { %2416 = vmax.xlane.f32.xlu1 %v2415_v20 }
 0x46b   :  { %v2378_v22 = vpop.f32.mrb[76].mxu1 }
 0x46c   :  { %v2391_v24 = vmul.f32 0.35355338, %v2378_v22  ;;  %v7402_v27 = vpop.f32.mrb[77].mxu1 }
 0x46d   :  { %v2381_v28 = vpop.f32.mrb[78].mxu1 }
 0x46e   :  { %v7403_v29 = vpop.f32.mrb[79].mxu1  ;;  %v2399_v31 = vadd.f32 %v2391_v24, %v8819_v30 }
 0x470   :  { %v2421_v32 = vsel %vm2015_vm2, %v2399_v31, -inf }
 0x471   :  { %2422 = vmax.xlane.f32.xlu1 %v2421_v32  ;;  %v2685_v32 = vsel %vm2499_vm3, %v2011_v10, 0 }
 0x4ba   :  { %v2402_v33 = vpop.xlane.xlu0 %2401 }
 0x4bb   :  { %v2424_v34 = vsub.f32 %v2392_v36, %v2402_v33  ;;  %v1962_v33 = vadd.f32 %v6568_v14, %v8784_v40 }
 0x4bd   :  { %v2432_v35 = vmul.f32 1.442695, %v2424_v34 }
 0x4bf   :  { %8026 = vpow2.f32 %v2432_v35 }
 0x4c2   :  { %v2408_v37 = vpop.xlane.xlu0 %2407 }
 0x4c3   :  { %v2426_v38 = vsub.f32 %v2394_v25, %v2408_v37  ;;  %v2013_v37 = vpack.c.bf16 %v1962_v33, %v1962_v33 }
 0x4c5   :  { %v2436_v39 = vmul.f32 1.442695, %v2426_v38 }
 0x4c7   :  { %8028 = vpow2.f32 %v2436_v39  ;;  %v2777_v39 = vsel %vm2499_vm3, %v2013_v37, 0 }
 0x4c9   :  { %v8027_v41 = vpop.eup %8026 }
 0x4ca   :  { %v2414_v42 = vpop.xlane.xlu0 %2413  ;;  %v2448_v60 = vsel %vm2015_vm2, %v8027_v41, 0.0 }
 0x4cb   :  { %v2428_v43 = vsub.f32 %v2396_v49, %v2414_v42  ;;  %2449 = vadd.xlane.f32.xlu0 %v2448_v60 }
 0x4cd   :  { %v2440_v44 = vmul.f32 1.442695, %v2428_v43  ;;  %v6569_v43 = vld [vmem:[%s9663_s11 + $0x3] ss:$0 sm:$0xff] }
 0x4cf   :  { %8030 = vpow2.f32 %v2440_v44  ;;  %v1842_v44 = vadd.f32 %v6569_v43, %v8812_v5 }
 0x4d1   :  { %v8029_v45 = vpop.eup %8028 }
 0x4d2   :  { %v2420_v46 = vpop.xlane.xlu0 %2419  ;;  %v2454_v47 = vsel %vm2015_vm2, %v8029_v45, 0.0 }
 0x4d3   :  { %v2430_v48 = vsub.f32 %v2398_v59, %v2420_v46  ;;  %2455 = vadd.xlane.f32.xlu0 %v2454_v47  ;;  %v2010_v47 = vpack.c.bf16 %v1842_v44, %v1842_v44 }
 0x4d5   :  { %v2444_v36 = vmul.f32 1.442695, %v2430_v48 }
 0x4d7   :  { %8032 = vpow2.f32 %v2444_v36 }
 0x4d9   :  { %v8839_v50 = vpop.eup %8030 }
 0x4da   :  { %v2460_v25 = vsel %vm2015_vm2, %v8839_v50, 0.0 }
 0x4db   :  { %2461 = vadd.xlane.f32.xlu0 %v2460_v25 }
 0x4e1   :  { %v8843_v52 = vpop.eup %8032 }
 0x4e2   :  { %v2466_v49 = vsel %vm2015_vm2, %v8843_v52, 0.0 }
 0x4e3   :  { %2467 = vadd.xlane.f32.xlu0 %v2466_v49 }
 0x4e6   :  { %v2405_v53 = vpop.xlane.xlu1 %2404 }
 0x4e7   :  { %v2425_v23 = vsub.f32 %v2393_v51, %v2405_v53 }
 0x4e9   :  { %v2434_v55 = vmul.f32 1.442695, %v2425_v23 }
 0x4eb   :  { %8034 = vpow2.f32 %v2434_v55  ;;  %v2002_v55 = vadd.f32 %v6569_v43, %v8816_v21 }
 0x4ee   :  { %v2411_v58 = vpop.xlane.xlu1 %2410 }
 0x4ef   :  { %v2427_v59 = vsub.f32 %v2395_v11, %v2411_v58 }
 0x4f1   :  { %v2438_v61 = vmul.f32 1.442695, %v2427_v59 }
 0x4f3   :  { %8036 = vpow2.f32 %v2438_v61  ;;  %v2014_v61 = vpack.c.bf16 %v2002_v55, %v2002_v55 }
 0x4f5   :  { %v8847_v62 = vpop.eup %8034 }
 0x4f6   :  { %v2417_v63 = vpop.xlane.xlu1 %2416  ;;  %v2451_v0 = vsel %vm2015_vm2, %v8847_v62, 0.0 }
 0x4f7   :  { %v2429_v1 = vsub.f32 %v2397_v19, %v2417_v63  ;;  %2452 = vadd.xlane.f32.xlu1 %v2451_v0  ;;  %v2009_v19 = vpack.c.bf16 %v1790_v15, %v1790_v15  ;;  %v2823_v63 = vsel %vm2499_vm3, %v2014_v61, 0 }
 0x4f9   :  { %v2442_v2 = vmul.f32 1.442695, %v2429_v1  ;;  %v2593_v24 = vsel %vm2499_vm3, %v2009_v19, 0 }
 0x4fb   :  { %8038 = vpow2.f32 %v2442_v2  ;;  %v2873_v2 = vld [vmem:[%s9664_s12] sm:$0xf] }
 0x4fd   :  { %v8851_v3 = vpop.eup %8036 }
 0x4fe   :  { %v2423_v4 = vpop.xlane.xlu1 %2422  ;;  %v2457_v51 = vsel %vm2015_vm2, %v8851_v3, 0.0 }
 0x4ff   :  { %v2431_v6 = vsub.f32 %v2399_v31, %v2423_v4  ;;  %2458 = vadd.xlane.f32.xlu1 %v2457_v51  ;;  %v2874_v4 = vld [vmem:[%s9664_s12 + $0x4] sm:$0xf] }
 0x500   :  { %v2927_v51 = vsel %vm2499_vm3, %v2874_v4, 0 }
 0x501   :  { %v2446_v8 = vmul.f32 1.442695, %v2431_v6  ;;  %v2875_v6 = vld [vmem:[%s9664_s12 + $0x8] sm:$0xf] }
 0x503   :  { %8040 = vpow2.f32 %v2446_v8 }
 0x505   :  { %v8855_v9 = vpop.eup %8038 }
 0x506   :  { %v2463_v54 = vsel %vm2015_vm2, %v8855_v9, 0.0 }
 0x507   :  { %2464 = vadd.xlane.f32.xlu1 %v2463_v54 }
 0x50d   :  { %v8859_v11 = vpop.eup %8040 }
 0x50e   :  { %v2469_v12 = vsel %vm2015_vm2, %v8859_v11, 0.0 }
 0x50f   :  { %2470 = vadd.xlane.f32.xlu1 %v2469_v12 }
 0x558   :  { %v2450_v13 = vpop.xlane.xlu0 %2449 }
 0x559   :  { %8042 = vrcp.f32 %v2450_v13 }
 0x560   :  { %v2456_v16 = vpop.xlane.xlu0 %2455 }
 0x561   :  { %8044 = vrcp.f32 %v2456_v16 }
 0x563   :  { %v8043_v18 = vpop.eup %8042 }
 0x564   :  { %v2480_v20 = vmul.f32 %v8043_v18, %v8027_v41 }
 0x566   :  { %v2488_v22 = vpack.c.bf16 %v2480_v20, %v2480_v20 }
 0x568   :  { %7407 = vmatmul.mubr.msk.bf16.vlgmr.msra.gmra.mrb[60].mxu0 %vm2015_vm2, %v2488_v22  ;;  %v2462_v27 = vpop.xlane.xlu0 %2461 }
 0x569   :  { %7417 = vmatpush3.bf16.msra.mxu0 %v2593_v24  ;;  %8046 = vrcp.f32 %v2462_v27  ;;  %7418 = vmatprep.mubr.msk.bf16.mxu0 %vm8141_vm1, %v8140_v7 }
 0x56a   :  { %7428 = vmatprep.subr.bf16.mxu0 %v8140_v7 }
 0x56b   :  { %v8045_v28 = vpop.eup %8044 }
 0x56c   :  { %v2482_v29 = vmul.f32 %v8045_v28, %v8029_v45 }
 0x56e   :  { %v2490_v31 = vpack.c.bf16 %v2482_v29, %v2482_v29 }
 0x570   :  { %7419 = vmatmul.mubr.msk.bf16.vlgmr.msra.gmra.mrb[64].mxu0 %vm2015_vm2, %v2490_v31  ;;  %v2468_v34 = vpop.xlane.xlu0 %2467 }
 0x571   :  { %7429 = vmatpush3.bf16.msra.mxu0 %v2685_v32  ;;  %8048 = vrcp.f32 %v2468_v34  ;;  %7430 = vmatprep.mubr.msk.bf16.mxu0 %vm8141_vm1, %v8140_v7  ;;  %v2876_v34 = vld [vmem:[%s9664_s12 + $0xc] sm:$0xf] }
 0x572   :  { %7440 = vmatprep.subr.bf16.mxu0 %v8140_v7 }
 0x573   :  { %v8047_v35 = vpop.eup %8046 }
 0x574   :  { %v2484_v26 = vmul.f32 %v8047_v35, %v8839_v50  ;;  %v2639_v50 = vsel %vm2499_vm3, %v2010_v47, 0 }
 0x576   :  { %v2492_v38 = vpack.c.bf16 %v2484_v26, %v2484_v26 }
 0x578   :  { %7431 = vmatmul.mubr.msk.bf16.vlgmr.msra.gmra.mrb[68].mxu0 %vm2015_vm2, %v2492_v38  ;;  %v3019_v38 = vsel %vm2499_vm3, %v2876_v34, 0 }
 0x579   :  { %7441 = vmatpush3.bf16.msra.mxu0 %v2777_v39  ;;  %7442 = vmatprep.mubr.msk.bf16.mxu0 %vm8141_vm1, %v8140_v7 }
 0x57a   :  { %7452 = vmatprep.subr.bf16.mxu0 %v8140_v7 }
 0x57b   :  { %v8049_v40 = vpop.eup %8048 }
 0x57c   :  { %v2486_v41 = vmul.f32 %v8049_v40, %v8843_v52  ;;  %v2012_v52 = vpack.c.bf16 %v8814_v17, %v8814_v17 }
 0x57e   :  { %v2494_v42 = vpack.c.bf16 %v2486_v41, %v2486_v41  ;;  %v2731_v23 = vsel %vm2499_vm3, %v2012_v52, 0 }
 0x580   :  { %7443 = vmatmul.mubr.msk.bf16.vlgmr.msra.gmra.mrb[72].mxu0 %vm2015_vm2, %v2494_v42 }
 0x581   :  { %7454 = vmatprep.mubr.msk.bf16.mxu0 %vm8141_vm1, %v8140_v7 }
 0x584   :  { %v2453_v60 = vpop.xlane.xlu1 %2452 }
 0x585   :  { %8050 = vrcp.f32 %v2453_v60 }
 0x58c   :  { %v2459_v45 = vpop.xlane.xlu1 %2458 }
 0x58d   :  { %8052 = vrcp.f32 %v2459_v45 }
 0x58f   :  { %v8051_v46 = vpop.eup %8050 }
 0x590   :  { %v2481_v48 = vmul.f32 %v8051_v46, %v8847_v62 }
 0x592   :  { %v2489_v36 = vpack.c.bf16 %v2481_v48, %v2481_v48 }
 0x594   :  { %7413 = vmatmul.mubr.msk.bf16.vlgmr.msra.gmra.mrb[80].mxu1 %vm2015_vm2, %v2489_v36  ;;  %v2465_v25 = vpop.xlane.xlu1 %2464 }
 0x595   :  { %7423 = vmatpush3.bf16.msra.mxu1 %v2639_v50  ;;  %8054 = vrcp.f32 %v2465_v25  ;;  %7424 = vmatprep.mubr.msk.bf16.mxu1 %vm8141_vm1, %v8140_v7 }
 0x596   :  { %7434 = vmatprep.subr.bf16.mxu1 %v8140_v7 }
 0x597   :  { %v8053_v5 = vpop.eup %8052 }
 0x598   :  { %v2483_v49 = vmul.f32 %v8053_v5, %v8851_v3  ;;  %v2881_v3 = vsel %vm2499_vm3, %v2873_v2, 0 }
 0x599   :  { %7453 = vmatpush3.bf16.msra.mxu0 %v2881_v3 }
 0x59a   :  { %v2491_v53 = vpack.c.bf16 %v2483_v49, %v2483_v49  ;;  %7464 = vmatprep.subr.bf16.mxu0 %v8140_v7 }
 0x59c   :  { %7425 = vmatmul.mubr.msk.bf16.vlgmr.msra.gmra.mrb[84].mxu1 %vm2015_vm2, %v2491_v53  ;;  %v2471_v58 = vpop.xlane.xlu1 %2470 }
 0x59d   :  { %7435 = vmatpush3.bf16.msra.mxu1 %v2731_v23  ;;  %8056 = vrcp.f32 %v2471_v58  ;;  %7436 = vmatprep.mubr.msk.bf16.mxu1 %vm8141_vm1, %v8140_v7 }
 0x59e   :  { %7446 = vmatprep.subr.bf16.mxu1 %v8140_v7 }
 0x59f   :  { %v8055_v59 = vpop.eup %8054 }
 0x5a0   :  { %v2485_v17 = vmul.f32 %v8055_v59, %v8855_v9 }
 0x5a2   :  { %v2493_v62 = vpack.c.bf16 %v2485_v17, %v2485_v17 }
 0x5a4   :  { %7437 = vmatmul.mubr.msk.bf16.vlgmr.msra.gmra.mrb[88].mxu1 %vm2015_vm2, %v2493_v62 }
 0x5a5   :  { %7447 = vmatpush3.bf16.msra.mxu1 %v2823_v63  ;;  %7448 = vmatprep.mubr.msk.bf16.mxu1 %vm8141_vm1, %v8140_v7 }
 0x5a6   :  { %7458 = vmatprep.subr.bf16.mxu1 %v8140_v7 }
 0x5a7   :  { %v8057_v21 = vpop.eup %8056 }
 0x5a8   :  { %v2487_v0 = vmul.f32 %v8057_v21, %v8859_v11  ;;  %v2973_v11 = vsel %vm2499_vm3, %v2875_v6, 0 }
 0x5aa   :  { %v2495_v1 = vpack.c.bf16 %v2487_v0, %v2487_v0 }
 0x5ac   :  { %7449 = vmatmul.mubr.msk.bf16.vlgmr.msra.gmra.mrb[92].mxu1 %vm2015_vm2, %v2495_v1 }
 0x5ad   :  { %7460 = vmatprep.mubr.msk.bf16.mxu1 %vm8141_vm1, %v8140_v7  ;;  %7459 = vmatpush3.bf16.msra.mxu1 %v2927_v51 }
 0x5ae   :  { %7470 = vmatprep.subr.bf16.mxu1 %v8140_v7 }
 0x63b   :  { %v2537_v8 = vpop.f32.mrb[60].mxu0 }
 0x63c   :  { %v2865_v9 = vpack.c.bf16 %v2537_v8, %v2537_v8  ;;  %v7408_v54 = vpop.f32.mrb[61].mxu0 }
 0x63d   :  { %v2540_v12 = vpop.f32.mrb[62].mxu0 }
 0x63e   :  { %v7409_v13 = vpop.f32.mrb[63].mxu0  ;;  %7455 = vmatmul.mubr.msk.bf16.vlgmr.msra.gmra.mrb[76].mxu0 %vm2015_vm2, %v2865_v9 }
 0x63f   :  { %7465 = vmatpush3.bf16.msra.mxu0 %v2973_v11  ;;  %7466 = vmatprep.mubr.msk.bf16.mxu0 %vm8141_vm1, %v8140_v7 }
 0x640   :  { %7476 = vmatprep.subr.bf16.mxu0 %v8140_v7 }
 0x643   :  { %v2629_v14 = vpop.f32.mrb[64].mxu0 }
 0x644   :  { %v2867_v15 = vpack.c.bf16 %v2629_v14, %v2629_v14  ;;  %v7420_v16 = vpop.f32.mrb[65].mxu0 }
 0x645   :  { %v2632_v18 = vpop.f32.mrb[66].mxu0 }
 0x646   :  { %v7421_v19 = vpop.f32.mrb[67].mxu0  ;;  %7467 = vmatmul.mubr.msk.bf16.vlgmr.msra.gmra.mrb[80].mxu0 %vm2015_vm2, %v2867_v15 }
 0x647   :  { %7477 = vmatpush3.bf16.msra.mxu0 %v2881_v3  ;;  %7478 = vmatprep.mubr.msk.bf16.mxu0 %vm8141_vm1, %v8140_v7 }
 0x648   :  { %7488 = vmatprep.subr.bf16.mxu0 %v8140_v7 }
 0x64b   :  { %v2721_v20 = vpop.f32.mrb[68].mxu0 }
 0x64c   :  { %v2869_v22 = vpack.c.bf16 %v2721_v20, %v2721_v20  ;;  %v7432_v24 = vpop.f32.mrb[69].mxu0 }
 0x64d   :  { %v2724_v27 = vpop.f32.mrb[70].mxu0 }
 0x64e   :  { %v7433_v28 = vpop.f32.mrb[71].mxu0  ;;  %7479 = vmatmul.mubr.msk.bf16.vlgmr.msra.gmra.mrb[84].mxu0 %vm2015_vm2, %v2869_v22  ;;  %v6610_v27 = vld [vmem:[%s9665_s13] ss:$0 sm:$0xff] }
 0x64f   :  { %7489 = vmatpush3.bf16.msra.mxu0 %v2973_v11  ;;  %7490 = vmatprep.mubr.msk.bf16.mxu0 %vm8141_vm1, %v8140_v7 }
 0x650   :  { %7500 = vmatprep.subr.bf16.mxu0 %v8140_v7 }
 0x653   :  { %v2813_v10 = vpop.f32.mrb[72].mxu0 }
 0x654   :  { %v2871_v29 = vpack.c.bf16 %v2813_v10, %v2813_v10  ;;  %v7444_v31 = vpop.f32.mrb[73].mxu0 }
 0x655   :  { %v2816_v32 = vpop.f32.mrb[74].mxu0 }
 0x656   :  { %v7445_v33 = vpop.f32.mrb[75].mxu0  ;;  %7491 = vmatmul.mubr.msk.bf16.vlgmr.msra.gmra.mrb[88].mxu0 %vm2015_vm2, %v2871_v29 }
 0x657   :  { %7504 = vmatprep.mubr.msk.bf16.mxu0 %vm8141_vm1, %v8140_v7 }
 0x667   :  { %v2583_v35 = vpop.f32.mrb[80].mxu1 }
 0x668   :  { %v2866_v37 = vpack.c.bf16 %v2583_v35, %v2583_v35  ;;  %v7414_v26 = vpop.f32.mrb[81].mxu1 }
 0x669   :  { %v2586_v39 = vpop.f32.mrb[82].mxu1 }
 0x66a   :  { %v7415_v40 = vpop.f32.mrb[83].mxu1  ;;  %7461 = vmatmul.mubr.msk.bf16.vlgmr.msra.gmra.mrb[96].mxu1 %vm2015_vm2, %v2866_v37 }
 0x66b   :  { %7471 = vmatpush3.bf16.msra.mxu1 %v3019_v38  ;;  %7472 = vmatprep.mubr.msk.bf16.mxu1 %vm8141_vm1, %v8140_v7 }
 0x66c   :  { %7482 = vmatprep.subr.bf16.mxu1 %v8140_v7 }
 0x66f   :  { %v2675_v41 = vpop.f32.mrb[84].mxu1 }
 0x670   :  { %v2868_v42 = vpack.c.bf16 %v2675_v41, %v2675_v41  ;;  %v7426_v60 = vpop.f32.mrb[85].mxu1 }
 0x671   :  { %v2678_v43 = vpop.f32.mrb[86].mxu1 }
 0x672   :  { %v7427_v44 = vpop.f32.mrb[87].mxu1  ;;  %7473 = vmatmul.mubr.msk.bf16.vlgmr.msra.gmra.mrb[100].mxu1 %vm2015_vm2, %v2868_v42 }
 0x673   :  { %7483 = vmatpush3.bf16.msra.mxu1 %v2927_v51  ;;  %7484 = vmatprep.mubr.msk.bf16.mxu1 %vm8141_vm1, %v8140_v7 }
 0x674   :  { %7494 = vmatprep.subr.bf16.mxu1 %v8140_v7 }
 0x677   :  { %v2767_v45 = vpop.f32.mrb[88].mxu1 }
 0x678   :  { %v2870_v46 = vpack.c.bf16 %v2767_v45, %v2767_v45  ;;  %v7438_v47 = vpop.f32.mrb[89].mxu1 }
 0x679   :  { %v2770_v48 = vpop.f32.mrb[90].mxu1 }
 0x67a   :  { %v7439_v36 = vpop.f32.mrb[91].mxu1  ;;  %7485 = vmatmul.mubr.msk.bf16.vlgmr.msra.gmra.mrb[104].mxu1 %vm2015_vm2, %v2870_v46 }
 0x67b   :  { %7495 = vmatpush3.bf16.msra.mxu1 %v3019_v38  ;;  %7496 = vmatprep.mubr.msk.bf16.mxu1 %vm8141_vm1, %v8140_v7 }
 0x67c   :  { %7508 = vmatprep.subr.bf16.mxu1 %v8140_v7 }
 0x67f   :  { %v2859_v50 = vpop.f32.mrb[92].mxu1 }
 0x680   :  { %v2872_v25 = vpack.c.bf16 %v2859_v50, %v2859_v50  ;;  %v7450_v5 = vpop.f32.mrb[93].mxu1 }
 0x681   :  { %v2862_v52 = vpop.f32.mrb[94].mxu1 }
 0x682   :  { %v7451_v49 = vpop.f32.mrb[95].mxu1  ;;  %7497 = vmatmul.mubr.msk.bf16.vlgmr.msra.gmra.mrb[108].mxu1 %vm2015_vm2, %v2872_v25 }
 0x683   :  { %7524 = vmatprep.mubr.msk.bf16.mxu1 %vm8141_vm1, %v8140_v7 }
 0x711   :  { %v2917_v53 = vpop.f32.mrb[76].mxu0 }
 0x712   :  { %v7456_v23 = vpop.f32.mrb[77].mxu0  ;;  %v3233_v8 = vsel %vm699_vm0, %v2917_v53, 0.0 }
 0x713   :  { %v2920_v55 = vpop.f32.mrb[78].mxu0  ;;  %v7976_v23 = vld [vmem:[%s9668_s16] sm:$0xff]  }
 0x714   :  { %v7457_v58 = vpop.f32.mrb[79].mxu0  ;;  %7501 = vmatpush3.bf16.msra.mxu0 %v7976_v23  ;;  %v7977_v55 = vld [vmem:[%s9668_s16 + $0x8] sm:$0xff]  }
 0x715   :  { %7502 = vmatprep.subr.bf16.mxu0 %v8140_v7 }
 0x718   :  { %7503 = vmatpush3.bf16.msra.mxu0 %v7977_v55 }
 0x719   :  { %v3009_v59 = vpop.f32.mrb[80].mxu0  ;;  %7528 = vmatprep.subr.bf16.mxu0 %v8140_v7 }
 0x71a   :  { %v7468_v61 = vpop.f32.mrb[81].mxu0  ;;  %v3236_v13 = vsel %vm699_vm0, %v3009_v59, 0.0 }
 0x71b   :  { %v3012_v17 = vpop.f32.mrb[82].mxu0 }
 0x71c   :  { %v7469_v62 = vpop.f32.mrb[83].mxu0 }
 0x721   :  { %v3098_v63 = vpop.f32.mrb[84].mxu0 }
 0x722   :  { %v7480_v21 = vpop.f32.mrb[85].mxu0  ;;  %v3240_v32 = vsel %vm699_vm0, %v3098_v63, 0.0 }
 0x723   :  { %v3101_v0 = vpop.f32.mrb[86].mxu0 }
 0x724   :  { %v7481_v1 = vpop.f32.mrb[87].mxu0 }
 0x725   :  { %v6611_v1 = vld [vmem:[%s9666_s14] ss:$0 sm:$0xff] }
 0x729   :  { %v3184_v2 = vpop.f32.mrb[88].mxu0 }
 0x72a   :  { %v7492_v3 = vpop.f32.mrb[89].mxu0  ;;  %v3243_v26 = vsel %vm699_vm0, %v3184_v2, 0.0 }
 0x72b   :  { %v3187_v4 = vpop.f32.mrb[90].mxu0 }
 0x72c   :  { %v7493_v51 = vpop.f32.mrb[91].mxu0 }
 0x72d   :  { %v6612_v51 = vld [vmem:[%s9667_s15] ss:$0 sm:$0xff] }
 0x73d   :  { %v2963_v6 = vpop.f32.mrb[96].mxu1 }
 0x73e   :  { %v3234_v9 = vsel %vm699_vm0, %v2963_v6, 0.0  ;;  %v7462_v54 = vpop.f32.mrb[97].mxu1 }
 0x73f   :  { %v3235_v11 = vadd.f32 %v3234_v9, %v3233_v8  ;;  %v2966_v12 = vpop.f32.mrb[98].mxu1 }
 0x740   :  { %v7463_v14 = vpop.f32.mrb[99].mxu1  ;;  %v7979_v12 = vld [vmem:[%s9670_s18 + $0x8] sm:$0xff]  }
 0x741   :  { %v3237_v15 = vadd.f32 %v3236_v13, %v3235_v11  ;;  %v7978_v11 = vld [vmem:[%s9670_s18] sm:$0xff]   ;;  %v7980_v13 = vld [vmem:[%s9670_s18 + $0x10] sm:$0xff]   ;;  %v7981_v14 = vld [vmem:[%s9670_s18 + $0x18] sm:$0xff]  }
 0x742   :  { %7509 = vmatpush3.bf16.msra.mxu1 %v7978_v11 }
 0x743   :  { %7510 = vmatprep.subr.bf16.mxu1 %v8140_v7 }
 0x745   :  { %v3055_v16 = vpop.f32.mrb[100].mxu1 }
 0x746   :  { %v3238_v18 = vsel %vm699_vm0, %v3055_v16, 0.0  ;;  %v7474_v19 = vpop.f32.mrb[101].mxu1  ;;  %7511 = vmatpush3.bf16.msra.mxu1 %v7979_v12  ;;  %v7983_v16 = vld [vmem:[%s9670_s18 + $0x28] sm:$0xff]  }
 0x747   :  { %v3239_v20 = vadd.f32 %v3238_v18, %v3237_v15  ;;  %v3058_v22 = vpop.f32.mrb[102].mxu1  ;;  %7512 = vmatprep.subr.bf16.mxu1 %v8140_v7  ;;  %v7982_v15 = vld [vmem:[%s9670_s18 + $0x20] sm:$0xff]   ;;  %v7984_v18 = vld [vmem:[%s9670_s18 + $0x30] sm:$0xff]   ;;  %v7985_v19 = vld [vmem:[%s9670_s18 + $0x38] sm:$0xff]  }
 0x748   :  { %v7475_v24 = vpop.f32.mrb[103].mxu1 }
 0x749   :  { %v3247_v28 = vadd.f32 %v3239_v20, %v8465_v56  ;;  %v6613_v20 = vld [vmem:[%s9669_s17] ss:$0 sm:$0xff] }
 0x74a   :  { %7513 = vmatpush3.bf16.msra.mxu1 %v7980_v13  ;;  %v6628_v13 = vld [vmem:[%s9699_s2 + $0x1] ss:$0 sm:$0xff] }
 0x74b   :  { %v8975_v10 = vadd.f32 %v6610_v27, %v3247_v28  ;;  %7514 = vmatprep.subr.bf16.mxu1 %v8140_v7 }
 0x74d   :  { %v3141_v29 = vpop.f32.mrb[104].mxu1  ;;  %v3260_v31 = vsel %vm699_vm0, %v8975_v10, 0.0 }
 0x74e   :  { %v3241_v33 = vsel %vm699_vm0, %v3141_v29, 0.0  ;;  %v7486_v34 = vpop.f32.mrb[105].mxu1  ;;  %3261 = vadd.xlane.f32.xlu0 %v3260_v31  ;;  %7515 = vmatpush3.bf16.msra.mxu1 %v7981_v14 }
 0x74f   :  { %v3242_v35 = vadd.f32 %v3241_v33, %v3240_v32  ;;  %v3144_v37 = vpop.f32.mrb[106].mxu1  ;;  %7516 = vmatprep.subr.bf16.mxu1 %v8140_v7 }
 0x750   :  { %v7487_v38 = vpop.f32.mrb[107].mxu1 }
 0x751   :  { %v3244_v39 = vadd.f32 %v3243_v26, %v3242_v35 }
 0x752   :  { %7517 = vmatpush3.bf16.msra.mxu1 %v7982_v15 }
 0x753   :  { %7518 = vmatprep.subr.bf16.mxu1 %v8140_v7 }
 0x755   :  { %v3227_v40 = vpop.f32.mrb[108].mxu1 }
 0x756   :  { %v3245_v56 = vsel %vm699_vm0, %v3227_v40, 0.0  ;;  %v7498_v41 = vpop.f32.mrb[109].mxu1  ;;  %7519 = vmatpush3.bf16.msra.mxu1 %v7983_v16  ;;  %v6629_v16 = vld [vmem:[%s9700_s29 + $0x1] ss:$0 sm:$0xff] }
 0x757   :  { %v3246_v42 = vadd.f32 %v3245_v56, %v3244_v39  ;;  %v3230_v60 = vpop.f32.mrb[110].mxu1  ;;  %7520 = vmatprep.subr.bf16.mxu1 %v8140_v7 }
 0x758   :  { %v7499_v43 = vpop.f32.mrb[111].mxu1 }
 0x759   :  { %v3248_v44 = vadd.f32 %v3246_v42, %v8467_v57 }
 0x75a   :  { %7521 = vmatpush3.bf16.msra.mxu1 %v7984_v18 }
 0x75b   :  { %v8984_v45 = vadd.f32 %v6610_v27, %v3248_v44  ;;  %7522 = vmatprep.subr.bf16.mxu1 %v8140_v7 }
 0x75d   :  { %v3263_v46 = vsel %vm699_vm0, %v8984_v45, 0.0 }
 0x75e   :  { %3264 = vadd.xlane.f32.xlu1 %v3263_v46  ;;  %7523 = vmatpush3.bf16.msra.mxu1 %v7985_v19 }
 0x75f   :  { %7560 = vmatprep.subr.bf16.mxu1 %v8140_v7 }
 0x7db   :  { %v3262_v47 = vpop.xlane.xlu0 %3261 }
 0x7dc   :  { %v3266_v48 = vmul.f32 0.03125, %v3262_v47 }
 0x7de   :  { %v3268_v36 = vsub.f32 %v8975_v10, %v3266_v48 }
 0x7e0   :  { %v3270_v50 = vmul.f32 %v3268_v36, %v3268_v36 }
 0x7e2   :  { %v3272_v25 = vsel %vm699_vm0, %v3270_v50, 0.0  ;;  %v6617_v50 = vld [vmem:[%s9671_s19] ss:$0 sm:$0xff] }
 0x7e3   :  { %3273 = vadd.xlane.f32.xlu0 %v3272_v25 }
 0x7eb   :  { %v3265_v5 = vpop.xlane.xlu1 %3264 }
 0x7ec   :  { %v3267_v52 = vmul.f32 0.03125, %v3265_v5 }
 0x7ee   :  { %v3269_v49 = vsub.f32 %v8984_v45, %v3267_v52 }
 0x7f0   :  { %v3271_v53 = vmul.f32 %v3269_v49, %v3269_v49 }
 0x7f2   :  { %v3275_v57 = vsel %vm699_vm0, %v3271_v53, 0.0 }
 0x7f3   :  { %3276 = vadd.xlane.f32.xlu1 %v3275_v57 }
 0x870   :  { %v3274_v58 = vpop.xlane.xlu0 %3273 }
 0x871   :  { %v3278_v59 = vmul.f32 0.03125, %v3274_v58 }
 0x873   :  { %v3280_v61 = vadd.f32 1e-06, %v3278_v59 }
 0x875   :  { %8058 = vrsqrt.f32 %v3280_v61 }
 0x87f   :  { %v8059_v21 = vpop.eup %8058 }
 0x880   :  { %v3277_v17 = vpop.xlane.xlu1 %3276  ;;  %v3284_v0 = vmul.f32 %v8059_v21, %v3268_v36 }
 0x881   :  { %v3279_v62 = vmul.f32 0.03125, %v3277_v17 }
 0x882   :  { %v3292_v3 = vmul.f32 %v6611_v1, %v3284_v0 }
 0x883   :  { %v3281_v63 = vadd.f32 1e-06, %v3279_v62 }
 0x884   :  { %v3300_v8 = vadd.f32 %v6612_v51, %v3292_v3  ;;  %v7986_v3 = vld [vmem:[%s9698_s30 + $0x40] sm:$0xff]  }
 0x885   :  { %8060 = vrsqrt.f32 %v3281_v63 }
 0x88f   :  { %v8061_v2 = vpop.eup %8060 }
 0x890   :  { %v3285_v4 = vmul.f32 %v8061_v2, %v3269_v49 }
 0x892   :  { %v3293_v6 = vmul.f32 %v6611_v1, %v3285_v4  ;;  %v7987_v4 = vld [vmem:[%s9698_s30 + $0x48] sm:$0xff]  }
 0x894   :  { %v3301_v9 = vadd.f32 %v6612_v51, %v3293_v6 }
 0x896   :  { %v3302_v54 = vpack.c.bf16 %v3301_v9, %v3300_v8 }
 0x898   :  { %7505 = vmatmul.mubr.msk.bf16.vlgmr.msra.gmra.mrb[92].mxu0 %vm699_vm0, %v3302_v54 }
 0x899   :  { %7532 = vmatprep.mubr.msk.bf16.mxu0 %vm8141_vm1, %v8140_v7  ;;  %7529 = vmatpush3.bf16.msra.mxu0 %v7986_v3 }
 0x89a   :  { %7530 = vmatprep.subr.bf16.mxu0 %v8140_v7 }
 0x89d   :  { %7531 = vmatpush3.bf16.msra.mxu0 %v7987_v4 }
 0x89e   :  { %7536 = vmatprep.subr.bf16.mxu0 %v8140_v7 }
 0x96b   :  { %v3363_v22 = vpop.f32.mrb[92].mxu0 }
 0x96c   :  { %v3364_v24 = vadd.f32 %v6613_v20, %v3363_v22  ;;  %v7506_v27 = vpop.f32.mrb[93].mxu0 }
 0x96d   :  { %v3366_v28 = vpop.f32.mrb[94].mxu0 }
 0x96e   :  { %v3372_v29 = vmul.f32 %v3364_v24, %v3364_v24  ;;  %v3367_v31 = vadd.f32 %v6613_v20, %v3366_v28  ;;  %v7507_v32 = vpop.f32.mrb[95].mxu0  ;;  %v3370_v43 = vmul.f32 0.5, %v3364_v24 }
 0x96f   :  { %v7990_v32 = vld [vmem:[%s9698_s30 + $0x58] sm:$0xff]  }
 0x970   :  { %v3374_v33 = vmul.f32 %v3372_v29, %v3364_v24  ;;  %v3373_v34 = vmul.f32 %v3367_v31, %v3367_v31  ;;  %v3371_v44 = vmul.f32 0.5, %v3367_v31  ;;  %v7989_v29 = vld [vmem:[%s9698_s30 + $0x60] sm:$0xff]  }
 0x972   :  { %v3376_v35 = vmul.f32 0.044715, %v3374_v33  ;;  %v3375_v37 = vmul.f32 %v3373_v34, %v3367_v31  ;;  %v7991_v33 = vld [vmem:[%s9698_s30 + $0x68] sm:$0xff]   ;;  %v7992_v34 = vld [vmem:[%s9701_s1 + $0x40] sm:$0xff]  }
 0x974   :  { %v3378_v26 = vadd.f32 %v3376_v35, %v3364_v24  ;;  %v3377_v38 = vmul.f32 0.044715, %v3375_v37  ;;  %v7988_v24 = vld [vmem:[%s9698_s30 + $0x50] sm:$0xff]   ;;  %v7993_v35 = vld [vmem:[%s9701_s1 + $0x48] sm:$0xff]  }
 0x975   :  { %v7994_v37 = vld [vmem:[%s9698_s30 + $0x70] sm:$0xff]  }
 0x976   :  { %v3380_v39 = vmul.f32 0.7978846, %v3378_v26  ;;  %v3379_v40 = vadd.f32 %v3377_v38, %v3367_v31  ;;  %v7995_v26 = vld [vmem:[%s9701_s1 + $0x60] sm:$0xff]   ;;  %v7996_v38 = vld [vmem:[%s9698_s30 + $0x78] sm:$0xff]  }
 0x978   :  { %8062 = vtanh.f32 %v3380_v39  ;;  %v3381_v56 = vmul.f32 0.7978846, %v3379_v40  ;;  %v7997_v39 = vld [vmem:[%s9701_s1 + $0x68] sm:$0xff]   ;;  %v7998_v40 = vld [vmem:[%s9701_s1 + $0x50] sm:$0xff]  }
 0x97a   :  { %8064 = vtanh.f32 %v3381_v56  ;;  %v7999_v56 = vld [vmem:[%s9662_s10 + $0x40] sm:$0xff]  }
 0x982   :  { %v8063_v41 = vpop.eup %8062 }
 0x983   :  { %v3384_v42 = vadd.f32 1.0, %v8063_v41  ;;  %v8000_v41 = vld [vmem:[%s9701_s1 + $0x58] sm:$0xff]  }
 0x984   :  { %v8065_v60 = vpop.eup %8064 }
 0x985   :  { %v3385_v46 = vadd.f32 1.0, %v8065_v60  ;;  %v3386_v47 = vmul.f32 %v3384_v42, %v3370_v43  ;;  %v8001_v42 = vld [vmem:[%s9662_s10 + $0x48] sm:$0xff]   ;;  %v8002_v60 = vld [vmem:[%s9701_s1 + $0x70] sm:$0xff]   ;;  %v8003_v43 = vld [vmem:[%s9662_s10 + $0x60] sm:$0xff]  }
 0x987   :  { %v3387_v48 = vmul.f32 %v3385_v46, %v3371_v44  ;;  %v8004_v44 = vld [vmem:[%s9701_s1 + $0x78] sm:$0xff]   ;;  %v8005_v46 = vld [vmem:[%s9662_s10 + $0x68] sm:$0xff]  }
 0x989   :  { %v3388_v36 = vpack.c.bf16 %v3387_v48, %v3386_v47  ;;  %v8006_v47 = vld [vmem:[%s9662_s10 + $0x50] sm:$0xff]   ;;  %v8007_v48 = vld [vmem:[%s9662_s10 + $0x58] sm:$0xff]  }
 0x98b   :  { %7525 = vmatmul.mubr.bf16.vlgmr.msra.gmra.mrb[112].mxu1 %v3388_v36  ;;  %v8008_v36 = vld [vmem:[%s9662_s10 + $0x70] sm:$0xff]  }
 0x98c   :  { %7564 = vmatprep.mubr.msk.bf16.mxu1 %vm8141_vm1, %v8140_v7  ;;  %7561 = vmatpush3.bf16.msra.mxu1 %v7986_v3 }
 0x98d   :  { %7562 = vmatprep.subr.bf16.mxu1 %v8140_v7 }
 0x990   :  { %7563 = vmatpush3.bf16.msra.mxu1 %v7987_v4 }
 0x991   :  { %7576 = vmatprep.subr.bf16.mxu1 %v8140_v7 }
 0xa5e   :  { %v3494_v25 = vpop.f32.mrb[112].mxu1 }
 0xa5f   :  { %v3495_v5 = vadd.f32 %v6617_v50, %v3494_v25  ;;  %v7526_v52 = vpop.f32.mrb[113].mxu1 }
 0xa60   :  { %v3497_v49 = vpop.f32.mrb[114].mxu1 }
 0xa61   :  { %v9050_v53 = vadd.f32 %v3495_v5, %v8975_v10  ;;  %v3498_v57 = vadd.f32 %v6617_v50, %v3497_v49  ;;  %v7527_v23 = vpop.f32.mrb[115].mxu1  ;;  %v8009_v50 = vld [vmem:[%s9662_s10 + $0x78] sm:$0xff]  }
 0xa63   :  { %v9053_v55 = vadd.f32 %v3498_v57, %v8984_v45  ;;  %v3507_v58 = vsel %vm699_vm0, %v9050_v53, 0.0 }
 0xa64   :  { %3508 = vadd.xlane.f32.xlu0 %v3507_v58 }
 0xa65   :  { %v3510_v59 = vsel %vm699_vm0, %v9053_v55, 0.0 }
 0xa66   :  { %3511 = vadd.xlane.f32.xlu1 %v3510_v59 }
 0xaf1   :  { %v3509_v61 = vpop.xlane.xlu0 %3508 }
 0xaf2   :  { %v3513_v17 = vmul.f32 0.03125, %v3509_v61 }
 0xaf3   :  { %v3512_v62 = vpop.xlane.xlu1 %3511 }
 0xaf4   :  { %v3515_v63 = vsub.f32 %v9050_v53, %v3513_v17  ;;  %v3514_v10 = vmul.f32 0.03125, %v3512_v62 }
 0xaf6   :  { %v3516_v21 = vsub.f32 %v9053_v55, %v3514_v10  ;;  %v3517_v0 = vmul.f32 %v3515_v63, %v3515_v63 }
 0xaf8   :  { %v3519_v45 = vsel %vm699_vm0, %v3517_v0, 0.0  ;;  %v3518_v1 = vmul.f32 %v3516_v21, %v3516_v21 }
 0xaf9   :  { %3520 = vadd.xlane.f32.xlu0 %v3519_v45 }
 0xafa   :  { %v3522_v2 = vsel %vm699_vm0, %v3518_v1, 0.0 }
 0xafb   :  { %3523 = vadd.xlane.f32.xlu1 %v3522_v2  ;;  %v6692_v2 = vld [vmem:[%s9661_s9 + $0x4] ss:$0 sm:$0xff] }
 0xb86   :  { %v3521_v51 = vpop.xlane.xlu0 %3520 }
 0xb87   :  { %v3525_v6 = vmul.f32 0.03125, %v3521_v51 }
 0xb88   :  { %v3524_v8 = vpop.xlane.xlu1 %3523 }
 0xb89   :  { %v3527_v9 = vadd.f32 1e-06, %v3525_v6  ;;  %v3526_v54 = vmul.f32 0.03125, %v3524_v8 }
 0xb8b   :  { %8066 = vrsqrt.f32 %v3527_v9  ;;  %v3528_v11 = vadd.f32 1e-06, %v3526_v54 }
 0xb8d   :  { %8068 = vrsqrt.f32 %v3528_v11 }
 0xb95   :  { %v8067_v12 = vpop.eup %8066 }
 0xb96   :  { %v3531_v14 = vmul.f32 %v8067_v12, %v3515_v63 }
 0xb97   :  { %v8069_v15 = vpop.eup %8068 }
 0xb98   :  { %v3539_v18 = vmul.f32 %v6628_v13, %v3531_v14  ;;  %v3532_v19 = vmul.f32 %v8069_v15, %v3516_v21 }
 0xb9a   :  { %v3547_v20 = vadd.f32 %v6629_v16, %v3539_v18  ;;  %v3540_v22 = vmul.f32 %v6628_v13, %v3532_v19  ;;  %v6652_v13 = vld [vmem:[%s9702_s0 + $0x4] ss:$0 sm:$0xff] }
 0xb9c   :  { %v9082_v27 = vpack.c.bf16 %v3547_v20, %v3547_v20  ;;  %v3548_v28 = vadd.f32 %v6629_v16, %v3540_v22  ;;  %v6694_v16 = vld [vmem:[%s9661_s9 + $0x6] ss:$0 sm:$0xff] }
 0xb9e   :  { %v9087_v31 = vpack.c.bf16 %v3548_v28, %v3548_v28  ;;  %7533 = vmatmul.mubr.msk.bf16.vlgmr.msra.gmra.mrb[96].mxu0 %vm699_vm0, %v9082_v27 }
 0xb9f   :  { %7537 = vmatpush3.bf16.msra.mxu0 %v7988_v24  ;;  %7540 = vmatprep.mubr.msk.bf16.mxu0 %vm8141_vm1, %v8140_v7 }
 0xba0   :  { %7565 = vmatmul.mubr.msk.bf16.vlgmr.msra.gmra.mrb[116].mxu1 %vm699_vm0, %v9087_v31  ;;  %7538 = vmatprep.subr.bf16.mxu0 %v8140_v7 }
 0xba1   :  { %7577 = vmatpush3.bf16.msra.mxu1 %v7989_v29  ;;  %7580 = vmatprep.mubr.msk.bf16.mxu1 %vm8141_vm1, %v8140_v7 }
 0xba2   :  { %7578 = vmatprep.subr.bf16.mxu1 %v8140_v7 }
 0xba3   :  { %7539 = vmatpush3.bf16.msra.mxu0 %v7990_v32 }
 0xba4   :  { %7544 = vmatprep.subr.bf16.mxu0 %v8140_v7 }
 0xba5   :  { %7579 = vmatpush3.bf16.msra.mxu1 %v7991_v33 }
 0xba6   :  { %7541 = vmatmul.mubr.msk.bf16.vlgmr.msra.gmra.mrb[100].mxu0 %vm699_vm0, %v9082_v27  ;;  %7592 = vmatprep.subr.bf16.mxu1 %v8140_v7 }
 0xba7   :  { %7545 = vmatpush3.bf16.msra.mxu0 %v7989_v29  ;;  %7548 = vmatprep.mubr.msk.bf16.mxu0 %vm8141_vm1, %v8140_v7 }
 0xba8   :  { %7581 = vmatmul.mubr.msk.bf16.vlgmr.msra.gmra.mrb[120].mxu1 %vm699_vm0, %v9087_v31  ;;  %7546 = vmatprep.subr.bf16.mxu0 %v8140_v7 }
 0xba9   :  { %7593 = vmatpush3.bf16.msra.mxu1 %v7992_v34  ;;  %7596 = vmatprep.mubr.msk.bf16.mxu1 %vm8141_vm1, %v8140_v7 }
 0xbaa   :  { %7594 = vmatprep.subr.bf16.mxu1 %v8140_v7 }
 0xbab   :  { %7547 = vmatpush3.bf16.msra.mxu0 %v7991_v33 }
 0xbac   :  { %7552 = vmatprep.subr.bf16.mxu0 %v8140_v7 }
 0xbad   :  { %7595 = vmatpush3.bf16.msra.mxu1 %v7993_v35 }
 0xbae   :  { %7549 = vmatmul.mubr.msk.bf16.vlgmr.msra.gmra.mrb[104].mxu0 %vm699_vm0, %v9082_v27  ;;  %7608 = vmatprep.subr.bf16.mxu1 %v8140_v7 }
 0xbaf   :  { %7553 = vmatpush3.bf16.msra.mxu0 %v7994_v37  ;;  %7556 = vmatprep.mubr.msk.bf16.mxu0 %vm8141_vm1, %v8140_v7 }
 0xbb0   :  { %7597 = vmatmul.mubr.msk.bf16.vlgmr.msra.gmra.mrb[124].mxu1 %vm699_vm0, %v9082_v27  ;;  %7554 = vmatprep.subr.bf16.mxu0 %v8140_v7 }
 0xbb1   :  { %7609 = vmatpush3.bf16.msra.mxu1 %v7995_v26  ;;  %7612 = vmatprep.mubr.msk.bf16.mxu1 %vm8141_vm1, %v8140_v7 }
 0xbb2   :  { %7610 = vmatprep.subr.bf16.mxu1 %v8140_v7 }
 0xbb3   :  { %7555 = vmatpush3.bf16.msra.mxu0 %v7996_v38 }
 0xbb4   :  { %7568 = vmatprep.subr.bf16.mxu0 %v8140_v7 }
 0xbb5   :  { %7611 = vmatpush3.bf16.msra.mxu1 %v7997_v39 }
 0xbb6   :  { %7557 = vmatmul.mubr.msk.bf16.vlgmr.msra.gmra.mrb[108].mxu0 %vm699_vm0, %v9082_v27  ;;  %7624 = vmatprep.subr.bf16.mxu1 %v8140_v7 }
 0xbb7   :  { %7569 = vmatpush3.bf16.msra.mxu0 %v7988_v24  ;;  %7572 = vmatprep.mubr.msk.bf16.mxu0 %vm8141_vm1, %v8140_v7 }
 0xbb8   :  { %7613 = vmatmul.mubr.msk.bf16.vlgmr.msra.gmra.mrb[128].mxu1 %vm699_vm0, %v9082_v27  ;;  %7570 = vmatprep.subr.bf16.mxu0 %v8140_v7 }
 0xbb9   :  { %7625 = vmatpush3.bf16.msra.mxu1 %v7992_v34  ;;  %7628 = vmatprep.mubr.msk.bf16.mxu1 %vm8141_vm1, %v8140_v7 }
 0xbba   :  { %7626 = vmatprep.subr.bf16.mxu1 %v8140_v7 }
 0xbbb   :  { %7571 = vmatpush3.bf16.msra.mxu0 %v7990_v32 }
 0xbbc   :  { %7584 = vmatprep.subr.bf16.mxu0 %v8140_v7 }
 0xbbd   :  { %7627 = vmatpush3.bf16.msra.mxu1 %v7993_v35  ;;  %v6654_v35 = vld [vmem:[%s9702_s0 + $0x6] ss:$0 sm:$0xff] }
 0xbbe   :  { %7573 = vmatmul.mubr.msk.bf16.vlgmr.msra.gmra.mrb[112].mxu0 %vm699_vm0, %v9087_v31  ;;  %7640 = vmatprep.subr.bf16.mxu1 %v8140_v7 }
 0xbbf   :  { %7585 = vmatpush3.bf16.msra.mxu0 %v7994_v37  ;;  %7588 = vmatprep.mubr.msk.bf16.mxu0 %vm8141_vm1, %v8140_v7 }
 0xbc0   :  { %7629 = vmatmul.mubr.msk.bf16.vlgmr.msra.gmra.mrb[132].mxu1 %vm699_vm0, %v9087_v31  ;;  %7586 = vmatprep.subr.bf16.mxu0 %v8140_v7 }
 0xbc1   :  { %7641 = vmatpush3.bf16.msra.mxu1 %v7995_v26  ;;  %7644 = vmatprep.mubr.msk.bf16.mxu1 %vm8141_vm1, %v8140_v7 }
 0xbc2   :  { %7642 = vmatprep.subr.bf16.mxu1 %v8140_v7 }
 0xbc3   :  { %7587 = vmatpush3.bf16.msra.mxu0 %v7996_v38 }
 0xbc4   :  { %7600 = vmatprep.subr.bf16.mxu0 %v8140_v7 }
 0xbc5   :  { %7643 = vmatpush3.bf16.msra.mxu1 %v7997_v39 }
 0xbc6   :  { %7589 = vmatmul.mubr.msk.bf16.vlgmr.msra.gmra.mrb[116].mxu0 %vm699_vm0, %v9087_v31  ;;  %7656 = vmatprep.subr.bf16.mxu1 %v8140_v7 }
 0xbc7   :  { %7601 = vmatpush3.bf16.msra.mxu0 %v7998_v40  ;;  %7604 = vmatprep.mubr.msk.bf16.mxu0 %vm8141_vm1, %v8140_v7 }
 0xbc8   :  { %7645 = vmatmul.mubr.msk.bf16.vlgmr.msra.gmra.mrb[136].mxu1 %vm699_vm0, %v9087_v31  ;;  %7602 = vmatprep.subr.bf16.mxu0 %v8140_v7 }
 0xbc9   :  { %7657 = vmatpush3.bf16.msra.mxu1 %v7999_v56  ;;  %7660 = vmatprep.mubr.msk.bf16.mxu1 %vm8141_vm1, %v8140_v7 }
 0xbca   :  { %7658 = vmatprep.subr.bf16.mxu1 %v8140_v7 }
 0xbcb   :  { %7603 = vmatpush3.bf16.msra.mxu0 %v8000_v41 }
 0xbcc   :  { %7616 = vmatprep.subr.bf16.mxu0 %v8140_v7 }
 0xbcd   :  { %7659 = vmatpush3.bf16.msra.mxu1 %v8001_v42 }
 0xbce   :  { %7605 = vmatmul.mubr.msk.bf16.vlgmr.msra.gmra.mrb[120].mxu0 %vm699_vm0, %v9082_v27  ;;  %7672 = vmatprep.subr.bf16.mxu1 %v8140_v7 }
 0xbcf   :  { %7617 = vmatpush3.bf16.msra.mxu0 %v8002_v60  ;;  %7620 = vmatprep.mubr.msk.bf16.mxu0 %vm8141_vm1, %v8140_v7 }
 0xbd0   :  { %7661 = vmatmul.mubr.msk.bf16.vlgmr.msra.gmra.mrb[140].mxu1 %vm699_vm0, %v9082_v27  ;;  %7618 = vmatprep.subr.bf16.mxu0 %v8140_v7 }
 0xbd1   :  { %7673 = vmatpush3.bf16.msra.mxu1 %v8003_v43  ;;  %7676 = vmatprep.mubr.msk.bf16.mxu1 %vm8141_vm1, %v8140_v7 }
 0xbd2   :  { %7674 = vmatprep.subr.bf16.mxu1 %v8140_v7 }
 0xbd3   :  { %7619 = vmatpush3.bf16.msra.mxu0 %v8004_v44 }
 0xbd4   :  { %7632 = vmatprep.subr.bf16.mxu0 %v8140_v7 }
 0xbd5   :  { %7675 = vmatpush3.bf16.msra.mxu1 %v8005_v46 }
 0xbd6   :  { %7621 = vmatmul.mubr.msk.bf16.vlgmr.msra.gmra.mrb[124].mxu0 %vm699_vm0, %v9082_v27  ;;  %7688 = vmatprep.subr.bf16.mxu1 %v8140_v7 }
 0xbd7   :  { %7633 = vmatpush3.bf16.msra.mxu0 %v7998_v40  ;;  %7636 = vmatprep.mubr.msk.bf16.mxu0 %vm8141_vm1, %v8140_v7 }
 0xbd8   :  { %7677 = vmatmul.mubr.msk.bf16.vlgmr.msra.gmra.mrb[144].mxu1 %vm699_vm0, %v9082_v27  ;;  %7634 = vmatprep.subr.bf16.mxu0 %v8140_v7 }
 0xbd9   :  { %7689 = vmatpush3.bf16.msra.mxu1 %v7999_v56  ;;  %7692 = vmatprep.mubr.msk.bf16.mxu1 %vm8141_vm1, %v8140_v7 }
 0xbda   :  { %7690 = vmatprep.subr.bf16.mxu1 %v8140_v7 }
 0xbdb   :  { %7635 = vmatpush3.bf16.msra.mxu0 %v8000_v41 }
 0xbdc   :  { %7648 = vmatprep.subr.bf16.mxu0 %v8140_v7 }
 0xbdd   :  { %7691 = vmatpush3.bf16.msra.mxu1 %v8001_v42 }
 0xbde   :  { %7637 = vmatmul.mubr.msk.bf16.vlgmr.msra.gmra.mrb[128].mxu0 %vm699_vm0, %v9087_v31  ;;  %7704 = vmatprep.subr.bf16.mxu1 %v8140_v7 }
 0xbdf   :  { %7649 = vmatpush3.bf16.msra.mxu0 %v8002_v60  ;;  %7652 = vmatprep.mubr.msk.bf16.mxu0 %vm8141_vm1, %v8140_v7 }
 0xbe0   :  { %7693 = vmatmul.mubr.msk.bf16.vlgmr.msra.gmra.mrb[148].mxu1 %vm699_vm0, %v9087_v31  ;;  %7650 = vmatprep.subr.bf16.mxu0 %v8140_v7 }
 0xbe1   :  { %7705 = vmatpush3.bf16.msra.mxu1 %v8003_v43  ;;  %7708 = vmatprep.mubr.msk.bf16.mxu1 %vm8141_vm1, %v8140_v7 }
 0xbe2   :  { %7706 = vmatprep.subr.bf16.mxu1 %v8140_v7 }
 0xbe3   :  { %7651 = vmatpush3.bf16.msra.mxu0 %v8004_v44 }
 0xbe4   :  { %7664 = vmatprep.subr.bf16.mxu0 %v8140_v7 }
 0xbe5   :  { %7707 = vmatpush3.bf16.msra.mxu1 %v8005_v46 }
 0xbe6   :  { %7653 = vmatmul.mubr.msk.bf16.vlgmr.msra.gmra.mrb[132].mxu0 %vm699_vm0, %v9087_v31  ;;  %7720 = vmatprep.subr.bf16.mxu1 %v8140_v7 }
 0xbe7   :  { %7665 = vmatpush3.bf16.msra.mxu0 %v8006_v47  ;;  %7668 = vmatprep.mubr.msk.bf16.mxu0 %vm8141_vm1, %v8140_v7 }
 0xbe8   :  { %7709 = vmatmul.mubr.msk.bf16.vlgmr.msra.gmra.mrb[152].mxu1 %vm699_vm0, %v9087_v31  ;;  %7666 = vmatprep.subr.bf16.mxu0 %v8140_v7 }
 0xbe9   :  { %7722 = vmatprep.mubr.msk.bf16.mxu1 %vm8141_vm1, %v8140_v7 }
 0xbeb   :  { %7667 = vmatpush3.bf16.msra.mxu0 %v8007_v48 }
 0xbec   :  { %7680 = vmatprep.subr.bf16.mxu0 %v8140_v7 }
 0xbee   :  { %7669 = vmatmul.mubr.msk.bf16.vlgmr.msra.gmra.mrb[136].mxu0 %vm699_vm0, %v9082_v27 }
 0xbef   :  { %7681 = vmatpush3.bf16.msra.mxu0 %v8008_v36  ;;  %7684 = vmatprep.mubr.msk.bf16.mxu0 %vm8141_vm1, %v8140_v7 }
 0xbf0   :  { %7682 = vmatprep.subr.bf16.mxu0 %v8140_v7 }
 0xbf3   :  { %7683 = vmatpush3.bf16.msra.mxu0 %v8009_v50 }
 0xbf4   :  { %7696 = vmatprep.subr.bf16.mxu0 %v8140_v7 }
 0xbf6   :  { %7685 = vmatmul.mubr.msk.bf16.vlgmr.msra.gmra.mrb[140].mxu0 %vm699_vm0, %v9082_v27 }
 0xbf7   :  { %7697 = vmatpush3.bf16.msra.mxu0 %v8006_v47  ;;  %7700 = vmatprep.mubr.msk.bf16.mxu0 %vm8141_vm1, %v8140_v7 }
 0xbf8   :  { %7698 = vmatprep.subr.bf16.mxu0 %v8140_v7 }
 0xbfb   :  { %7699 = vmatpush3.bf16.msra.mxu0 %v8007_v48 }
 0xbfc   :  { %7712 = vmatprep.subr.bf16.mxu0 %v8140_v7 }
 0xbfe   :  { %7701 = vmatmul.mubr.msk.bf16.vlgmr.msra.gmra.mrb[144].mxu0 %vm699_vm0, %v9087_v31 }
 0xbff   :  { %7713 = vmatpush3.bf16.msra.mxu0 %v8008_v36  ;;  %7716 = vmatprep.mubr.msk.bf16.mxu0 %vm8141_vm1, %v8140_v7 }
 0xc00   :  { %7714 = vmatprep.subr.bf16.mxu0 %v8140_v7 }
 0xc03   :  { %7715 = vmatpush3.bf16.msra.mxu0 %v8009_v50 }
 0xc04   :  { %7726 = vmatprep.subr.bf16.mxu0 %v8140_v7 }
 0xc06   :  { %7717 = vmatmul.mubr.msk.bf16.vlgmr.msra.gmra.mrb[148].mxu0 %vm699_vm0, %v9087_v31 }
 0xc07   :  { %7728 = vmatprep.mubr.msk.bf16.mxu0 %vm8141_vm1, %v8140_v7 }
 0xc71   :  { %v3650_v25 = vpop.f32.mrb[96].mxu0 }
 0xc72   :  { %v7534_v5 = vpop.f32.mrb[97].mxu0  ;;  %v3651_v18 = vadd.f32 %v6652_v13, %v3650_v25 }
 0xc73   :  { %v3653_v52 = vpop.f32.mrb[98].mxu0  ;;  %v9289_v49 = vpop.f32.mrb[116].mxu1 }
 0xc74   :  { %v7535_v57 = vpop.f32.mrb[99].mxu0  ;;  %v7566_v23 = vpop.f32.mrb[117].mxu1  ;;  %v3975_v31 = vpack.c.bf16 %v3651_v18, %v3651_v18  ;;  %v3850_v36 = vadd.f32 %v6652_v13, %v9289_v49 }
 0xc75   :  { %v3852_v58 = vpop.f32.mrb[118].mxu1 }
 0xc76   :  { %v7567_v59 = vpop.f32.mrb[119].mxu1 }
 0xc77   :  { %v3979_v59 = vpack.c.bf16 %v3850_v36, %v3850_v36 }
 0xc79   :  { %v9291_v61 = vpop.f32.mrb[100].mxu0 }
 0xc7a   :  { %v7542_v17 = vpop.f32.mrb[101].mxu0 }
 0xc7b   :  { %v3705_v62 = vpop.f32.mrb[102].mxu0  ;;  %v9293_v63 = vpop.f32.mrb[120].mxu1 }
 0xc7c   :  { %v7543_v10 = vpop.f32.mrb[103].mxu0  ;;  %v7582_v21 = vpop.f32.mrb[121].mxu1 }
 0xc7d   :  { %v3932_v0 = vpop.f32.mrb[122].mxu1  ;;  %v6693_v10 = vld [vmem:[%s9661_s9 + $0x5] ss:$0 sm:$0xff] }
 0xc7e   :  { %v7583_v45 = vpop.f32.mrb[123].mxu1  ;;  %v6732_v0 = vld [vmem:[%s9663_s11 + $0x4] ss:$0 sm:$0xff] }
 0xc7f   :  { %v3930_v45 = vadd.f32 %v6654_v35, %v9293_v63 }
 0xc81   :  { %v3754_v1 = vpop.f32.mrb[104].mxu0 }
 0xc82   :  { %v7550_v3 = vpop.f32.mrb[105].mxu0  ;;  %v3755_v26 = vadd.f32 %v6654_v35, %v3754_v1 }
 0xc83   :  { %v3757_v4 = vpop.f32.mrb[106].mxu0  ;;  %v4075_v51 = vpop.f32.mrb[124].mxu1 }
 0xc84   :  { %v4076_v6 = vadd.f32 %v6692_v2, %v4075_v51  ;;  %v7551_v8 = vpop.f32.mrb[107].mxu0  ;;  %v7598_v9 = vpop.f32.mrb[125].mxu1  ;;  %v3977_v43 = vpack.c.bf16 %v3755_v26, %v3755_v26 }
 0xc85   :  { %v4078_v54 = vpop.f32.mrb[126].mxu1 }
 0xc86   :  { %v4397_v11 = vpack.c.bf16 %v4076_v6, %v4076_v6  ;;  %v7599_v12 = vpop.f32.mrb[127].mxu1  ;;  %v6653_v54 = vld [vmem:[%s9702_s0 + $0x5] ss:$0 sm:$0xff] }
 0xc87   :  { %v3981_v12 = vpack.c.bf16 %v3930_v45, %v3930_v45  ;;  %v3703_v18 = vadd.f32 %v6653_v54, %v9291_v61 }
 0xc88   :  { %v4831_v14 = vsel %vm2015_vm2, %v4397_v11, 0 }
 0xc89   :  { %v9302_v15 = vpop.f32.mrb[108].mxu0  ;;  %7721 = vmatpush3.bf16.xpose.msra.mxu1 %v4831_v14 }
 0xc8a   :  { %v7558_v19 = vpop.f32.mrb[109].mxu0  ;;  %7732 = vmatprep.subr.bf16.mxu1 %v8140_v7 }
 0xc8b   :  { %v3809_v20 = vpop.f32.mrb[110].mxu0  ;;  %v4179_v22 = vpop.f32.mrb[128].mxu1 }
 0xc8c   :  { %v4180_v24 = vadd.f32 %v6694_v16, %v4179_v22  ;;  %v7559_v27 = vpop.f32.mrb[111].mxu0  ;;  %v7614_v28 = vpop.f32.mrb[129].mxu1 }
 0xc8d   :  { %v4182_v29 = vpop.f32.mrb[130].mxu1 }
 0xc8e   :  { %v4399_v32 = vpack.c.bf16 %v4180_v24, %v4180_v24  ;;  %v7615_v33 = vpop.f32.mrb[131].mxu1  ;;  %v3976_v29 = vpack.c.bf16 %v3703_v18, %v3703_v18 }
 0xc8f   :  { %v6655_v33 = vld [vmem:[%s9702_s0 + $0x7] ss:$0 sm:$0xff] }
 0xc90   :  { %v4923_v34 = vsel %vm2015_vm2, %v4399_v32, 0  ;;  %7723 = vmatmul.mubr.msk.bf16.vlgmr.msra.gmra.mrb[156].mxu1 %vm2015_vm2, %v3975_v31 }
 0xc91   :  { %v9313_v37 = vpop.f32.mrb[112].mxu0  ;;  %7733 = vmatpush3.bf16.xpose.msra.mxu1 %v4923_v34  ;;  %7734 = vmatprep.mubr.msk.bf16.mxu1 %vm8141_vm1, %v8140_v7 }
 0xc92   :  { %v7574_v38 = vpop.f32.mrb[113].mxu0  ;;  %7744 = vmatprep.subr.bf16.mxu1 %v8140_v7 }
 0xc93   :  { %v3892_v39 = vpop.f32.mrb[114].mxu0  ;;  %v4271_v40 = vpop.f32.mrb[132].mxu1  ;;  %v3807_v38 = vadd.f32 %v6655_v33, %v9302_v15  ;;  %v3890_v15 = vadd.f32 %v6653_v54, %v9313_v37  ;;  %v6733_v37 = vld [vmem:[%s9663_s11 + $0x5] ss:$0 sm:$0xff] }
 0xc94   :  { %v4272_v56 = vadd.f32 %v6692_v2, %v4271_v40  ;;  %v7575_v41 = vpop.f32.mrb[115].mxu0  ;;  %v7630_v42 = vpop.f32.mrb[133].mxu1 }
 0xc95   :  { %v4274_v60 = vpop.f32.mrb[134].mxu1 }
 0xc96   :  { %v4401_v44 = vpack.c.bf16 %v4272_v56, %v4272_v56  ;;  %v7631_v46 = vpop.f32.mrb[135].mxu1  ;;  %v3978_v60 = vpack.c.bf16 %v3807_v38, %v3807_v38 }
 0xc98   :  { %v5015_v47 = vsel %vm2015_vm2, %v4401_v44, 0  ;;  %7735 = vmatmul.mubr.msk.bf16.vlgmr.msra.gmra.mrb[160].mxu1 %vm2015_vm2, %v3977_v43 }
 0xc99   :  { %v9320_v48 = vpop.f32.mrb[116].mxu0  ;;  %7745 = vmatpush3.bf16.xpose.msra.mxu1 %v5015_v47  ;;  %7746 = vmatprep.mubr.msk.bf16.mxu1 %vm8141_vm1, %v8140_v7 }
 0xc9a   :  { %v7590_v50 = vpop.f32.mrb[117].mxu0  ;;  %7756 = vmatprep.subr.bf16.mxu1 %v8140_v7  ;;  %v3970_v45 = vadd.f32 %v6655_v33, %v9320_v48 }
 0xc9b   :  { %v3972_v25 = vpop.f32.mrb[118].mxu0  ;;  %v4351_v5 = vpop.f32.mrb[136].mxu1 }
 0xc9c   :  { %v4352_v52 = vadd.f32 %v6694_v16, %v4351_v5  ;;  %v7591_v57 = vpop.f32.mrb[119].mxu0  ;;  %v7646_v23 = vpop.f32.mrb[137].mxu1  ;;  %v6695_v16 = vld [vmem:[%s9661_s9 + $0x7] ss:$0 sm:$0xff] }
 0xc9d   :  { %v4354_v58 = vpop.f32.mrb[138].mxu1 }
 0xc9e   :  { %v4403_v17 = vpack.c.bf16 %v4352_v52, %v4352_v52  ;;  %v7647_v62 = vpop.f32.mrb[139].mxu1 }
 0xca0   :  { %v5107_v21 = vsel %vm2015_vm2, %v4403_v17, 0  ;;  %7747 = vmatmul.mubr.msk.bf16.vlgmr.msra.gmra.mrb[164].mxu1 %vm2015_vm2, %v3979_v59  ;;  %v3980_v59 = vpack.c.bf16 %v3890_v15, %v3890_v15 }
 0xca1   :  { %v4127_v49 = vpop.f32.mrb[120].mxu0  ;;  %7757 = vmatpush3.bf16.xpose.msra.mxu1 %v5107_v21  ;;  %7758 = vmatprep.mubr.msk.bf16.mxu1 %vm8141_vm1, %v8140_v7 }
 0xca2   :  { %v4128_v1 = vadd.f32 %v6693_v10, %v4127_v49  ;;  %v7606_v2 = vpop.f32.mrb[121].mxu0  ;;  %7768 = vmatprep.subr.bf16.mxu1 %v8140_v7 }
 0xca3   :  { %v4130_v3 = vpop.f32.mrb[122].mxu0  ;;  %v4497_v4 = vpop.f32.mrb[140].mxu1 }
 0xca4   :  { %v4398_v51 = vpack.c.bf16 %v4128_v1, %v4128_v1  ;;  %v4498_v6 = vadd.f32 %v6732_v0, %v4497_v4  ;;  %v7607_v8 = vpop.f32.mrb[123].mxu0  ;;  %v7662_v9 = vpop.f32.mrb[141].mxu1 }
 0xca5   :  { %v4500_v11 = vpop.f32.mrb[142].mxu1 }
 0xca6   :  { %v4877_v13 = vsel %vm2015_vm2, %v4398_v51, 0  ;;  %v4819_v14 = vpack.c.bf16 %v4498_v6, %v4498_v6  ;;  %v7663_v63 = vpop.f32.mrb[143].mxu1  ;;  %v3982_v51 = vpack.c.bf16 %v3970_v45, %v3970_v45 }
 0xca7   :  { %7727 = vmatpush3.bf16.xpose.msra.mxu0 %v4877_v13 }
 0xca8   :  { %v5311_v19 = vsel %vm2499_vm3, %v4819_v14, 0  ;;  %7759 = vmatmul.mubr.msk.bf16.vlgmr.msra.gmra.mrb[168].mxu1 %vm2015_vm2, %v3981_v12  ;;  %7738 = vmatprep.subr.bf16.mxu0 %v8140_v7 }
 0xca9   :  { %v4231_v20 = vpop.f32.mrb[124].mxu0  ;;  %7769 = vmatpush3.bf16.msra.mxu1 %v5311_v19  ;;  %7770 = vmatprep.mubr.msk.bf16.mxu1 %vm8141_vm1, %v8140_v7 }
 0xcaa   :  { %v4232_v22 = vadd.f32 %v6695_v16, %v4231_v20  ;;  %v7622_v24 = vpop.f32.mrb[125].mxu0  ;;  %7780 = vmatprep.subr.bf16.mxu1 %v8140_v7 }
 0xcab   :  { %v4234_v27 = vpop.f32.mrb[126].mxu0  ;;  %v9352_v28 = vpop.f32.mrb[144].mxu1 }
 0xcac   :  { %v4400_v61 = vpack.c.bf16 %v4232_v22, %v4232_v22  ;;  %v7623_v31 = vpop.f32.mrb[127].mxu0  ;;  %v7678_v32 = vpop.f32.mrb[145].mxu1 }
 0xcad   :  { %v4604_v34 = vpop.f32.mrb[146].mxu1 }
 0xcae   :  { %v4969_v35 = vsel %vm2015_vm2, %v4400_v61, 0  ;;  %v7679_v26 = vpop.f32.mrb[147].mxu1  ;;  %7729 = vmatmul.mubr.msk.bf16.vlgmr.msra.gmra.mrb[152].mxu0 %vm2015_vm2, %v3976_v29 }
 0xcaf   :  { %7739 = vmatpush3.bf16.xpose.msra.mxu0 %v4969_v35  ;;  %7740 = vmatprep.mubr.msk.bf16.mxu0 %vm8141_vm1, %v8140_v7 }
 0xcb0   :  { %7750 = vmatprep.subr.bf16.mxu0 %v8140_v7 }
 0xcb1   :  { %v4311_v39 = vpop.f32.mrb[128].mxu0 }
 0xcb2   :  { %v4312_v40 = vadd.f32 %v6693_v10, %v4311_v39  ;;  %v7638_v56 = vpop.f32.mrb[129].mxu0 }
 0xcb3   :  { %v4314_v41 = vpop.f32.mrb[130].mxu0  ;;  %v4693_v42 = vpop.f32.mrb[148].mxu1 }
 0xcb4   :  { %v4402_v43 = vpack.c.bf16 %v4312_v40, %v4312_v40  ;;  %v9363_v44 = vadd.f32 %v6732_v0, %v4693_v42  ;;  %v7639_v46 = vpop.f32.mrb[131].mxu0  ;;  %v7694_v47 = vpop.f32.mrb[149].mxu1 }
 0xcb5   :  { %v4696_v36 = vpop.f32.mrb[150].mxu1 }
 0xcb6   :  { %v5061_v50 = vsel %vm2015_vm2, %v4402_v43, 0  ;;  %v7695_v25 = vpop.f32.mrb[151].mxu1  ;;  %7741 = vmatmul.mubr.msk.bf16.vlgmr.msra.gmra.mrb[156].mxu0 %vm2015_vm2, %v3978_v60 }
 0xcb7   :  { %7751 = vmatpush3.bf16.xpose.msra.mxu0 %v5061_v50  ;;  %7752 = vmatprep.mubr.msk.bf16.mxu0 %vm8141_vm1, %v8140_v7 }
 0xcb8   :  { %7762 = vmatprep.subr.bf16.mxu0 %v8140_v7 }
 0xcb9   :  { %v4391_v5 = vpop.f32.mrb[132].mxu0 }
 0xcba   :  { %v4392_v52 = vadd.f32 %v6695_v16, %v4391_v5  ;;  %v7654_v57 = vpop.f32.mrb[133].mxu0 }
 0xcbb   :  { %v4394_v23 = vpop.f32.mrb[134].mxu0  ;;  %v9371_v58 = vpop.f32.mrb[152].mxu1 }
 0xcbc   :  { %v4404_v17 = vpack.c.bf16 %v4392_v52, %v4392_v52  ;;  %v7655_v62 = vpop.f32.mrb[135].mxu0  ;;  %v7710_v10 = vpop.f32.mrb[153].mxu1 }
 0xcbd   :  { %v4776_v21 = vpop.f32.mrb[154].mxu1 }
 0xcbe   :  { %v5153_v49 = vsel %vm2015_vm2, %v4404_v17, 0  ;;  %v7711_v0 = vpop.f32.mrb[155].mxu1  ;;  %7753 = vmatmul.mubr.msk.bf16.vlgmr.msra.gmra.mrb[160].mxu0 %vm2015_vm2, %v3980_v59 }
 0xcbf   :  { %7763 = vmatpush3.bf16.xpose.msra.mxu0 %v5153_v49  ;;  %7764 = vmatprep.mubr.msk.bf16.mxu0 %vm8141_vm1, %v8140_v7 }
 0xcc0   :  { %7774 = vmatprep.subr.bf16.mxu0 %v8140_v7 }
 0xcc1   :  { %v4549_v1 = vpop.f32.mrb[136].mxu0 }
 0xcc2   :  { %v4550_v2 = vadd.f32 %v6733_v37, %v4549_v1  ;;  %v7670_v3 = vpop.f32.mrb[137].mxu0 }
 0xcc3   :  { %v4552_v4 = vpop.f32.mrb[138].mxu0 }
 0xcc4   :  { %v4820_v6 = vpack.c.bf16 %v4550_v2, %v4550_v2  ;;  %v7671_v8 = vpop.f32.mrb[139].mxu0 }
 0xcc6   :  { %v5357_v9 = vsel %vm2499_vm3, %v4820_v6, 0  ;;  %7765 = vmatmul.mubr.msk.bf16.vlgmr.msra.gmra.mrb[164].mxu0 %vm2015_vm2, %v3982_v51 }
 0xcc7   :  { %7775 = vmatpush3.bf16.msra.mxu0 %v5357_v9  ;;  %7776 = vmatprep.mubr.msk.bf16.mxu0 %vm8141_vm1, %v8140_v7 }
 0xcc8   :  { %7786 = vmatprep.subr.bf16.mxu0 %v8140_v7 }
 0xcc9   :  { %v9387_v48 = vpop.f32.mrb[140].mxu0 }
 0xcca   :  { %v7686_v54 = vpop.f32.mrb[141].mxu0 }
 0xccb   :  { %v4656_v11 = vpop.f32.mrb[142].mxu0 }
 0xccc   :  { %v7687_v12 = vpop.f32.mrb[143].mxu0 }
 0xcd1   :  { %v4733_v13 = vpop.f32.mrb[144].mxu0 }
 0xcd2   :  { %v9389_v14 = vadd.f32 %v6733_v37, %v4733_v13  ;;  %v7702_v63 = vpop.f32.mrb[145].mxu0 }
 0xcd3   :  { %v4736_v16 = vpop.f32.mrb[146].mxu0 }
 0xcd4   :  { %v7703_v18 = vpop.f32.mrb[147].mxu0 }
 0xcd9   :  { %v9391_v19 = vpop.f32.mrb[148].mxu0 }
 0xcda   :  { %v7718_v20 = vpop.f32.mrb[149].mxu0 }
 0xcdb   :  { %v4816_v22 = vpop.f32.mrb[150].mxu0 }
 0xcdc   :  { %v7719_v24 = vpop.f32.mrb[151].mxu0 }
 0xd63   :  { %v4867_v27 = vpop.f32.mrb[156].mxu1 }
 0xd64   :  { %v5195_v29 = vmul.f32 0.35355338, %v4867_v27  ;;  %v7724_v61 = vpop.f32.mrb[157].mxu1 }
 0xd65   :  { %v4870_v31 = vpop.f32.mrb[158].mxu1 }
 0xd66   :  { %v7725_v32 = vpop.f32.mrb[159].mxu1  ;;  %v5203_v33 = vadd.f32 %v5195_v29, %v8819_v30 }
 0xd68   :  { %v5211_v34 = vsel %vm2015_vm2, %v5203_v33, -inf }
 0xd69   :  { %5212 = vmax.xlane.f32.xlu0 %v5211_v34 }
 0xd6b   :  { %v4959_v35 = vpop.f32.mrb[160].mxu1 }
 0xd6c   :  { %v5197_v26 = vmul.f32 0.35355338, %v4959_v35  ;;  %v7736_v38 = vpop.f32.mrb[161].mxu1 }
 0xd6d   :  { %v4962_v39 = vpop.f32.mrb[162].mxu1 }
 0xd6e   :  { %v7737_v40 = vpop.f32.mrb[163].mxu1  ;;  %v5205_v56 = vadd.f32 %v5197_v26, %v8819_v30 }
 0xd70   :  { %v5217_v41 = vsel %vm2015_vm2, %v5205_v56, -inf }
 0xd71   :  { %5218 = vmax.xlane.f32.xlu0 %v5217_v41 }
 0xd73   :  { %v5051_v42 = vpop.f32.mrb[164].mxu1 }
 0xd74   :  { %v5199_v60 = vmul.f32 0.35355338, %v5051_v42  ;;  %v7748_v43 = vpop.f32.mrb[165].mxu1 }
 0xd75   :  { %v5054_v46 = vpop.f32.mrb[166].mxu1 }
 0xd76   :  { %v7749_v47 = vpop.f32.mrb[167].mxu1  ;;  %v5207_v36 = vadd.f32 %v5199_v60, %v8819_v30 }
 0xd78   :  { %v5223_v50 = vsel %vm2015_vm2, %v5207_v36, -inf }
 0xd79   :  { %5224 = vmax.xlane.f32.xlu0 %v5223_v50 }
 0xd7b   :  { %v5143_v25 = vpop.f32.mrb[168].mxu1 }
 0xd7c   :  { %v5201_v15 = vmul.f32 0.35355338, %v5143_v25  ;;  %v7760_v5 = vpop.f32.mrb[169].mxu1 }
 0xd7d   :  { %v5146_v52 = vpop.f32.mrb[170].mxu1 }
 0xd7e   :  { %v7761_v57 = vpop.f32.mrb[171].mxu1  ;;  %v5209_v23 = vadd.f32 %v5201_v15, %v8819_v30 }
 0xd80   :  { %v5229_v59 = vsel %vm2015_vm2, %v5209_v23, -inf }
 0xd81   :  { %5230 = vmax.xlane.f32.xlu0 %v5229_v59  ;;  %v4913_v17 = vpop.f32.mrb[152].mxu0 }
 0xd82   :  { %v5196_v62 = vmul.f32 0.35355338, %v4913_v17  ;;  %v7730_v10 = vpop.f32.mrb[153].mxu0 }
 0xd83   :  { %v4916_v21 = vpop.f32.mrb[154].mxu0 }
 0xd84   :  { %v7731_v49 = vpop.f32.mrb[155].mxu0  ;;  %v5204_v0 = vadd.f32 %v5196_v62, %v8819_v30 }
 0xd86   :  { %v5214_v37 = vsel %vm2015_vm2, %v5204_v0, -inf }
 0xd87   :  { %5215 = vmax.xlane.f32.xlu1 %v5214_v37 }
 0xd89   :  { %v5005_v45 = vpop.f32.mrb[156].mxu0 }
 0xd8a   :  { %v5198_v1 = vmul.f32 0.35355338, %v5005_v45  ;;  %v7742_v2 = vpop.f32.mrb[157].mxu0 }
 0xd8b   :  { %v5008_v3 = vpop.f32.mrb[158].mxu0 }
 0xd8c   :  { %v7743_v4 = vpop.f32.mrb[159].mxu0  ;;  %v5206_v51 = vadd.f32 %v5198_v1, %v8819_v30 }
 0xd8e   :  { %v5220_v6 = vsel %vm2015_vm2, %v5206_v51, -inf }
 0xd8f   :  { %5221 = vmax.xlane.f32.xlu1 %v5220_v6 }
 0xd91   :  { %v5097_v8 = vpop.f32.mrb[160].mxu0 }
 0xd92   :  { %v5200_v9 = vmul.f32 0.35355338, %v5097_v8  ;;  %v7754_v54 = vpop.f32.mrb[161].mxu0  ;;  %v6734_v8 = vld [vmem:[%s9663_s11 + $0x6] ss:$0 sm:$0xff] }
 0xd93   :  { %v5100_v11 = vpop.f32.mrb[162].mxu0 }
 0xd94   :  { %v7755_v12 = vpop.f32.mrb[163].mxu0  ;;  %v5208_v13 = vadd.f32 %v5200_v9, %v8819_v30  ;;  %v4602_v9 = vadd.f32 %v6734_v8, %v9352_v28  ;;  %v4823_v28 = vpack.c.bf16 %v9363_v44, %v9363_v44 }
 0xd96   :  { %v5226_v63 = vsel %vm2015_vm2, %v5208_v13, -inf  ;;  %v4821_v12 = vpack.c.bf16 %v4602_v9, %v4602_v9 }
 0xd97   :  { %5227 = vmax.xlane.f32.xlu1 %v5226_v63 }
 0xd99   :  { %v5189_v16 = vpop.f32.mrb[164].mxu0 }
 0xd9a   :  { %v5202_v18 = vmul.f32 0.35355338, %v5189_v16  ;;  %v7766_v20 = vpop.f32.mrb[165].mxu0  ;;  %v5403_v16 = vsel %vm2499_vm3, %v4821_v12, 0 }
 0xd9b   :  { %v5192_v22 = vpop.f32.mrb[166].mxu0 }
 0xd9c   :  { %v7767_v24 = vpop.f32.mrb[167].mxu0  ;;  %v5210_v27 = vadd.f32 %v5202_v18, %v8819_v30 }
 0xd9e   :  { %v5232_v29 = vsel %vm2015_vm2, %v5210_v27, -inf }
 0xd9f   :  { %5233 = vmax.xlane.f32.xlu1 %v5232_v29  ;;  %v4774_v29 = vadd.f32 %v6734_v8, %v9371_v58 }
 0xdf6   :  { %v5213_v61 = vpop.xlane.xlu0 %5212 }
 0xdf7   :  { %v5235_v31 = vsub.f32 %v5203_v33, %v5213_v61 }
 0xdf9   :  { %v5243_v32 = vmul.f32 1.442695, %v5235_v31 }
 0xdfb   :  { %8070 = vpow2.f32 %v5243_v32  ;;  %v4825_v32 = vpack.c.bf16 %v4774_v29, %v4774_v29  ;;  %v6771_v29 = vld [vmem:[%s9664_s12 + $0x1c] sm:$0xf] }
 0xdfe   :  { %v5219_v34 = vpop.xlane.xlu0 %5218 }
 0xdff   :  { %v5237_v35 = vsub.f32 %v5205_v56, %v5219_v34 }
 0xe01   :  { %v5247_v26 = vmul.f32 1.442695, %v5237_v35 }
 0xe03   :  { %8072 = vpow2.f32 %v5247_v26  ;;  %v5587_v26 = vsel %vm2499_vm3, %v4825_v32, 0 }
 0xe05   :  { %v8071_v38 = vpop.eup %8070 }
 0xe06   :  { %v5225_v39 = vpop.xlane.xlu0 %5224  ;;  %v5259_v40 = vsel %vm2015_vm2, %v8071_v38, 0.0 }
 0xe07   :  { %v5239_v41 = vsub.f32 %v5207_v36, %v5225_v39  ;;  %5260 = vadd.xlane.f32.xlu0 %v5259_v40 }
 0xe09   :  { %v5251_v42 = vmul.f32 1.442695, %v5239_v41 }
 0xe0b   :  { %8074 = vpow2.f32 %v5251_v42 }
 0xe0d   :  { %v8073_v30 = vpop.eup %8072 }
 0xe0e   :  { %v5231_v60 = vpop.xlane.xlu0 %5230  ;;  %v5265_v43 = vsel %vm2015_vm2, %v8073_v30, 0.0 }
 0xe0f   :  { %v5241_v46 = vsub.f32 %v5209_v23, %v5231_v60  ;;  %5266 = vadd.xlane.f32.xlu0 %v5265_v43 }
 0xe11   :  { %v5255_v33 = vmul.f32 1.442695, %v5241_v46 }
 0xe13   :  { %8076 = vpow2.f32 %v5255_v33 }
 0xe14   :  { %v5216_v47 = vpop.xlane.xlu1 %5215 }
 0xe15   :  { %v9411_v56 = vpop.eup %8074  ;;  %v5236_v50 = vsub.f32 %v5204_v0, %v5216_v47 }
 0xe16   :  { %v5271_v25 = vsel %vm2015_vm2, %v9411_v56, 0.0 }
 0xe17   :  { %v5245_v15 = vmul.f32 1.442695, %v5236_v50  ;;  %5272 = vadd.xlane.f32.xlu0 %v5271_v25 }
 0xe19   :  { %8078 = vpow2.f32 %v5245_v15 }
 0xe1c   :  { %v5222_v36 = vpop.xlane.xlu1 %5221 }
 0xe1d   :  { %v9415_v5 = vpop.eup %8076  ;;  %v5238_v52 = vsub.f32 %v5206_v51, %v5222_v36 }
 0xe1e   :  { %v5277_v57 = vsel %vm2015_vm2, %v9415_v5, 0.0 }
 0xe1f   :  { %v5249_v23 = vmul.f32 1.442695, %v5238_v52  ;;  %5278 = vadd.xlane.f32.xlu0 %v5277_v57 }
 0xe21   :  { %8080 = vpow2.f32 %v5249_v23 }
 0xe23   :  { %v9419_v59 = vpop.eup %8078 }
 0xe24   :  { %v5228_v17 = vpop.xlane.xlu1 %5227  ;;  %v5262_v62 = vsel %vm2015_vm2, %v9419_v59, 0.0 }
 0xe25   :  { %v5240_v10 = vsub.f32 %v5208_v13, %v5228_v17  ;;  %5263 = vadd.xlane.f32.xlu1 %v5262_v62 }
 0xe27   :  { %v5253_v21 = vmul.f32 1.442695, %v5240_v10  ;;  %v6768_v10 = vld [vmem:[%s9664_s12 + $0x10] sm:$0xf] }
 0xe29   :  { %8082 = vpow2.f32 %v5253_v21  ;;  %v5692_v21 = vsel %vm2499_vm3, %v6768_v10, 0 }
 0xe2b   :  { %v9423_v49 = vpop.eup %8080 }
 0xe2c   :  { %v5234_v0 = vpop.xlane.xlu1 %5233  ;;  %v5268_v37 = vsel %vm2015_vm2, %v9423_v49, 0.0 }
 0xe2d   :  { %v5242_v45 = vsub.f32 %v5210_v27, %v5234_v0  ;;  %5269 = vadd.xlane.f32.xlu1 %v5268_v37  ;;  %v5495_v27 = vsel %vm2499_vm3, %v4823_v28, 0  ;;  %v6770_v37 = vld [vmem:[%s9664_s12 + $0x18] sm:$0xf] }
 0xe2f   :  { %v5257_v1 = vmul.f32 1.442695, %v5242_v45 }
 0xe31   :  { %8084 = vpow2.f32 %v5257_v1 }
 0xe33   :  { %v9427_v2 = vpop.eup %8082 }
 0xe34   :  { %v5274_v3 = vsel %vm2015_vm2, %v9427_v2, 0.0 }
 0xe35   :  { %5275 = vadd.xlane.f32.xlu1 %v5274_v3  ;;  %v5784_v3 = vsel %vm2499_vm3, %v6770_v37, 0 }
 0xe3b   :  { %v9431_v4 = vpop.eup %8084 }
 0xe3c   :  { %v5280_v51 = vsel %vm2015_vm2, %v9431_v4, 0.0 }
 0xe3d   :  { %5281 = vadd.xlane.f32.xlu1 %v5280_v51 }
 0xe94   :  { %v5261_v6 = vpop.xlane.xlu0 %5260 }
 0xe95   :  { %8086 = vrcp.f32 %v5261_v6 }
 0xe9c   :  { %v5267_v54 = vpop.xlane.xlu0 %5266 }
 0xe9d   :  { %8088 = vrcp.f32 %v5267_v54 }
 0xe9f   :  { %v8087_v11 = vpop.eup %8086 }
 0xea0   :  { %v5291_v13 = vmul.f32 %v8087_v11, %v8071_v38  ;;  %v6735_v38 = vld [vmem:[%s9663_s11 + $0x7] ss:$0 sm:$0xff] }
 0xea1   :  { %v4654_v40 = vadd.f32 %v6735_v38, %v9387_v48  ;;  %v4814_v36 = vadd.f32 %v6735_v38, %v9391_v19 }
 0xea2   :  { %v5299_v63 = vpack.c.bf16 %v5291_v13, %v5291_v13 }
 0xea3   :  { %v4822_v60 = vpack.c.bf16 %v4654_v40, %v4654_v40  ;;  %v4826_v57 = vpack.c.bf16 %v4814_v36, %v4814_v36 }
 0xea4   :  { %7771 = vmatmul.mubr.msk.bf16.vlgmr.msra.gmra.mrb[172].mxu1 %vm2015_vm2, %v5299_v63  ;;  %v5273_v18 = vpop.xlane.xlu0 %5272 }
 0xea5   :  { %7781 = vmatpush3.bf16.msra.mxu1 %v5403_v16  ;;  %8090 = vrcp.f32 %v5273_v18  ;;  %7782 = vmatprep.mubr.msk.bf16.mxu1 %vm8141_vm1, %v8140_v7  ;;  %v5449_v33 = vsel %vm2499_vm3, %v4822_v60, 0 }
 0xea6   :  { %7792 = vmatprep.subr.bf16.mxu1 %v8140_v7 }
 0xea7   :  { %v8089_v20 = vpop.eup %8088 }
 0xea8   :  { %v5293_v22 = vmul.f32 %v8089_v20, %v8073_v30 }
 0xeaa   :  { %v5301_v24 = vpack.c.bf16 %v5293_v22, %v5293_v22 }
 0xeac   :  { %7783 = vmatmul.mubr.msk.bf16.vlgmr.msra.gmra.mrb[176].mxu1 %vm2015_vm2, %v5301_v24  ;;  %v5279_v61 = vpop.xlane.xlu0 %5278 }
 0xead   :  { %7793 = vmatpush3.bf16.msra.mxu1 %v5495_v27  ;;  %8092 = vrcp.f32 %v5279_v61  ;;  %7794 = vmatprep.mubr.msk.bf16.mxu1 %vm8141_vm1, %v8140_v7 }
 0xeae   :  { %7804 = vmatprep.subr.bf16.mxu1 %v8140_v7 }
 0xeaf   :  { %v8091_v31 = vpop.eup %8090 }
 0xeb0   :  { %v5295_v44 = vmul.f32 %v8091_v31, %v9411_v56  ;;  %v4824_v56 = vpack.c.bf16 %v9389_v14, %v9389_v14 }
 0xeb2   :  { %v5264_v34 = vpop.xlane.xlu1 %5263  ;;  %v5303_v35 = vpack.c.bf16 %v5295_v44, %v5295_v44  ;;  %v5541_v15 = vsel %vm2499_vm3, %v4824_v56, 0  ;;  %v5830_v44 = vsel %vm2499_vm3, %v6771_v29, 0 }
 0xeb3   :  { %8094 = vrcp.f32 %v5264_v34 }
 0xeb4   :  { %7795 = vmatmul.mubr.msk.bf16.vlgmr.msra.gmra.mrb[180].mxu1 %vm2015_vm2, %v5303_v35 }
 0xeb5   :  { %7805 = vmatpush3.bf16.msra.mxu1 %v5587_v26  ;;  %7806 = vmatprep.mubr.msk.bf16.mxu1 %vm8141_vm1, %v8140_v7 }
 0xeb6   :  { %7816 = vmatprep.subr.bf16.mxu1 %v8140_v7 }
 0xeb7   :  { %v8093_v58 = vpop.eup %8092 }
 0xeb8   :  { %v5297_v39 = vmul.f32 %v8093_v58, %v9415_v5 }
 0xeba   :  { %v5270_v41 = vpop.xlane.xlu1 %5269  ;;  %v5305_v42 = vpack.c.bf16 %v5297_v39, %v5297_v39 }
 0xebb   :  { %8096 = vrcp.f32 %v5270_v41 }
 0xebc   :  { %7807 = vmatmul.mubr.msk.bf16.vlgmr.msra.gmra.mrb[184].mxu1 %vm2015_vm2, %v5305_v42 }
 0xebd   :  { %v8095_v30 = vpop.eup %8094  ;;  %7818 = vmatprep.mubr.msk.bf16.mxu1 %vm8141_vm1, %v8140_v7  ;;  %7817 = vmatpush3.bf16.msra.mxu1 %v5692_v21 }
 0xebe   :  { %v5292_v43 = vmul.f32 %v8095_v30, %v9419_v59  ;;  %v5633_v59 = vsel %vm2499_vm3, %v4826_v57, 0  ;;  %7828 = vmatprep.subr.bf16.mxu1 %v8140_v7 }
 0xec0   :  { %v5300_v46 = vpack.c.bf16 %v5292_v43, %v5292_v43 }
 0xec2   :  { %7777 = vmatmul.mubr.msk.bf16.vlgmr.msra.gmra.mrb[168].mxu0 %vm2015_vm2, %v5300_v46  ;;  %v5276_v47 = vpop.xlane.xlu1 %5275 }
 0xec3   :  { %7787 = vmatpush3.bf16.msra.mxu0 %v5449_v33  ;;  %8098 = vrcp.f32 %v5276_v47  ;;  %7788 = vmatprep.mubr.msk.bf16.mxu0 %vm8141_vm1, %v8140_v7 }
 0xec4   :  { %7798 = vmatprep.subr.bf16.mxu0 %v8140_v7 }
 0xec5   :  { %v8097_v48 = vpop.eup %8096 }
 0xec6   :  { %v5294_v50 = vmul.f32 %v8097_v48, %v9423_v49  ;;  %v6769_v49 = vld [vmem:[%s9664_s12 + $0x14] sm:$0xf] }
 0xec7   :  { %v5738_v0 = vsel %vm2499_vm3, %v6769_v49, 0 }
 0xec8   :  { %v5302_v25 = vpack.c.bf16 %v5294_v50, %v5294_v50 }
 0xeca   :  { %7789 = vmatmul.mubr.msk.bf16.vlgmr.msra.gmra.mrb[172].mxu0 %vm2015_vm2, %v5302_v25  ;;  %v5282_v5 = vpop.xlane.xlu1 %5281 }
 0xecb   :  { %7799 = vmatpush3.bf16.msra.mxu0 %v5541_v15  ;;  %8100 = vrcp.f32 %v5282_v5  ;;  %7800 = vmatprep.mubr.msk.bf16.mxu0 %vm8141_vm1, %v8140_v7 }
 0xecc   :  { %7810 = vmatprep.subr.bf16.mxu0 %v8140_v7 }
 0xecd   :  { %v8099_v52 = vpop.eup %8098 }
 0xece   :  { %v5296_v14 = vmul.f32 %v8099_v52, %v9427_v2 }
 0xed0   :  { %v5304_v23 = vpack.c.bf16 %v5296_v14, %v5296_v14 }
 0xed2   :  { %7801 = vmatmul.mubr.msk.bf16.vlgmr.msra.gmra.mrb[176].mxu0 %vm2015_vm2, %v5304_v23 }
 0xed3   :  { %7811 = vmatpush3.bf16.msra.mxu0 %v5633_v59  ;;  %7812 = vmatprep.mubr.msk.bf16.mxu0 %vm8141_vm1, %v8140_v7 }
 0xed4   :  { %7822 = vmatprep.subr.bf16.mxu0 %v8140_v7 }
 0xed5   :  { %v8101_v19 = vpop.eup %8100 }
 0xed6   :  { %v5298_v17 = vmul.f32 %v8101_v19, %v9431_v4 }
 0xed8   :  { %v5306_v62 = vpack.c.bf16 %v5298_v17, %v5298_v17 }
 0xeda   :  { %7813 = vmatmul.mubr.msk.bf16.vlgmr.msra.gmra.mrb[180].mxu0 %vm2015_vm2, %v5306_v62 }
 0xedb   :  { %7824 = vmatprep.mubr.msk.bf16.mxu0 %vm8141_vm1, %v8140_v7  ;;  %7823 = vmatpush3.bf16.msra.mxu0 %v5738_v0 }
 0xedc   :  { %7834 = vmatprep.subr.bf16.mxu0 %v8140_v7 }
 0xf77   :  { %v5347_v45 = vpop.f32.mrb[172].mxu1 }
 0xf78   :  { %v5675_v1 = vpack.c.bf16 %v5347_v45, %v5347_v45  ;;  %v7772_v2 = vpop.f32.mrb[173].mxu1 }
 0xf79   :  { %v5350_v4 = vpop.f32.mrb[174].mxu1 }
 0xf7a   :  { %v7773_v51 = vpop.f32.mrb[175].mxu1  ;;  %7819 = vmatmul.mubr.msk.bf16.vlgmr.msra.gmra.mrb[188].mxu1 %vm2015_vm2, %v5675_v1 }
 0xf7b   :  { %7829 = vmatpush3.bf16.msra.mxu1 %v5784_v3  ;;  %7830 = vmatprep.mubr.msk.bf16.mxu1 %vm8141_vm1, %v8140_v7 }
 0xf7c   :  { %7840 = vmatprep.subr.bf16.mxu1 %v8140_v7 }
 0xf7f   :  { %v5439_v6 = vpop.f32.mrb[176].mxu1 }
 0xf80   :  { %v5677_v8 = vpack.c.bf16 %v5439_v6, %v5439_v6  ;;  %v7784_v9 = vpop.f32.mrb[177].mxu1 }
 0xf81   :  { %v5442_v54 = vpop.f32.mrb[178].mxu1 }
 0xf82   :  { %v7785_v11 = vpop.f32.mrb[179].mxu1  ;;  %7831 = vmatmul.mubr.msk.bf16.vlgmr.msra.gmra.mrb[192].mxu1 %vm2015_vm2, %v5677_v8 }
 0xf83   :  { %7841 = vmatpush3.bf16.msra.mxu1 %v5692_v21  ;;  %7842 = vmatprep.mubr.msk.bf16.mxu1 %vm8141_vm1, %v8140_v7 }
 0xf84   :  { %7852 = vmatprep.subr.bf16.mxu1 %v8140_v7 }
 0xf87   :  { %v5531_v12 = vpop.f32.mrb[180].mxu1 }
 0xf88   :  { %v5679_v13 = vpack.c.bf16 %v5531_v12, %v5531_v12  ;;  %v7796_v63 = vpop.f32.mrb[181].mxu1 }
 0xf89   :  { %v5534_v16 = vpop.f32.mrb[182].mxu1  ;;  %v6781_v63 = vld [vmem:[%s9665_s13 + $0x1] ss:$0 sm:$0xff] }
 0xf8a   :  { %v7797_v18 = vpop.f32.mrb[183].mxu1  ;;  %7843 = vmatmul.mubr.msk.bf16.vlgmr.msra.gmra.mrb[196].mxu1 %vm2015_vm2, %v5679_v13 }
 0xf8b   :  { %7853 = vmatpush3.bf16.msra.mxu1 %v5784_v3  ;;  %7854 = vmatprep.mubr.msk.bf16.mxu1 %vm8141_vm1, %v8140_v7 }
 0xf8c   :  { %7864 = vmatprep.subr.bf16.mxu1 %v8140_v7 }
 0xf8f   :  { %v5623_v20 = vpop.f32.mrb[184].mxu1 }
 0xf90   :  { %v5681_v28 = vpack.c.bf16 %v5623_v20, %v5623_v20  ;;  %v7808_v22 = vpop.f32.mrb[185].mxu1 }
 0xf91   :  { %v5626_v24 = vpop.f32.mrb[186].mxu1 }
 0xf92   :  { %v7809_v27 = vpop.f32.mrb[187].mxu1  ;;  %7855 = vmatmul.mubr.msk.bf16.vlgmr.msra.gmra.mrb[200].mxu1 %vm2015_vm2, %v5681_v28 }
 0xf93   :  { %7868 = vmatprep.mubr.msk.bf16.mxu1 %vm8141_vm1, %v8140_v7 }
 0xf95   :  { %v5393_v61 = vpop.f32.mrb[168].mxu0 }
 0xf96   :  { %v5676_v31 = vpack.c.bf16 %v5393_v61, %v5393_v61  ;;  %v7778_v32 = vpop.f32.mrb[169].mxu0 }
 0xf97   :  { %v5396_v34 = vpop.f32.mrb[170].mxu0 }
 0xf98   :  { %v7779_v35 = vpop.f32.mrb[171].mxu0  ;;  %7825 = vmatmul.mubr.msk.bf16.vlgmr.msra.gmra.mrb[184].mxu0 %vm2015_vm2, %v5676_v31 }
 0xf99   :  { %7835 = vmatpush3.bf16.msra.mxu0 %v5830_v44  ;;  %7836 = vmatprep.mubr.msk.bf16.mxu0 %vm8141_vm1, %v8140_v7 }
 0xf9a   :  { %7846 = vmatprep.subr.bf16.mxu0 %v8140_v7 }
 0xf9d   :  { %v5485_v26 = vpop.f32.mrb[172].mxu0 }
 0xf9e   :  { %v5678_v58 = vpack.c.bf16 %v5485_v26, %v5485_v26  ;;  %v7790_v38 = vpop.f32.mrb[173].mxu0 }
 0xf9f   :  { %v5488_v39 = vpop.f32.mrb[174].mxu0 }
 0xfa0   :  { %v7791_v40 = vpop.f32.mrb[175].mxu0  ;;  %7837 = vmatmul.mubr.msk.bf16.vlgmr.msra.gmra.mrb[188].mxu0 %vm2015_vm2, %v5678_v58 }
 0xfa1   :  { %7847 = vmatpush3.bf16.msra.mxu0 %v5738_v0  ;;  %7848 = vmatprep.mubr.msk.bf16.mxu0 %vm8141_vm1, %v8140_v7 }
 0xfa2   :  { %7858 = vmatprep.subr.bf16.mxu0 %v8140_v7 }
 0xfa5   :  { %v5577_v41 = vpop.f32.mrb[176].mxu0 }
 0xfa6   :  { %v5680_v42 = vpack.c.bf16 %v5577_v41, %v5577_v41  ;;  %v7802_v30 = vpop.f32.mrb[177].mxu0 }
 0xfa7   :  { %v5580_v60 = vpop.f32.mrb[178].mxu0 }
 0xfa8   :  { %v7803_v43 = vpop.f32.mrb[179].mxu0  ;;  %7849 = vmatmul.mubr.msk.bf16.vlgmr.msra.gmra.mrb[192].mxu0 %vm2015_vm2, %v5680_v42 }
 0xfa9   :  { %7859 = vmatpush3.bf16.msra.mxu0 %v5830_v44  ;;  %7860 = vmatprep.mubr.msk.bf16.mxu0 %vm8141_vm1, %v8140_v7 }
 0xfaa   :  { %7872 = vmatprep.subr.bf16.mxu0 %v8140_v7 }
 0xfad   :  { %v5669_v46 = vpop.f32.mrb[180].mxu0 }
 0xfae   :  { %v5682_v33 = vpack.c.bf16 %v5669_v46, %v5669_v46  ;;  %v7814_v47 = vpop.f32.mrb[181].mxu0 }
 0xfaf   :  { %v5672_v48 = vpop.f32.mrb[182].mxu0 }
 0xfb0   :  { %v7815_v56 = vpop.f32.mrb[183].mxu0  ;;  %7861 = vmatmul.mubr.msk.bf16.vlgmr.msra.gmra.mrb[196].mxu0 %vm2015_vm2, %v5682_v33 }
 0xfb1   :  { %7888 = vmatprep.mubr.msk.bf16.mxu0 %vm8141_vm1, %v8140_v7 }
0x104d   :  { %v5728_v50 = vpop.f32.mrb[188].mxu1 }
0x104e   :  { %v7820_v25 = vpop.f32.mrb[189].mxu1  ;;  %v6044_v37 = vsel %vm699_vm0, %v5728_v50, 0.0  ;;  %v8010_v50 = vld [vmem:[%s9668_s16 + $0x10] sm:$0xff]  }
0x104f   :  { %v5731_v15 = vpop.f32.mrb[190].mxu1  ;;  %7865 = vmatpush3.bf16.msra.mxu1 %v8010_v50  ;;  %v8011_v25 = vld [vmem:[%s9668_s16 + $0x18] sm:$0xff]  }
0x1050   :  { %v7821_v36 = vpop.f32.mrb[191].mxu1  ;;  %7866 = vmatprep.subr.bf16.mxu1 %v8140_v7 }
0x1053   :  { %7867 = vmatpush3.bf16.msra.mxu1 %v8011_v25 }
0x1054   :  { %7892 = vmatprep.subr.bf16.mxu1 %v8140_v7 }
0x1055   :  { %v5820_v5 = vpop.f32.mrb[192].mxu1 }
0x1056   :  { %v7832_v52 = vpop.f32.mrb[193].mxu1  ;;  %v6047_v4 = vsel %vm699_vm0, %v5820_v5, 0.0 }
0x1057   :  { %v5823_v57 = vpop.f32.mrb[194].mxu1 }
0x1058   :  { %v7833_v14 = vpop.f32.mrb[195].mxu1 }
0x105d   :  { %v5909_v23 = vpop.f32.mrb[196].mxu1 }
0x105e   :  { %v7844_v59 = vpop.f32.mrb[197].mxu1  ;;  %v6051_v22 = vsel %vm699_vm0, %v5909_v23, 0.0 }
0x105f   :  { %v5912_v19 = vpop.f32.mrb[198].mxu1 }
0x1060   :  { %v7845_v17 = vpop.f32.mrb[199].mxu1  ;;  %v6784_v19 = vld [vmem:[%s9666_s14 + $0x1] ss:$0 sm:$0xff] }
0x1065   :  { %v5995_v62 = vpop.f32.mrb[200].mxu1 }
0x1066   :  { %v7856_v10 = vpop.f32.mrb[201].mxu1  ;;  %v6054_v31 = vsel %vm699_vm0, %v5995_v62, 0.0 }
0x1067   :  { %v5998_v21 = vpop.f32.mrb[202].mxu1 }
0x1068   :  { %v7857_v49 = vpop.f32.mrb[203].mxu1  ;;  %v6785_v21 = vld [vmem:[%s9667_s15 + $0x1] ss:$0 sm:$0xff] }
0x106b   :  { %v5774_v0 = vpop.f32.mrb[184].mxu0 }
0x106c   :  { %v6045_v45 = vsel %vm699_vm0, %v5774_v0, 0.0  ;;  %v7826_v1 = vpop.f32.mrb[185].mxu0 }
0x106d   :  { %v6046_v2 = vadd.f32 %v6045_v45, %v6044_v37  ;;  %v5777_v3 = vpop.f32.mrb[186].mxu0  ;;  %v8012_v1 = vld [vmem:[%s9670_s18 + $0x40] sm:$0xff]  }
0x106e   :  { %v7827_v51 = vpop.f32.mrb[187].mxu0  ;;  %7873 = vmatpush3.bf16.msra.mxu0 %v8012_v1  ;;  %v8014_v3 = vld [vmem:[%s9670_s18 + $0x50] sm:$0xff]  }
0x106f   :  { %v6048_v6 = vadd.f32 %v6047_v4, %v6046_v2  ;;  %7874 = vmatprep.subr.bf16.mxu0 %v8140_v7  ;;  %v8013_v2 = vld [vmem:[%s9670_s18 + $0x48] sm:$0xff]   ;;  %v8015_v4 = vld [vmem:[%s9670_s18 + $0x58] sm:$0xff]   ;;  %v8016_v51 = vld [vmem:[%s9670_s18 + $0x60] sm:$0xff]  }
0x1072   :  { %7875 = vmatpush3.bf16.msra.mxu0 %v8013_v2 }
0x1073   :  { %v5866_v8 = vpop.f32.mrb[188].mxu0  ;;  %7876 = vmatprep.subr.bf16.mxu0 %v8140_v7 }
0x1074   :  { %v6049_v9 = vsel %vm699_vm0, %v5866_v8, 0.0  ;;  %v7838_v54 = vpop.f32.mrb[189].mxu0  ;;  %v8018_v8 = vld [vmem:[%s9670_s18 + $0x70] sm:$0xff]  }
0x1075   :  { %v6050_v11 = vadd.f32 %v6049_v9, %v6048_v6  ;;  %v5869_v12 = vpop.f32.mrb[190].mxu0  ;;  %v8017_v6 = vld [vmem:[%s9670_s18 + $0x68] sm:$0xff]   ;;  %v8019_v9 = vld [vmem:[%s9670_s18 + $0x78] sm:$0xff]   ;;  %v6791_v54 = vld [vmem:[%s9669_s17 + $0x1] ss:$0 sm:$0xff] }
0x1076   :  { %v7839_v13 = vpop.f32.mrb[191].mxu0  ;;  %7877 = vmatpush3.bf16.msra.mxu0 %v8014_v3  ;;  %v6822_v3 = vld [vmem:[%s9673_s21] ss:$0 sm:$0xff]  ;;  %s8143_s21 = smov [#allocation2]  }
0x1077   :  { %v6058_v16 = vadd.f32 %v6050_v11, %v9050_v53  ;;  %7878 = vmatprep.subr.bf16.mxu0 %v8140_v7  ;;  %s6464_s14 = sshll.u32 %s8143_s21, 4  ;;  %s6465_s14 = int_to_ptr.vmem [resolvable:$true] %s6464_s14 }
0x1078   :  { %s8116_s8 = scalar_lea.vmem %s6465_s14, 32  ;;  %p8121_p1 = scmp.lt.s32.totalorder %s6465_s14, %s6465_s14 }
0x1079   :  { %v9547_v18 = vadd.f32 %v6781_v63, %v6058_v16  ;;  %p8117_p0 = scmp.ne.s32.totalorder %s6465_s14, %s8116_s8  ;;  %p8122_p2 = scmp.lt.s32.totalorder %s8116_s8, %s8116_s8 }
0x107a   :  { %7879 = vmatpush3.bf16.msra.mxu0 %v8015_v4 }
0x107b   :  { %v5952_v20 = vpop.f32.mrb[192].mxu0  ;;  %v6074_v28 = vsel %vm699_vm0, %v9547_v18, 0.0  ;;  %7880 = vmatprep.subr.bf16.mxu0 %v8140_v7  ;;  %p8123_p3 = por %p8122_p2, %p8121_p1 }
0x107c   :  { %v6052_v24 = vsel %vm699_vm0, %v5952_v20, 0.0  ;;  %6075 = vadd.xlane.f32.xlu0 %v6074_v28  ;;  %v7850_v27 = vpop.f32.mrb[193].mxu0 }
0x107d   :  { %v6053_v29 = vadd.f32 %v6052_v24, %v6051_v22  ;;  %v5955_v61 = vpop.f32.mrb[194].mxu0  ;;  %p8124_p4 = pnand %p8123_p3, %p8117_p0 }
0x107e   :  { %v7851_v32 = vpop.f32.mrb[195].mxu0  ;;  %7881 = vmatpush3.bf16.msra.mxu0 %v8016_v51 }
0x107f   :  { %v6055_v44 = vadd.f32 %v6054_v31, %v6053_v29  ;;  %7882 = vmatprep.subr.bf16.mxu0 %v8140_v7 }
0x1082   :  { %7883 = vmatpush3.bf16.msra.mxu0 %v8017_v6 }
0x1083   :  { %v6038_v34 = vpop.f32.mrb[196].mxu0  ;;  %7884 = vmatprep.subr.bf16.mxu0 %v8140_v7 }
0x1084   :  { %v6056_v53 = vsel %vm699_vm0, %v6038_v34, 0.0  ;;  %v7862_v35 = vpop.f32.mrb[197].mxu0 }
0x1085   :  { %v6057_v26 = vadd.f32 %v6056_v53, %v6055_v44  ;;  %v6041_v58 = vpop.f32.mrb[198].mxu0 }
0x1086   :  { %v7863_v38 = vpop.f32.mrb[199].mxu0  ;;  %7885 = vmatpush3.bf16.msra.mxu0 %v8018_v8 }
0x1087   :  { %v6059_v39 = vadd.f32 %v6057_v26, %v9053_v55  ;;  %7886 = vmatprep.subr.bf16.mxu0 %v8140_v7 }
0x1089   :  { %v9556_v40 = vadd.f32 %v6781_v63, %v6059_v39 }
0x108a   :  { %7887 = vmatpush3.bf16.msra.mxu0 %v8019_v9 }
0x108b   :  { %v6077_v41 = vsel %vm699_vm0, %v9556_v40, 0.0 }
0x108c   :  { %6078 = vadd.xlane.f32.xlu1 %v6077_v41 }
0x1109   :  { %v6076_v42 = vpop.xlane.xlu0 %6075 }
0x110a   :  { %v6080_v30 = vmul.f32 0.03125, %v6076_v42 }
0x110c   :  { %v6082_v60 = vsub.f32 %v9547_v18, %v6080_v30 }
0x110e   :  { %v6084_v43 = vmul.f32 %v6082_v60, %v6082_v60 }
0x1110   :  { %v6086_v46 = vsel %vm699_vm0, %v6084_v43, 0.0 }
0x1111   :  { %6087 = vadd.xlane.f32.xlu0 %v6086_v46 }
0x1119   :  { %v6079_v33 = vpop.xlane.xlu1 %6078 }
0x111a   :  { %v6081_v47 = vmul.f32 0.03125, %v6079_v33 }
0x111c   :  { %v6083_v48 = vsub.f32 %v9556_v40, %v6081_v47 }
0x111e   :  { %v6085_v56 = vmul.f32 %v6083_v48, %v6083_v48 }
0x1120   :  { %v6089_v55 = vsel %vm699_vm0, %v6085_v56, 0.0 }
0x1121   :  { %6090 = vadd.xlane.f32.xlu1 %v6089_v55 }
0x119e   :  { %v6088_v15 = vpop.xlane.xlu0 %6087 }
0x119f   :  { %v6092_v36 = vmul.f32 0.03125, %v6088_v15 }
0x11a1   :  { %v6094_v5 = vadd.f32 1e-06, %v6092_v36 }
0x11a3   :  { %8102 = vrsqrt.f32 %v6094_v5 }
0x11ad   :  { %v8103_v23 = vpop.eup %8102 }
0x11ae   :  { %v6091_v52 = vpop.xlane.xlu1 %6090  ;;  %v6098_v59 = vmul.f32 %v8103_v23, %v6082_v60  ;;  %v6812_v60 = vld [vmem:[%s9671_s19 + $0x1] ss:$0 sm:$0xff] }
0x11af   :  { %v6093_v57 = vmul.f32 0.03125, %v6091_v52 }
0x11b0   :  { %v6106_v62 = vmul.f32 %v6784_v19, %v6098_v59 }
0x11b1   :  { %v6095_v14 = vadd.f32 1e-06, %v6093_v57 }
0x11b2   :  { %v6114_v0 = vadd.f32 %v6785_v21, %v6106_v62 }
0x11b3   :  { %8104 = vrsqrt.f32 %v6095_v14 }
0x11bd   :  { %v8105_v17 = vpop.eup %8104 }
0x11be   :  { %v6099_v10 = vmul.f32 %v8105_v17, %v6083_v48 }
0x11c0   :  { %v6107_v49 = vmul.f32 %v6784_v19, %v6099_v10  ;;  %v8021_v10 = vld [vmem:[%s9674_s22 + $0x8] sm:$0xff]  }
0x11c2   :  { %v6115_v37 = vadd.f32 %v6785_v21, %v6107_v49 }
0x11c4   :  { %v6116_v45 = vpack.c.bf16 %v6115_v37, %v6114_v0 }
0x11c6   :  { %7869 = vmatmul.mubr.msk.bf16.vlgmr.msra.gmra.mrb[204].mxu1 %vm699_vm0, %v6116_v45  ;;  %v6821_v45 = vld [vmem:[%s9672_s20] ss:$0 sm:$0xff] }
0x11c7   :  { %7896 = vmatprep.mubr.msk.bf16.mxu1 %vm8141_vm1, %v8140_v7 }
0x1299   :  { %v6179_v11 = vpop.f32.mrb[204].mxu1 }
0x129a   :  { %v6180_v12 = vadd.f32 %v6791_v54, %v6179_v11  ;;  %v7870_v13 = vpop.f32.mrb[205].mxu1 }
0x129b   :  { %v6182_v63 = vpop.f32.mrb[206].mxu1 }
0x129c   :  { %v6188_v16 = vmul.f32 %v6180_v12, %v6180_v12  ;;  %v6183_v20 = vadd.f32 %v6791_v54, %v6182_v63  ;;  %v7871_v28 = vpop.f32.mrb[207].mxu1  ;;  %v6186_v58 = vmul.f32 0.5, %v6180_v12 }
0x129e   :  { %v6190_v22 = vmul.f32 %v6188_v16, %v6180_v12  ;;  %v6189_v24 = vmul.f32 %v6183_v20, %v6183_v20  ;;  %v6187_v38 = vmul.f32 0.5, %v6183_v20 }
0x12a0   :  { %v6192_v27 = vmul.f32 0.044715, %v6190_v22  ;;  %v6191_v29 = vmul.f32 %v6189_v24, %v6183_v20 }
0x12a2   :  { %v6194_v61 = vadd.f32 %v6192_v27, %v6180_v12  ;;  %v6193_v31 = vmul.f32 0.044715, %v6191_v29 }
0x12a4   :  { %v6196_v32 = vmul.f32 0.7978846, %v6194_v61  ;;  %v6195_v44 = vadd.f32 %v6193_v31, %v6183_v20  ;;  %v6823_v20 = vld [vmem:[%s9675_s23] ss:$0 sm:$0xff] }
0x12a6   :  { %8106 = vtanh.f32 %v6196_v32  ;;  %v6197_v34 = vmul.f32 0.7978846, %v6195_v44 }
0x12a8   :  { %8108 = vtanh.f32 %v6197_v34 }
0x12b0   :  { %v8107_v53 = vpop.eup %8106 }
0x12b1   :  { %v6200_v35 = vadd.f32 1.0, %v8107_v53 }
0x12b2   :  { %v8109_v26 = vpop.eup %8108 }
0x12b3   :  { %v6201_v39 = vadd.f32 1.0, %v8109_v26  ;;  %v6202_v41 = vmul.f32 %v6200_v35, %v6186_v58 }
0x12b5   :  { %v6203_v42 = vmul.f32 %v6201_v39, %v6187_v38 }
0x12b7   :  { %v6204_v30 = vpack.c.bf16 %v6203_v42, %v6202_v41 }
0x12b9   :  { %7889 = vmatmul.mubr.bf16.vlgmr.msra.gmra.mrb[200].mxu0 %v6204_v30 }
0x138c   :  { %v6312_v43 = vpop.f32.mrb[200].mxu0 }
0x138d   :  { %v7890_v46 = vpop.f32.mrb[201].mxu0  ;;  %v6313_v47 = vadd.f32 %v6812_v60, %v6312_v43 }
0x138e   :  { %v6315_v33 = vpop.f32.mrb[202].mxu0 }
0x138f   :  { %v6316_v48 = vadd.f32 %v6812_v60, %v6315_v33  ;;  %v7891_v56 = vpop.f32.mrb[203].mxu0  ;;  %v6319_v50 = vadd.f32 %v6313_v47, %v9547_v18  ;;  %v8020_v18 = vld [vmem:[%s9674_s22] sm:$0xff]  }
0x1390   :  { %7893 = vmatpush3.bf16.msra.mxu1 %v8020_v18 }
0x1391   :  { %v6320_v55 = vadd.f32 %v6316_v48, %v9556_v40  ;;  %7894 = vmatprep.subr.bf16.mxu1 %v8140_v7 }
0x1393   :  { %v6325_v25 = vrot.slane %v6320_v55, 7 }
0x1394   :  { %7895 = vmatpush3.bf16.msra.mxu1 %v8021_v10 }
0x1395   :  { %v6327_v15 = vsel %vm6326_vm5, %v6325_v25, %v6319_v50 }
0x1396   :  { %v6330_v36 = vsel %vm6329_vm6, %v6327_v15, 0.0 }
0x1397   :  { %6331 = vadd.xlane.f32.xlu0 %v6330_v36 }
0x1424   :  { %v6332_v5 = vpop.xlane.xlu0 %6331 }
0x1425   :  { %v6333_v52 = vmul.f32 0.03125, %v6332_v5 }
0x1427   :  { %v6335_v57 = vrot.slane %v6333_v52, 1  ;;  %v6338_v14 = vsub.f32 %v6319_v50, %v6333_v52 }
0x1429   :  { %v6339_v23 = vsub.f32 %v6320_v55, %v6335_v57  ;;  %v6340_v19 = vmul.f32 %v6338_v14, %v6338_v14 }
0x142b   :  { %v6341_v59 = vmul.f32 %v6339_v23, %v6339_v23 }
0x142d   :  { %v6344_v17 = vrot.slane %v6341_v59, 7 }
0x142f   :  { %v6345_v62 = vsel %vm6326_vm5, %v6344_v17, %v6340_v19 }
0x1430   :  { %v6347_v40 = vsel %vm6329_vm6, %v6345_v62, 0.0 }
0x1431   :  { %6348 = vadd.xlane.f32.xlu1 %v6347_v40 }
0x14be   :  { %v6349_v21 = vpop.xlane.xlu1 %6348 }
0x14bf   :  { %v6350_v49 = vmul.f32 0.03125, %v6349_v21 }
0x14c1   :  { %v6351_v0 = vadd.f32 1e-06, %v6350_v49 }
0x14c3   :  { %8110 = vrsqrt.f32 %v6351_v0 }
0x14cd   :  { %v8111_v37 = vpop.eup %8110 }
0x14ce   :  { %v6354_v1 = vrot.slane %v8111_v37, 1  ;;  %v6357_v2 = vmul.f32 %v8111_v37, %v6338_v14 }
0x14d0   :  { %v6358_v4 = vmul.f32 %v6354_v1, %v6339_v23  ;;  %v6365_v51 = vmul.f32 %v6821_v45, %v6357_v2 }
0x14d2   :  { %v6366_v6 = vmul.f32 %v6821_v45, %v6358_v4  ;;  %v6373_v7 = vadd.f32 %v6822_v3, %v6365_v51 }
0x14d4   :  { %v6374_v8 = vadd.f32 %v6822_v3, %v6366_v6  ;;  %v6375_v9 = vpack.c.bf16 %v6373_v7, %v6373_v7 }
0x14d6   :  { %v6376_v54 = vpack.c.bf16 %v6374_v8, %v6374_v8  ;;  %v6390_v12 = vunpack.c.l.b16 %v6375_v9 }
0x14d8   :  { %v6391_v11 = vunpack.c.l.b16 %v6376_v54 }
0x14da   :  { %v6392_v13 = vrot.slane %v6391_v11, 7 }
0x14dc   :  { %v6393_v63 = vsel %vm6326_vm5, %v6392_v13, %v6390_v12 }
0x14dd   :  { %v6394_v16 = vpack.c.b16 %v6393_v63, %v6393_v63 }
0x14df   :  { %7897 = vmatmul.mubr.msk.bf16.vlgmr.msra.gmra.mrb[208].mxu1 %vm699_vm0, %v6394_v16 }
0x15b2   :  { %v6444_v28 = vpop.f32.mrb[208].mxu1 }
0x15b3   :  { %v6445_v22 = vadd.f32 %v6823_v20, %v6444_v28  ;;  %v7898_v24 = vpop.f32.mrb[209].mxu1 }
0x15b4   :  { %v6447_v27 = vpop.f32.mrb[210].mxu1 }
0x15b5   :  { %v6450_v29 = vsub.f32 0.0, %v6445_v22  ;;  %v7899_v61 = vpop.f32.mrb[211].mxu1 }
0x15b7   :  { %v6451_v31 = vmul.f32 1.442695, %v6450_v29 }
0x15b9   :  { %8112 = vpow2.f32 %v6451_v31 }
0x15c3   :  { %v8113_v32 = vpop.eup %8112 }
0x15c4   :  { %v6453_v44 = vadd.f32 1.0, %v8113_v32 }
0x15c6   :  { %8114 = vrcp.f32 %v6453_v44 }
0x15d0   :  { %v8115_v34 = vpop.eup %8114 }
0x15d1   :  { %6457 = vst.msk [vmem:[#allocation2] sm:$0x3] %vm6456_vm7, %v8115_v34 }
0x15d2   :  { %8127 = shalt.err (!%p8124_p4)
}
0x15d3   :  { %s8128_s11 = scalar_lea.hbm %s9676_s24, 32 }
0x15d4   :  { %p8129_p5 = scmp.ne.s32.totalorder %s9676_s24, %s8128_s11  ;;  %p8132_p6 = scmp.lt.u32.totalorder %s8128_s11, %s9676_s24 }
0x15d6   :  { %p8134_p7 = pnand %p8132_p6, %p8129_p5 }
0x15d8   :  { %8137 = shalt.err (!%p8134_p7)
}
0x15d9   :  { %6467 = dma.vmem_to_hbm [thread:$0]  %s6465_s14, 32, %s9676_s24, [#allocation3]  }
0x15da   :  { %8138 = dma.done.wait [#allocation3], 32  }
0x15db   :  { %8139 = vsyncadd [#allocation3], 4294967264 }
0x15dc   :  { %6471 = vsyncpa [#allocation3], 1 }

</bundles_post_ra>
